<compile_context>
chip_gen: v7x
topology: tpu7x:2x2x1
jax: 0.10.0
libtpu: 0.0.40
codegen_flags: <defaults>
</compile_context>

<pallas_src>
import functools

import jax
import jax.numpy as jnp
from jax import lax
from jax.experimental import pallas as pl
from jax.experimental.pallas import tpu as pltpu


def _round_up(x, m):
    return (x + m - 1) // m * m


# _PHASE_MIX[a, r, ky] = 1 if conv-kernel row ky, evaluated at output sub-pixel
# row-phase a, reads window row r of the padded ORIGINAL-resolution input
# (same matrix is used for columns / phase b).
_PHASE_MIX = jnp.array(
    [[[1., 0., 0.], [0., 1., 1.], [0., 0., 0.]],
     [[0., 0., 0.], [1., 1., 0.], [0., 0., 1.]]], dtype=jnp.float32)


def _upblock_kernel(xa_ref, xb0_ref, xb1_ref, w_ref, bias_ref, o_ref, *,
                    tile_h, Wp, Cin):
    """One (batch, row-tile, channel-group) grid step.

    xa_ref  : (1, tile_h, Wp, Cin)  rows [t*tile_h, (t+1)*tile_h) of the padded input
    xb0/1   : (1, 1, Wp, Cin)       the two halo rows just below the tile
    w_ref   : (9, Cin, cg)          tap-major, BN/upsample-folded conv weights
    bias_ref: (1, cg)               folded BN bias (f32)
    o_ref   : (1, 1, tile_h*Wp, cg) rows = tile pixels (row-major over (i, j<Wp)),
                                    lanes = (row-phase, col-phase, cout) group
    """
    cg = o_ref.shape[-1]

    def conv_rows(flat, n_rows):
        # flat: (n_rows*Wp, Cin).  Returns the folded 3x3 conv for output rows
        # [0, n_rows-2); later rows contain roll wrap-around and must be ignored.
        rows = n_rows * Wp
        acc = jnp.zeros((rows, cg), jnp.float32)
        for r in range(3):
            for s in range(3):
                d = r * Wp + s                      # flattened (row, col) tap offset
                y = jnp.dot(flat, w_ref[3 * r + s],
                            preferred_element_type=jnp.float32)
                # acc[q] += y[q + d]  (shift on the f32 matmul OUTPUT via the XLU)
                acc = acc + (y if d == 0 else pltpu.roll(y, rows - d, 0))
        return acc

    # Main body: output rows whose 3-row windows stay inside this tile.
    flat = xa_ref[0].reshape(tile_h * Wp, Cin)       # free relabel (Wp % 16 == 0)
    acc_main = conv_rows(flat, tile_h)               # valid rows [0, (tile_h-2)*Wp)

    # Last 2 output rows need the 2 halo rows below the tile: tiny 4-row window.
    tail_win = jnp.concatenate(
        [xa_ref[0, tile_h - 2:, :, :], xb0_ref[0], xb1_ref[0]], axis=0)  # (4, Wp, Cin)
    acc_tail = conv_rows(tail_win.reshape(4 * Wp, Cin), 4)   # valid rows [0, 2*Wp)

    bias = bias_ref[...]                              # (1, cg) f32
    y_main = jnp.maximum(acc_main + bias, 0.0).astype(o_ref.dtype)
    y_tail = jnp.maximum(acc_tail[:2 * Wp] + bias, 0.0).astype(o_ref.dtype)
    o_ref[0, 0] = y_main                              # lane-dense full-block store
    o_ref[0, 0, (tile_h - 2) * Wp:, :] = y_tail       # overwrite the 2 boundary rows


def upblock_forward(x_nchw, weight, gamma, beta, run_mean, run_var, *,
                    eps=1e-5, tile_h=None, compute_dtype=jnp.float32,
                    out_dtype=jnp.float32, channels_last_out=False):
    """UPBlock forward (BatchNorm in eval mode).

    x_nchw: (N, Cin, H, W); weight: (Cout, Cin, 3, 3) with Cout = Cin // 2.
    Returns (N, Cout, 2H, 2W) (or (N, 2H, 2W, Cout) if channels_last_out).
    """
    N, Cin, H, W = x_nchw.shape
    Cout = weight.shape[0]
    assert weight.shape == (Cout, Cin, 3, 3), weight.shape
    assert H >= 3, "H >= 3 required"
    f32 = jnp.float32
    Cout4 = 4 * Cout
    Cout4p = _round_up(Cout4, 128)         # lane-dense output -> unmasked stores
    Wp = _round_up(W + 2, 16)              # sublane-aligned width (f32 and bf16)

    # -------- one-time parameter folding (XLA, O(9*Cin*Cout)) --------------------
    w = jnp.transpose(weight, (2, 3, 1, 0)).astype(f32)            # (ky, kx, Cin, Cout)
    inv_std = lax.rsqrt(run_var.astype(f32) + eps)
    scale = gamma.astype(f32) * inv_std                            # (Cout,)
    bias = beta.astype(f32) - run_mean.astype(f32) * scale         # (Cout,)
    w = w * scale[None, None, None, :]                             # fold BN scale
    # Fold the x2-nearest upsample: 4 phase-specific 3x3 weight sets over the padded
    # ORIGINAL input.  Output axis order is (r, s, c, a, b, co) -- co minor.
    w_phase = jnp.einsum('ark,bsl,klcd->rscabd', _PHASE_MIX, _PHASE_MIX, w)
    assert w_phase.shape == (3, 3, Cin, 2, 2, Cout)
    w_taps = w_phase.reshape(9, Cin, Cout4)                        # tap (3r+s) major
    # Bias columns MUST follow the same (a, b, co) ordering as the weight columns.
    bias_cols = jnp.broadcast_to(bias[None, None, :], (2, 2, Cout)).reshape(Cout4)
    # Zero-pad the lane dim (phase x Cout) up to a multiple of 128.
    w_taps = jnp.pad(w_taps, ((0, 0), (0, 0), (0, Cout4p - Cout4))).astype(compute_dtype)
    bias_cols = jnp.pad(bias_cols, (0, Cout4p - Cout4)).reshape(1, Cout4p).astype(f32)

    # -------- input prep: NHWC + zero pad (no overlapping tile copies) -----------
    x = jnp.transpose(x_nchw, (0, 2, 3, 1)).astype(compute_dtype)  # (N, H, W, Cin)
    xp = jnp.pad(x, ((0, 0), (1, 1), (1, Wp - (W + 1)), (0, 0)))   # (N, H+2, Wp, Cin)

    # -------- tile / channel-group selection from a VMEM budget ------------------
    c_sz = jnp.dtype(compute_dtype).itemsize
    o_sz = jnp.dtype(out_dtype).itemsize
    vmem_cap = 64 * 1024 * 1024            # v7x physical VMEM (smallest generation)
    try:
        cap = getattr(pltpu.get_tpu_info(), "vmem_capacity_bytes", None)
        if cap:
            vmem_cap = int(cap)
    except Exception:
        pass
    budget = int(0.55 * vmem_cap)

    # Channel group: bound the (double-buffered) resident weight block.
    n128 = Cout4p // 128
    cg = 128
    for d in range(1, n128 + 1):
        if n128 % d:
            continue
        cand = Cout4p // d                  # largest candidate first
        if 2 * 9 * Cin * cand * c_sz <= budget // 4 or cand == 128:
            cg = cand
            break
    n_cg = Cout4p // cg

    def step_bytes(th, cg_):
        a_blk = 2 * th * Wp * Cin * c_sz            # double-buffered input tile
        halo = 2 * 2 * Wp * Cin * c_sz              # two 1-row halo blocks
        w_blk = 2 * (9 * Cin * cg_ * c_sz + 4 * cg_)
        o_blk = 2 * th * Wp * cg_ * o_sz
        live = th * Wp * (2 * cg_ * 4 + Cin * c_sz)  # acc + rolled temp + flat
        tail = 4 * Wp * (3 * Cin * c_sz + 2 * cg_ * 4)
        return a_blk + halo + w_blk + o_blk + live + tail

    if tile_h is None:
        divs = sorted((d for d in range(3, H + 1) if H % d == 0), reverse=True)
        fitting = [d for d in divs if step_bytes(d, cg) <= budget] or [divs[-1]]
        tile_h = fitting[0]
        # v7x has 2 TensorCores: keep >= 4 parallel grid steps when possible.
        for d in fitting:
            if N * (H // d) >= 4:
                tile_h = d
                break
    if H % tile_h or tile_h < 3:
        raise ValueError(f"tile_h={tile_h} must divide H={H} and be >= 3")
    T = H // tile_h
    vmem_limit = int(min(max(1.5 * step_bytes(tile_h, cg), 32 * 1024 * 1024),
                         0.92 * vmem_cap))

    kern = functools.partial(_upblock_kernel, tile_h=tile_h, Wp=Wp, Cin=Cin)

    out_flat = pl.pallas_call(
        kern,
        out_shape=jax.ShapeDtypeStruct((N, T, tile_h * Wp, Cout4p), out_dtype),
        grid_spec=pltpu.PrefetchScalarGridSpec(
            num_scalar_prefetch=0,
            grid=(N, T, n_cg),
            in_specs=[
                # main row tile (no halo, non-overlapping blocks of the padded input)
                pl.BlockSpec((1, tile_h, Wp, Cin),
                             lambda n, t, c: (n, t, 0, 0)),
                # the 2 halo rows below the tile, as two 1-row blocks of the SAME array
                pl.BlockSpec((1, 1, Wp, Cin),
                             lambda n, t, c: (n, (t + 1) * tile_h, 0, 0)),
                pl.BlockSpec((1, 1, Wp, Cin),
                             lambda n, t, c: (n, (t + 1) * tile_h + 1, 0, 0)),
                # folded weights / bias, tiled over channel groups (constant over n, t)
                pl.BlockSpec((9, Cin, cg), lambda n, t, c: (0, 0, c)),
                pl.BlockSpec((1, cg), lambda n, t, c: (0, c)),
            ],
            out_specs=pl.BlockSpec((1, 1, tile_h * Wp, cg),
                                   lambda n, t, c: (n, t, 0, c)),
        ),
        compiler_params=pltpu.CompilerParams(
            dimension_semantics=("parallel", "parallel", "arbitrary"),
            vmem_limit_bytes=vmem_limit),
    )(xp, xp, xp, w_taps, bias_cols)

    # -------- phase de-interleave (single fused XLA copy) ------------------------
    out = out_flat[..., :Cout4].reshape(N, T, tile_h, Wp, 2, 2, Cout)[:, :, :, :W]
    if channels_last_out:
        return out.transpose(0, 1, 2, 4, 3, 5, 6).reshape(N, 2 * H, 2 * W, Cout)
    return out.transpose(0, 6, 1, 2, 4, 3, 5).reshape(N, Cout, 2 * H, 2 * W)


def _reference(x_nchw, weight, gamma, beta, run_mean, run_var, eps=1e-5):
    """Plain-JAX reference of UPBlock.forward (BN in eval mode)."""
    x = jnp.repeat(jnp.repeat(x_nchw, 2, axis=2), 2, axis=3)
    y = lax.conv_general_dilated(
        x.astype(jnp.float32), weight.astype(jnp.float32),
        window_strides=(1, 1), padding=((1, 1), (1, 1)),
        dimension_numbers=("NCHW", "OIHW", "NCHW"))
    inv_std = 1.0 / jnp.sqrt(run_var + eps)
    y = (y - run_mean[None, :, None, None]) * inv_std[None, :, None, None]
    y = y * gamma[None, :, None, None] + beta[None, :, None, None]
    return jnp.maximum(y, 0.0)


if __name__ == "__main__":
    N, Cin, H, W = 2, 4, 16, 16
    Cout = Cin // 2

    key = jax.random.PRNGKey(0)
    kx, kw = jax.random.split(key)

    x = jax.random.normal(kx, (N, Cin, H, W), dtype=jnp.float32)
    weight = 0.1 * jax.random.normal(kw, (Cout, Cin, 3, 3), dtype=jnp.float32)
    gamma = 1.0 + 0.1 * jnp.arange(Cout, dtype=jnp.float32)
    beta = 0.05 * jnp.arange(Cout, dtype=jnp.float32)
    run_mean = 0.02 * jnp.arange(Cout, dtype=jnp.float32)
    run_var = 1.0 + 0.1 * jnp.arange(Cout, dtype=jnp.float32)

    ref = _reference(x, weight, gamma, beta, run_mean, run_var)

    # f32 path (numerically faithful to the module); auto tiling -> grid (2, 2, 1),
    # which exercises the halo logic across a real (non-padding) tile boundary.
    out = jax.block_until_ready(
        upblock_forward(x, weight, gamma, beta, run_mean, run_var))
    assert out.shape == (N, Cout, 2 * H, 2 * W), out.shape
    assert jnp.allclose(out, ref, atol=1e-4, rtol=1e-4), \
        float(jnp.max(jnp.abs(out - ref)))

    # bf16 I/O path (bandwidth-optimized; f32 accumulation + f32 epilogue).
    out_bf16 = jax.block_until_ready(
        upblock_forward(x, weight, gamma, beta, run_mean, run_var,
                        compute_dtype=jnp.bfloat16))
    assert out_bf16.shape == (N, Cout, 2 * H, 2 * W), out_bf16.shape
    assert float(jnp.max(jnp.abs(out_bf16 - ref))) < 0.1

    print("KERNEL_OK")
</pallas_src>

<mosaic_0001>
module attributes {stable_mosaic.version = 11 : i64} {
  func.func @_upblock_kernel(%arg0: i32, %arg1: i32, %arg2: i32, %arg3: memref<1x8x32x4xf32, #tpu.memory_space<vmem>>, %arg4: memref<1x1x32x4xf32, #tpu.memory_space<vmem>>, %arg5: memref<1x1x32x4xf32, #tpu.memory_space<vmem>>, %arg6: memref<9x4x128xf32, #tpu.memory_space<vmem>>, %arg7: memref<1x128xf32, #tpu.memory_space<vmem>>, %arg8: memref<1x1x256x128xf32, #tpu.memory_space<vmem>>) attributes {dimension_semantics = [#tpu.dimension_semantics<parallel>, #tpu.dimension_semantics<parallel>, #tpu.dimension_semantics<arbitrary>], iteration_bounds = array<i64: 2, 2, 1>, scalar_prefetch = 0 : i64, scratch_operands = 0 : i64, tpu.core_type = #tpu.core_type<tc>, window_params = [{transform_indices = @transform_0, window_bounds = array<i64: 1, 8, 32, 4>}, {transform_indices = @transform_1, window_bounds = array<i64: 1, 1, 32, 4>}, {transform_indices = @transform_2, window_bounds = array<i64: 1, 1, 32, 4>}, {transform_indices = @transform_3, window_bounds = array<i64: 9, 4, 128>}, {transform_indices = @transform_4, window_bounds = array<i64: 1, 128>}, {transform_indices = @transform_5, window_bounds = array<i64: 1, 1, 256, 128>}]} {
    %c0 = arith.constant 0 : index
    %c0_0 = arith.constant 0 : index
    %c0_1 = arith.constant 0 : index
    %c0_2 = arith.constant 0 : index
    %0 = vector.load %arg3[%c0, %c0_0, %c0_1, %c0_2] : memref<1x8x32x4xf32, #tpu.memory_space<vmem>>, vector<1x8x32x4xf32>
    %1 = vector.shape_cast %0 : vector<1x8x32x4xf32> to vector<8x32x4xf32>
    %2 = vector.shape_cast %1 : vector<8x32x4xf32> to vector<256x4xf32>
    %cst = arith.constant 0.000000e+00 : f32
    %3 = vector.broadcast %cst : f32 to vector<256x128xf32>
    %c0_3 = arith.constant 0 : index
    %c0_4 = arith.constant 0 : index
    %c0_5 = arith.constant 0 : index
    %4 = vector.load %arg6[%c0_3, %c0_4, %c0_5] : memref<9x4x128xf32, #tpu.memory_space<vmem>>, vector<1x4x128xf32>
    %5 = vector.shape_cast %4 : vector<1x4x128xf32> to vector<4x128xf32>
    %cst_6 = arith.constant dense<0.000000e+00> : vector<256x128xf32>
    %6 = tpu.matmul %2, %5, %cst_6 {dimension_numbers = #tpu.dot_dimension_numbers<[1], [0], [0], [1], [0, 0, 1, 1], [], []>} : vector<256x4xf32>, vector<4x128xf32>, vector<256x128xf32> -> vector<256x128xf32>
    %7 = arith.addf %3, %6 : vector<256x128xf32>
    %c1 = arith.constant 1 : index
    %c0_7 = arith.constant 0 : index
    %c0_8 = arith.constant 0 : index
    %8 = vector.load %arg6[%c1, %c0_7, %c0_8] : memref<9x4x128xf32, #tpu.memory_space<vmem>>, vector<1x4x128xf32>
    %9 = vector.shape_cast %8 : vector<1x4x128xf32> to vector<4x128xf32>
    %cst_9 = arith.constant dense<0.000000e+00> : vector<256x128xf32>
    %10 = tpu.matmul %2, %9, %cst_9 {dimension_numbers = #tpu.dot_dimension_numbers<[1], [0], [0], [1], [0, 0, 1, 1], [], []>} : vector<256x4xf32>, vector<4x128xf32>, vector<256x128xf32> -> vector<256x128xf32>
    %c255_i32 = arith.constant 255 : i32
    %11 = tpu.dynamic_rotate %10 by %c255_i32 dim 0 : vector<256x128xf32>, i32 -> vector<256x128xf32>
    %12 = arith.addf %7, %11 : vector<256x128xf32>
    %c2 = arith.constant 2 : index
    %c0_10 = arith.constant 0 : index
    %c0_11 = arith.constant 0 : index
    %13 = vector.load %arg6[%c2, %c0_10, %c0_11] : memref<9x4x128xf32, #tpu.memory_space<vmem>>, vector<1x4x128xf32>
    %14 = vector.shape_cast %13 : vector<1x4x128xf32> to vector<4x128xf32>
    %cst_12 = arith.constant dense<0.000000e+00> : vector<256x128xf32>
    %15 = tpu.matmul %2, %14, %cst_12 {dimension_numbers = #tpu.dot_dimension_numbers<[1], [0], [0], [1], [0, 0, 1, 1], [], []>} : vector<256x4xf32>, vector<4x128xf32>, vector<256x128xf32> -> vector<256x128xf32>
    %c254_i32 = arith.constant 254 : i32
    %16 = tpu.dynamic_rotate %15 by %c254_i32 dim 0 : vector<256x128xf32>, i32 -> vector<256x128xf32>
    %17 = arith.addf %12, %16 : vector<256x128xf32>
    %c3 = arith.constant 3 : index
    %c0_13 = arith.constant 0 : index
    %c0_14 = arith.constant 0 : index
    %18 = vector.load %arg6[%c3, %c0_13, %c0_14] : memref<9x4x128xf32, #tpu.memory_space<vmem>>, vector<1x4x128xf32>
    %19 = vector.shape_cast %18 : vector<1x4x128xf32> to vector<4x128xf32>
    %cst_15 = arith.constant dense<0.000000e+00> : vector<256x128xf32>
    %20 = tpu.matmul %2, %19, %cst_15 {dimension_numbers = #tpu.dot_dimension_numbers<[1], [0], [0], [1], [0, 0, 1, 1], [], []>} : vector<256x4xf32>, vector<4x128xf32>, vector<256x128xf32> -> vector<256x128xf32>
    %c224_i32 = arith.constant 224 : i32
    %21 = tpu.dynamic_rotate %20 by %c224_i32 dim 0 : vector<256x128xf32>, i32 -> vector<256x128xf32>
    %22 = arith.addf %17, %21 : vector<256x128xf32>
    %c4 = arith.constant 4 : index
    %c0_16 = arith.constant 0 : index
    %c0_17 = arith.constant 0 : index
    %23 = vector.load %arg6[%c4, %c0_16, %c0_17] : memref<9x4x128xf32, #tpu.memory_space<vmem>>, vector<1x4x128xf32>
    %24 = vector.shape_cast %23 : vector<1x4x128xf32> to vector<4x128xf32>
    %cst_18 = arith.constant dense<0.000000e+00> : vector<256x128xf32>
    %25 = tpu.matmul %2, %24, %cst_18 {dimension_numbers = #tpu.dot_dimension_numbers<[1], [0], [0], [1], [0, 0, 1, 1], [], []>} : vector<256x4xf32>, vector<4x128xf32>, vector<256x128xf32> -> vector<256x128xf32>
    %c223_i32 = arith.constant 223 : i32
    %26 = tpu.dynamic_rotate %25 by %c223_i32 dim 0 : vector<256x128xf32>, i32 -> vector<256x128xf32>
    %27 = arith.addf %22, %26 : vector<256x128xf32>
    %c5 = arith.constant 5 : index
    %c0_19 = arith.constant 0 : index
    %c0_20 = arith.constant 0 : index
    %28 = vector.load %arg6[%c5, %c0_19, %c0_20] : memref<9x4x128xf32, #tpu.memory_space<vmem>>, vector<1x4x128xf32>
    %29 = vector.shape_cast %28 : vector<1x4x128xf32> to vector<4x128xf32>
    %cst_21 = arith.constant dense<0.000000e+00> : vector<256x128xf32>
    %30 = tpu.matmul %2, %29, %cst_21 {dimension_numbers = #tpu.dot_dimension_numbers<[1], [0], [0], [1], [0, 0, 1, 1], [], []>} : vector<256x4xf32>, vector<4x128xf32>, vector<256x128xf32> -> vector<256x128xf32>
    %c222_i32 = arith.constant 222 : i32
    %31 = tpu.dynamic_rotate %30 by %c222_i32 dim 0 : vector<256x128xf32>, i32 -> vector<256x128xf32>
    %32 = arith.addf %27, %31 : vector<256x128xf32>
    %c6 = arith.constant 6 : index
    %c0_22 = arith.constant 0 : index
    %c0_23 = arith.constant 0 : index
    %33 = vector.load %arg6[%c6, %c0_22, %c0_23] : memref<9x4x128xf32, #tpu.memory_space<vmem>>, vector<1x4x128xf32>
    %34 = vector.shape_cast %33 : vector<1x4x128xf32> to vector<4x128xf32>
    %cst_24 = arith.constant dense<0.000000e+00> : vector<256x128xf32>
    %35 = tpu.matmul %2, %34, %cst_24 {dimension_numbers = #tpu.dot_dimension_numbers<[1], [0], [0], [1], [0, 0, 1, 1], [], []>} : vector<256x4xf32>, vector<4x128xf32>, vector<256x128xf32> -> vector<256x128xf32>
    %c192_i32 = arith.constant 192 : i32
    %36 = tpu.dynamic_rotate %35 by %c192_i32 dim 0 : vector<256x128xf32>, i32 -> vector<256x128xf32>
    %37 = arith.addf %32, %36 : vector<256x128xf32>
    %c7 = arith.constant 7 : index
    %c0_25 = arith.constant 0 : index
    %c0_26 = arith.constant 0 : index
    %38 = vector.load %arg6[%c7, %c0_25, %c0_26] : memref<9x4x128xf32, #tpu.memory_space<vmem>>, vector<1x4x128xf32>
    %39 = vector.shape_cast %38 : vector<1x4x128xf32> to vector<4x128xf32>
    %cst_27 = arith.constant dense<0.000000e+00> : vector<256x128xf32>
    %40 = tpu.matmul %2, %39, %cst_27 {dimension_numbers = #tpu.dot_dimension_numbers<[1], [0], [0], [1], [0, 0, 1, 1], [], []>} : vector<256x4xf32>, vector<4x128xf32>, vector<256x128xf32> -> vector<256x128xf32>
    %c191_i32 = arith.constant 191 : i32
    %41 = tpu.dynamic_rotate %40 by %c191_i32 dim 0 : vector<256x128xf32>, i32 -> vector<256x128xf32>
    %42 = arith.addf %37, %41 : vector<256x128xf32>
    %c8 = arith.constant 8 : index
    %c0_28 = arith.constant 0 : index
    %c0_29 = arith.constant 0 : index
    %43 = vector.load %arg6[%c8, %c0_28, %c0_29] : memref<9x4x128xf32, #tpu.memory_space<vmem>>, vector<1x4x128xf32>
    %44 = vector.shape_cast %43 : vector<1x4x128xf32> to vector<4x128xf32>
    %cst_30 = arith.constant dense<0.000000e+00> : vector<256x128xf32>
    %45 = tpu.matmul %2, %44, %cst_30 {dimension_numbers = #tpu.dot_dimension_numbers<[1], [0], [0], [1], [0, 0, 1, 1], [], []>} : vector<256x4xf32>, vector<4x128xf32>, vector<256x128xf32> -> vector<256x128xf32>
    %c190_i32 = arith.constant 190 : i32
    %46 = tpu.dynamic_rotate %45 by %c190_i32 dim 0 : vector<256x128xf32>, i32 -> vector<256x128xf32>
    %47 = arith.addf %42, %46 : vector<256x128xf32>
    %c0_31 = arith.constant 0 : index
    %c6_32 = arith.constant 6 : index
    %c0_33 = arith.constant 0 : index
    %c0_34 = arith.constant 0 : index
    %48 = vector.load %arg3[%c0_31, %c6_32, %c0_33, %c0_34] : memref<1x8x32x4xf32, #tpu.memory_space<vmem>>, vector<1x2x32x4xf32>
    %49 = vector.shape_cast %48 : vector<1x2x32x4xf32> to vector<2x32x4xf32>
    %c0_35 = arith.constant 0 : index
    %c0_36 = arith.constant 0 : index
    %c0_37 = arith.constant 0 : index
    %c0_38 = arith.constant 0 : index
    %50 = vector.load %arg4[%c0_35, %c0_36, %c0_37, %c0_38] : memref<1x1x32x4xf32, #tpu.memory_space<vmem>>, vector<1x1x32x4xf32>
    %51 = vector.shape_cast %50 : vector<1x1x32x4xf32> to vector<1x32x4xf32>
    %c0_39 = arith.constant 0 : index
    %c0_40 = arith.constant 0 : index
    %c0_41 = arith.constant 0 : index
    %c0_42 = arith.constant 0 : index
    %52 = vector.load %arg5[%c0_39, %c0_40, %c0_41, %c0_42] : memref<1x1x32x4xf32, #tpu.memory_space<vmem>>, vector<1x1x32x4xf32>
    %53 = vector.shape_cast %52 : vector<1x1x32x4xf32> to vector<1x32x4xf32>
    %54 = tpu.concatenate %49, %51, %53 in 0 : vector<2x32x4xf32>, vector<1x32x4xf32>, vector<1x32x4xf32> -> vector<4x32x4xf32>
    %55 = vector.shape_cast %54 : vector<4x32x4xf32> to vector<128x4xf32>
    %cst_43 = arith.constant 0.000000e+00 : f32
    %56 = vector.broadcast %cst_43 : f32 to vector<128x128xf32>
    %c0_44 = arith.constant 0 : index
    %c0_45 = arith.constant 0 : index
    %c0_46 = arith.constant 0 : index
    %57 = vector.load %arg6[%c0_44, %c0_45, %c0_46] : memref<9x4x128xf32, #tpu.memory_space<vmem>>, vector<1x4x128xf32>
    %58 = vector.shape_cast %57 : vector<1x4x128xf32> to vector<4x128xf32>
    %cst_47 = arith.constant dense<0.000000e+00> : vector<128x128xf32>
    %59 = tpu.matmul %55, %58, %cst_47 {dimension_numbers = #tpu.dot_dimension_numbers<[1], [0], [0], [1], [0, 0, 1, 1], [], []>} : vector<128x4xf32>, vector<4x128xf32>, vector<128x128xf32> -> vector<128x128xf32>
    %60 = arith.addf %56, %59 : vector<128x128xf32>
    %c1_48 = arith.constant 1 : index
    %c0_49 = arith.constant 0 : index
    %c0_50 = arith.constant 0 : index
    %61 = vector.load %arg6[%c1_48, %c0_49, %c0_50] : memref<9x4x128xf32, #tpu.memory_space<vmem>>, vector<1x4x128xf32>
    %62 = vector.shape_cast %61 : vector<1x4x128xf32> to vector<4x128xf32>
    %cst_51 = arith.constant dense<0.000000e+00> : vector<128x128xf32>
    %63 = tpu.matmul %55, %62, %cst_51 {dimension_numbers = #tpu.dot_dimension_numbers<[1], [0], [0], [1], [0, 0, 1, 1], [], []>} : vector<128x4xf32>, vector<4x128xf32>, vector<128x128xf32> -> vector<128x128xf32>
    %c127_i32 = arith.constant 127 : i32
    %64 = tpu.dynamic_rotate %63 by %c127_i32 dim 0 : vector<128x128xf32>, i32 -> vector<128x128xf32>
    %65 = arith.addf %60, %64 : vector<128x128xf32>
    %c2_52 = arith.constant 2 : index
    %c0_53 = arith.constant 0 : index
    %c0_54 = arith.constant 0 : index
    %66 = vector.load %arg6[%c2_52, %c0_53, %c0_54] : memref<9x4x128xf32, #tpu.memory_space<vmem>>, vector<1x4x128xf32>
    %67 = vector.shape_cast %66 : vector<1x4x128xf32> to vector<4x128xf32>
    %cst_55 = arith.constant dense<0.000000e+00> : vector<128x128xf32>
    %68 = tpu.matmul %55, %67, %cst_55 {dimension_numbers = #tpu.dot_dimension_numbers<[1], [0], [0], [1], [0, 0, 1, 1], [], []>} : vector<128x4xf32>, vector<4x128xf32>, vector<128x128xf32> -> vector<128x128xf32>
    %c126_i32 = arith.constant 126 : i32
    %69 = tpu.dynamic_rotate %68 by %c126_i32 dim 0 : vector<128x128xf32>, i32 -> vector<128x128xf32>
    %70 = arith.addf %65, %69 : vector<128x128xf32>
    %c3_56 = arith.constant 3 : index
    %c0_57 = arith.constant 0 : index
    %c0_58 = arith.constant 0 : index
    %71 = vector.load %arg6[%c3_56, %c0_57, %c0_58] : memref<9x4x128xf32, #tpu.memory_space<vmem>>, vector<1x4x128xf32>
    %72 = vector.shape_cast %71 : vector<1x4x128xf32> to vector<4x128xf32>
    %cst_59 = arith.constant dense<0.000000e+00> : vector<128x128xf32>
    %73 = tpu.matmul %55, %72, %cst_59 {dimension_numbers = #tpu.dot_dimension_numbers<[1], [0], [0], [1], [0, 0, 1, 1], [], []>} : vector<128x4xf32>, vector<4x128xf32>, vector<128x128xf32> -> vector<128x128xf32>
    %c96_i32 = arith.constant 96 : i32
    %74 = tpu.dynamic_rotate %73 by %c96_i32 dim 0 : vector<128x128xf32>, i32 -> vector<128x128xf32>
    %75 = arith.addf %70, %74 : vector<128x128xf32>
    %c4_60 = arith.constant 4 : index
    %c0_61 = arith.constant 0 : index
    %c0_62 = arith.constant 0 : index
    %76 = vector.load %arg6[%c4_60, %c0_61, %c0_62] : memref<9x4x128xf32, #tpu.memory_space<vmem>>, vector<1x4x128xf32>
    %77 = vector.shape_cast %76 : vector<1x4x128xf32> to vector<4x128xf32>
    %cst_63 = arith.constant dense<0.000000e+00> : vector<128x128xf32>
    %78 = tpu.matmul %55, %77, %cst_63 {dimension_numbers = #tpu.dot_dimension_numbers<[1], [0], [0], [1], [0, 0, 1, 1], [], []>} : vector<128x4xf32>, vector<4x128xf32>, vector<128x128xf32> -> vector<128x128xf32>
    %c95_i32 = arith.constant 95 : i32
    %79 = tpu.dynamic_rotate %78 by %c95_i32 dim 0 : vector<128x128xf32>, i32 -> vector<128x128xf32>
    %80 = arith.addf %75, %79 : vector<128x128xf32>
    %c5_64 = arith.constant 5 : index
    %c0_65 = arith.constant 0 : index
    %c0_66 = arith.constant 0 : index
    %81 = vector.load %arg6[%c5_64, %c0_65, %c0_66] : memref<9x4x128xf32, #tpu.memory_space<vmem>>, vector<1x4x128xf32>
    %82 = vector.shape_cast %81 : vector<1x4x128xf32> to vector<4x128xf32>
    %cst_67 = arith.constant dense<0.000000e+00> : vector<128x128xf32>
    %83 = tpu.matmul %55, %82, %cst_67 {dimension_numbers = #tpu.dot_dimension_numbers<[1], [0], [0], [1], [0, 0, 1, 1], [], []>} : vector<128x4xf32>, vector<4x128xf32>, vector<128x128xf32> -> vector<128x128xf32>
    %c94_i32 = arith.constant 94 : i32
    %84 = tpu.dynamic_rotate %83 by %c94_i32 dim 0 : vector<128x128xf32>, i32 -> vector<128x128xf32>
    %85 = arith.addf %80, %84 : vector<128x128xf32>
    %c6_68 = arith.constant 6 : index
    %c0_69 = arith.constant 0 : index
    %c0_70 = arith.constant 0 : index
    %86 = vector.load %arg6[%c6_68, %c0_69, %c0_70] : memref<9x4x128xf32, #tpu.memory_space<vmem>>, vector<1x4x128xf32>
    %87 = vector.shape_cast %86 : vector<1x4x128xf32> to vector<4x128xf32>
    %cst_71 = arith.constant dense<0.000000e+00> : vector<128x128xf32>
    %88 = tpu.matmul %55, %87, %cst_71 {dimension_numbers = #tpu.dot_dimension_numbers<[1], [0], [0], [1], [0, 0, 1, 1], [], []>} : vector<128x4xf32>, vector<4x128xf32>, vector<128x128xf32> -> vector<128x128xf32>
    %c64_i32 = arith.constant 64 : i32
    %89 = tpu.dynamic_rotate %88 by %c64_i32 dim 0 : vector<128x128xf32>, i32 -> vector<128x128xf32>
    %90 = arith.addf %85, %89 : vector<128x128xf32>
    %c7_72 = arith.constant 7 : index
    %c0_73 = arith.constant 0 : index
    %c0_74 = arith.constant 0 : index
    %91 = vector.load %arg6[%c7_72, %c0_73, %c0_74] : memref<9x4x128xf32, #tpu.memory_space<vmem>>, vector<1x4x128xf32>
    %92 = vector.shape_cast %91 : vector<1x4x128xf32> to vector<4x128xf32>
    %cst_75 = arith.constant dense<0.000000e+00> : vector<128x128xf32>
    %93 = tpu.matmul %55, %92, %cst_75 {dimension_numbers = #tpu.dot_dimension_numbers<[1], [0], [0], [1], [0, 0, 1, 1], [], []>} : vector<128x4xf32>, vector<4x128xf32>, vector<128x128xf32> -> vector<128x128xf32>
    %c63_i32 = arith.constant 63 : i32
    %94 = tpu.dynamic_rotate %93 by %c63_i32 dim 0 : vector<128x128xf32>, i32 -> vector<128x128xf32>
    %95 = arith.addf %90, %94 : vector<128x128xf32>
    %c8_76 = arith.constant 8 : index
    %c0_77 = arith.constant 0 : index
    %c0_78 = arith.constant 0 : index
    %96 = vector.load %arg6[%c8_76, %c0_77, %c0_78] : memref<9x4x128xf32, #tpu.memory_space<vmem>>, vector<1x4x128xf32>
    %97 = vector.shape_cast %96 : vector<1x4x128xf32> to vector<4x128xf32>
    %cst_79 = arith.constant dense<0.000000e+00> : vector<128x128xf32>
    %98 = tpu.matmul %55, %97, %cst_79 {dimension_numbers = #tpu.dot_dimension_numbers<[1], [0], [0], [1], [0, 0, 1, 1], [], []>} : vector<128x4xf32>, vector<4x128xf32>, vector<128x128xf32> -> vector<128x128xf32>
    %c62_i32 = arith.constant 62 : i32
    %99 = tpu.dynamic_rotate %98 by %c62_i32 dim 0 : vector<128x128xf32>, i32 -> vector<128x128xf32>
    %100 = arith.addf %95, %99 : vector<128x128xf32>
    %c0_80 = arith.constant 0 : index
    %c0_81 = arith.constant 0 : index
    %101 = vector.load %arg7[%c0_80, %c0_81] : memref<1x128xf32, #tpu.memory_space<vmem>>, vector<1x128xf32>
    %102 = vector.broadcast %101 : vector<1x128xf32> to vector<256x128xf32>
    %103 = arith.addf %47, %102 : vector<256x128xf32>
    %cst_82 = arith.constant 0.000000e+00 : f32
    %104 = vector.broadcast %cst_82 : f32 to vector<256x128xf32>
    %105 = arith.maximumf %103, %104 : vector<256x128xf32>
    %106 = vector.extract_strided_slice %100 {offsets = [0, 0], sizes = [64, 128], strides = [1, 1]} : vector<128x128xf32> to vector<64x128xf32>
    %107 = vector.broadcast %101 : vector<1x128xf32> to vector<64x128xf32>
    %108 = arith.addf %106, %107 : vector<64x128xf32>
    %cst_83 = arith.constant 0.000000e+00 : f32
    %109 = vector.broadcast %cst_83 : f32 to vector<64x128xf32>
    %110 = arith.maximumf %108, %109 : vector<64x128xf32>
    %c0_84 = arith.constant 0 : index
    %c0_85 = arith.constant 0 : index
    %c0_86 = arith.constant 0 : index
    %c0_87 = arith.constant 0 : index
    %111 = vector.load %arg8[%c0_84, %c0_85, %c0_86, %c0_87] : memref<1x1x256x128xf32, #tpu.memory_space<vmem>>, vector<1x1x256x128xf32>
    %112 = vector.shape_cast %111 : vector<1x1x256x128xf32> to vector<256x128xf32>
    %113 = vector.shape_cast %105 : vector<256x128xf32> to vector<1x1x256x128xf32>
    tpu.vector_store %arg8[%c0_84, %c0_85, %c0_86, %c0_87], %113 {strides = array<i32>} : memref<1x1x256x128xf32, #tpu.memory_space<vmem>>, vector<1x1x256x128xf32>,
    %c0_88 = arith.constant 0 : index
    %c0_89 = arith.constant 0 : index
    %c192 = arith.constant 192 : index
    %c0_90 = arith.constant 0 : index
    %114 = vector.load %arg8[%c0_88, %c0_89, %c192, %c0_90] : memref<1x1x256x128xf32, #tpu.memory_space<vmem>>, vector<1x1x64x128xf32>
    %115 = vector.shape_cast %114 : vector<1x1x64x128xf32> to vector<64x128xf32>
    %116 = vector.shape_cast %110 : vector<64x128xf32> to vector<1x1x64x128xf32>
    tpu.vector_store %arg8[%c0_88, %c0_89, %c192, %c0_90], %116 {strides = array<i32>} : memref<1x1x256x128xf32, #tpu.memory_space<vmem>>, vector<1x1x64x128xf32>,
    return
  }
  func.func @transform_0(%arg0: i32, %arg1: i32, %arg2: i32) -> (i32, i32, i32, i32) {
    %c0_i32 = arith.constant 0 : i32
    %c0_i32_0 = arith.constant 0 : i32
    %c0_i32_1 = arith.constant 0 : i32
    return %arg0, %arg1, %c0_i32, %c0_i32_0 : i32, i32, i32, i32
  }
  func.func @transform_1(%arg0: i32, %arg1: i32, %arg2: i32) -> (i32, i32, i32, i32) {
    %c1_i32 = arith.constant 1 : i32
    %0 = arith.addi %arg1, %c1_i32 : i32
    %c8_i32 = arith.constant 8 : i32
    %1 = arith.muli %0, %c8_i32 : i32
    %c0_i32 = arith.constant 0 : i32
    %c0_i32_0 = arith.constant 0 : i32
    %c0_i32_1 = arith.constant 0 : i32
    return %arg0, %1, %c0_i32, %c0_i32_0 : i32, i32, i32, i32
  }
  func.func @transform_2(%arg0: i32, %arg1: i32, %arg2: i32) -> (i32, i32, i32, i32) {
    %c1_i32 = arith.constant 1 : i32
    %0 = arith.addi %arg1, %c1_i32 : i32
    %c8_i32 = arith.constant 8 : i32
    %1 = arith.muli %0, %c8_i32 : i32
    %c1_i32_0 = arith.constant 1 : i32
    %2 = arith.addi %1, %c1_i32_0 : i32
    %c0_i32 = arith.constant 0 : i32
    %c0_i32_1 = arith.constant 0 : i32
    %c0_i32_2 = arith.constant 0 : i32
    return %arg0, %2, %c0_i32, %c0_i32_1 : i32, i32, i32, i32
  }
  func.func @transform_3(%arg0: i32, %arg1: i32, %arg2: i32) -> (i32, i32, i32) {
    %c0_i32 = arith.constant 0 : i32
    %c0_i32_0 = arith.constant 0 : i32
    %c0_i32_1 = arith.constant 0 : i32
    return %c0_i32, %c0_i32_0, %arg2 : i32, i32, i32
  }
  func.func @transform_4(%arg0: i32, %arg1: i32, %arg2: i32) -> (i32, i32) {
    %c0_i32 = arith.constant 0 : i32
    %c0_i32_0 = arith.constant 0 : i32
    return %c0_i32, %arg2 : i32, i32
  }
  func.func @transform_5(%arg0: i32, %arg1: i32, %arg2: i32) -> (i32, i32, i32, i32) {
    %c0_i32 = arith.constant 0 : i32
    %c0_i32_0 = arith.constant 0 : i32
    return %arg0, %arg1, %c0_i32, %arg2 : i32, i32, i32, i32
  }
}

</mosaic_0001>

<bundles_post_ra>
// kernel: tpu_custom_call.1
= control target key start
LH: loop header
LB: loop body
LE: loop exit
PB: predicated region body
PF: predicated region fallthrough
CT: control target
= control target key end

     0   :  { %10 = vsyncpa [#allocation3], 0  ;;  %s9394_s0 = inlined_call_operand.vmem [shape: f32[2,18,32,4], index: 0, kind: input, shape index: {}]   ;;  %s9395_s1 = inlined_call_operand.vmem [shape: f32[2,18,32,4], index: 1, kind: input, shape index: {}]   ;;  %s9396_s2 = inlined_call_operand.vmem [shape: f32[2,18,32,4], index: 2, kind: input, shape index: {}]   ;;  %s9397_s3 = inlined_call_operand.vmem [shape: f32[9,4,128], index: 3, kind: input, shape index: {}]   ;;  %s9398_s4 = inlined_call_operand.vmem [shape: f32[1,128], index: 4, kind: input, shape index: {}]   ;;  %s9399_s5 = inlined_call_operand.hbm [shape: f32[2,2,256,128], index: 5, kind: output, shape index: {}]  }
   0x1   :  { %12 = vsyncpa [#allocation3 + $0x1], 0  ;;  %s7098_s18 = smov 0   ;;  %s7100_s19 = smov 0  }
   0x2   :  { %s7102_s20 = smov 0   ;;  %s7104_s21 = smov 0  }
   0x3   :  { %s7106_s22 = smov 0   ;;  %s7108_s23 = smov 0  }
   0x4   :  { %s7110_s24 = smov 0   ;;  %s7112_s25 = smov 0  }
   0x5 LB: > { %s4999_s26 = sadd.s32 4294967295, %s7063_s25   ;;  %s5000_s27 = sadd.s32 4294967294, %s7063_s25   ;;  %s7063_s25 = sphi %s7112_s25, %s18_s25   ;;  %s7059_s24 = sphi %s7110_s24, %s9409_s24   ;;  %s7055_s23 = sphi %s7108_s23, %s9408_s23   ;;  %s7051_s22 = sphi %s7106_s22, %s9407_s22   ;;  %s7047_s21 = sphi %s7104_s21, %s9406_s21   ;;  %s7043_s20 = sphi %s7102_s20, %s9405_s20   ;;  %s7039_s19 = sphi %s7100_s19, %s9404_s19   ;;  %s7035_s18 = sphi %s7098_s18, %s9403_s18  }
   0x6   : > { %s33_s28 = sadd.s32 1, %s7055_s23  ;;  %s37_s29 = sadd.s32 1, %s7059_s24 }
   0x7   : > { %p35_p0 = scmp.ge.s32.totalorder %s33_s28, 2  ;;  %p204_p1 = scmp.ne.s32.totalorder %s7043_s20, %s7039_s19 }
   0x8   : > { %p205_p2 = scmp.eq.s32.totalorder %s4999_s26, 3  ;;  %p210_p5 = scmp.ne.s32.totalorder %s7039_s19, %s7035_s18 }
   0x9   : > { %s9411_s28 = smov (%p35_p0, %s33_s28), 0  ;;  %s9413_s29 = smov (!%p35_p0, %s37_s29), %s7059_s24 }
   0xa   : > { %s188_s30 = ssub.s32 %s7055_s23, %s9411_s28  ;;  %p7149_p3 = por %p205_p2, %p204_p1 }
   0xb   : > { %p39_p4 = scmp.ge.s32.totalorder %s9413_s29, 2  ;;  %p211_p6 = scmp.eq.s32.totalorder %s5000_s27, 3 }
   0xc   : > { %p5009_p7 = scmp.ge.s32.totalorder %s7063_s25, 1  ;;  %p300_p9 = scmp.lt.s32.totalorder %s7063_s25, 5 }
   0xd   : > { %s9415_s29 = smov (%p39_p4, %s9413_s29), 0  ;;  %p7158_p8 = por %p211_p6, %p210_p5 }
   0xe   : > { %s187_s8 = ssub.s32 %s7059_s24, %s9415_s29  ;;  %s194_s9 = sadd.s32 1, %s7043_s20 }
   0xf   : > { %s189_s10 = sor.u32 %s188_s30, %s187_s8  ;;  %p301_p10 = pnand %p5009_p7, %p300_p9 }
  0x10   : > { %p192_p11 = scmp.eq.s32.totalorder %s189_s10, 0  ;;  %v7172_v0 = vld [vmem:[%s9397_s3 + $0x4] sm:$0xf] (!%p301_p10)  ;;  %vm556_vm0 = vcmask (!%p301_p10), 1043456   ;;  %s7175_s14 = sshll.u32 (!%p301_p10), %s7047_s21, 3  ;;  %vm459_vm1 = vcmask (!%p301_p10), 31744   ;;  %v817_v41 = vlaneseq (!%p301_p10) }
  0x11   : > { %304 = sbr.rel (%p301_p10) target bundleno = 700 (0x2bc), region = 40  ;;  %p374_p12 = scmp.lt.s32.totalorder (!%p301_p10), %s7051_s22, 1  ;;  %6639 = vmatprep.subr.msk.mxu1 (!%p301_p10), %vm556_vm0, %v7172_v0  ;;  %5955 = vmatprep.subr.msk.mxu0 (!%p301_p10), %vm556_vm0, %v7172_v0  ;;  %v7186_v1 = vld [vmem:[%s9397_s3] sm:$0xf] (!%p301_p10)  ;;  %v7191_v2 = vld [vmem:[%s9397_s3 + $0x8] sm:$0xf] (!%p301_p10) }
  0x12   : > { %s7167_s11 = scalar_select %p192_p11, %s7043_s20, %s194_s9  }
  0x13   : > { %p376_p13 = scmp.lt.s32.totalorder (!%p301_p10), %s7175_s14, 17  ;;  %6640 = vmatpush3.msk.msra.mxu1 (!%p301_p10), %vm556_vm0, %v7172_v0  ;;  %5956 = vmatpush3.msk.msra.mxu0 (!%p301_p10), %vm556_vm0, %v7172_v0  ;;  %v7240_v9 = vld [vmem:[%s9397_s3 + $0xc] sm:$0xf] (!%p301_p10)  ;;  %v7245_v10 = vld [vmem:[%s9397_s3 + $0x10] sm:$0xf] (!%p301_p10)  ;;  %v7793_v42 = vshrl.u32 (!%p301_p10), %v817_v41, 7 }
  0x14   : > { %6005 = vmatprep.subr.msk.mxu1 (!%p301_p10), %vm556_vm0, %v7186_v1  ;;  %6055 = vmatprep.subr.msk.mxu0 (!%p301_p10), %vm556_vm0, %v7191_v2  ;;  %v7325_v24 = vld [vmem:[%s9397_s3 + $0x14] sm:$0xf] (!%p301_p10)  ;;  %v7437_v38 = vld [vmem:[%s9397_s3 + $0x1c] sm:$0xf] (!%p301_p10)  ;;  %v7510_v39 = vld [vmem:[%s9397_s3 + $0x18] sm:$0xf] (!%p301_p10) }
  0x15   : > { %v7583_v40 = vld [vmem:[%s9397_s3 + $0x20] sm:$0xf] (!%p301_p10)  ;;  %vm819_vm2 = vcmp.lt.s32.totalorder (!%p301_p10), %v7793_v42, 7  ;;  %vm1342_vm3 = vcmp.lt.s32.totalorder (!%p301_p10), %v7793_v42, 6 }
  0x18   : > { %s375_s27 = scalar_select %p374_p12, %s7051_s22, 1 }
  0x19   : > { %s377_s30 = scalar_select %p376_p13, %s7175_s14, 17 }
  0x1a   : > { %s7203_s8 = smul.u32 72, %s375_s27 }
  0x1b   : > { %s5012_s9 = sshll.u32 %s377_s30, 2  ;;  %s8004_s30 = sadd.s32 8, %s7175_s14 }
  0x1c   : > { %s380_s10 = sadd.s32 %s7203_s8, %s5012_s9  ;;  %p393_p0 = scmp.lt.s32.totalorder %s8004_s30, 17 }
  0x1d   : > { %s5013_s12 = sshll.u32 %s380_s10, 3  ;;  %s404_s9 = sadd.s32 1, %s8004_s30 }
  0x1e   : > { %s7209_s16 = scalar_lea.vmem %s9394_s0, %s5013_s12  ;;  %p8052_p1 = scmp.lt.s32.totalorder %s404_s9, 17 }
  0x1f   : > { %v7212_v3 = vld [vmem:[%s7209_s16] sm:$0xff]  ;;  %v7218_v5 = vld [vmem:[%s7209_s16 + $0x8] sm:$0xff]  ;;  %v7228_v7 = vld [vmem:[%s7209_s16 + $0x10] sm:$0xff]  ;;  %s8030_s14 = scalar_select %p393_p0, %s8004_s30, 17 }
  0x20   : > { %v7215_v4 = vld [vmem:[%s7209_s16 + $0xc0] sm:$0xff]  ;;  %5957 = vmatprep.mubr.msk.f32.mxu0 %vm459_vm1, %v7212_v3  ;;  %v7225_v6 = vld [vmem:[%s7209_s16 + $0xc8] sm:$0xff]  ;;  %v7231_v8 = vld [vmem:[%s7209_s16 + $0xd0] sm:$0xff]  ;;  %s9417_s9 = smov (!%p8052_p1, %s404_s9), 17 }
  0x21   : > { %5993 = vmatprep.mubr.msk.f32.mxu1 %vm459_vm1, %v7215_v4  ;;  %5958 = vmatmul.mubr.msk.f32.vlgmr.msra.gmra.mrb[0].mxu0 %vm459_vm1, %v7218_v5  ;;  %v7252_v11 = vld [vmem:[%s7209_s16 + $0x18] sm:$0xff]  ;;  %v7262_v13 = vld [vmem:[%s7209_s16 + $0x20] sm:$0xff]  ;;  %v7280_v15 = vld [vmem:[%s7209_s16 + $0x28] sm:$0xff]  ;;  %s5015_s10 = sshll.u32 %s8030_s14, 2  ;;  %s5018_s17 = sshll.u32 %s9417_s9, 2 }
  0x22   : > { %5994 = vmatmul.mubr.msk.f32.vlgmr.msra.gmra.mrb[0].mxu1 %vm459_vm1, %v7225_v6  ;;  %6056 = vmatpush3.msk.msra.mxu0 %vm556_vm0, %v7191_v2  ;;  %v7255_v12 = vld [vmem:[%s7209_s16 + $0xd8] sm:$0xff]  ;;  %v7265_v14 = vld [vmem:[%s7209_s16 + $0xe0] sm:$0xff]  ;;  %v7283_v16 = vld [vmem:[%s7209_s16 + $0xe8] sm:$0xff]  ;;  %s397_s13 = sadd.s32 %s7203_s8, %s5015_s10  ;;  %s411_s14 = sadd.s32 %s7203_s8, %s5018_s17 }
  0x23   : > { %6006 = vmatpush3.msk.msra.mxu1 %vm556_vm0, %v7186_v1  ;;  %5960 = vmatprep.mubr.msk.f32.mxu0 %vm459_vm1, %v7228_v7  ;;  %v7286_v17 = vld [vmem:[%s7209_s16 + $0x30] sm:$0xff]  ;;  %v7300_v19 = vld [vmem:[%s7209_s16 + $0x38] sm:$0xff]  ;;  %v7306_v21 = vld [vmem:[%s7209_s16 + $0x40] sm:$0xff]  ;;  %s5016_s15 = sshll.u32 %s397_s13, 3  ;;  %s5019_s8 = sshll.u32 %s411_s14, 3 }
  0x24   : > { %5996 = vmatprep.mubr.msk.f32.mxu1 %vm459_vm1, %v7231_v8  ;;  %6105 = vmatprep.subr.msk.mxu1 %vm556_vm0, %v7240_v9  ;;  %v7289_v18 = vld [vmem:[%s7209_s16 + $0xf0] sm:$0xff]  ;;  %v7303_v20 = vld [vmem:[%s7209_s16 + $0xf8] sm:$0xff]  ;;  %v7317_v22 = vld [vmem:[%s7209_s16 + $0x48] sm:$0xff]  ;;  %s8109_s30 = scalar_lea.vmem %s9395_s1, %s5016_s15  ;;  %s8160_s12 = scalar_lea.vmem %s9396_s2, %s5019_s8 }
  0x25   : > { %6155 = vmatprep.subr.msk.mxu0 %vm556_vm0, %v7245_v10  ;;  %5961 = vmatmul.mubr.msk.f32.gmra.mrb[2].mxu0 %vm459_vm1, %v7252_v11  ;;  %v7320_v23 = vld [vmem:[%s7209_s16 + $0x50] sm:$0xff]  ;;  %v7336_v25 = vld [vmem:[%s7209_s16 + $0x58] sm:$0xff]  ;;  %v7341_v26 = vld [vmem:[%s7209_s16 + $0x60] sm:$0xff]  ;;  %s365_s13 = sand.u32 1, %s7039_s19   ;;  %s7065_s17 = smov [#allocation2]  }
  0x26   : > { %5997 = vmatmul.mubr.msk.f32.gmra.mrb[2].mxu1 %vm459_vm1, %v7255_v12  ;;  %5963 = vmatprep.mubr.msk.f32.mxu0 %vm459_vm1, %v7262_v13  ;;  %v7354_v27 = vld [vmem:[%s7209_s16 + $0x68] sm:$0xff]  ;;  %v7357_v28 = vld [vmem:[%s7209_s16 + $0x70] sm:$0xff]  ;;  %v7368_v29 = vld [vmem:[%s7209_s16 + $0x78] sm:$0xff]  ;;  %s5010_s26 = sshll.u32 %s365_s13, 8 }
  0x27   : > { %5999 = vmatprep.mubr.msk.f32.mxu1 %vm459_vm1, %v7265_v14  ;;  %v7371_v30 = vld [vmem:[%s7209_s16 + $0x80] sm:$0xff]  ;;  %v7382_v31 = vld [vmem:[%s7209_s16 + $0x88] sm:$0xff]  ;;  %v7385_v32 = vld [vmem:[%s7209_s16 + $0x90] sm:$0xff]  ;;  %s9022_s27 = scalar_lea.vmem [#allocation2], %s5010_s26  ;;  %s6973_s26 = sshll.u32 %s7065_s17, 4  ;;  %s6974_s26 = int_to_ptr.vmem [resolvable:$false] %s6973_s26 }
  0x28   : > { %v7396_v33 = vld [vmem:[%s7209_s16 + $0x98] sm:$0xff]  ;;  %v7399_v34 = vld [vmem:[%s7209_s16 + $0xa0] sm:$0xff]  ;;  %v7410_v35 = vld [vmem:[%s7209_s16 + $0xa8] sm:$0xff]  ;;  %s4841_s14 = sshll.u32 %s9022_s27, 4  ;;  %s9335_s14 = int_to_ptr.vmem [resolvable:$true] %s4841_s14 }
  0x29   : > { %5964 = vmatmul.mubr.msk.f32.gmra.mrb[4].mxu0 %vm459_vm1, %v7280_v15  ;;  %v7413_v36 = vld [vmem:[%s7209_s16 + $0xb0] sm:$0xff]  ;;  %v7424_v37 = vld [vmem:[%s7209_s16 + $0xb8] sm:$0xff]  ;;  %s6969_s15 = scalar_lea.vmem %s9335_s14, 4096  ;;  %p6976_p6 = scmp.lt.s32.totalorder %s9335_s14, %s6974_s26 }
  0x2a   : > { %6000 = vmatmul.mubr.msk.f32.gmra.mrb[4].mxu1 %vm459_vm1, %v7283_v16  ;;  %5966 = vmatprep.mubr.msk.f32.mxu0 %vm459_vm1, %v7286_v17  ;;  %p6970_p2 = scmp.ne.s32.totalorder %s9335_s14, %s6969_s15 }
  0x2b   : > { %6002 = vmatprep.mubr.msk.f32.mxu1 %vm459_vm1, %v7289_v18 }
  0x2c   : > { %p6971_p4 = pnand %p6970_p2, %p7149_p3 }
  0x2d   : > { %5967 = vmatmul.mubr.msk.f32.gmra.mrb[6].mxu0 %vm459_vm1, %v7300_v19 }
  0x2e   : > { %6003 = vmatmul.mubr.msk.f32.gmra.mrb[6].mxu1 %vm459_vm1, %v7303_v20  ;;  %5969 = vmatprep.mubr.msk.f32.mxu0 %vm459_vm1, %v7306_v21  ;;  %p6972_p5 = pneg %p6971_p4 }
  0x2f   : > { %6007 = vmatprep.mubr.msk.f32.mxu1 %vm459_vm1, %v7212_v3 }
  0x31   : > { %5970 = vmatmul.mubr.msk.f32.gmra.mrb[8].mxu0 %vm459_vm1, %v7317_v22 }
  0x32   : > { %6008 = vmatmul.mubr.msk.f32.vlgmr.msra.gmra.mrb[8].mxu1 %vm459_vm1, %v7218_v5  ;;  %5972 = vmatprep.mubr.msk.f32.mxu0 %vm459_vm1, %v7320_v23 }
  0x33   : > { %6106 = vmatpush3.msk.msra.mxu1 %vm556_vm0, %v7240_v9  ;;  %6010 = vmatprep.mubr.msk.f32.mxu1 %vm459_vm1, %v7228_v7 }
  0x34   : > { %6205 = vmatprep.subr.msk.mxu1 %vm556_vm0, %v7325_v24 }
  0x35   : > { %5973 = vmatmul.mubr.msk.f32.gmra.mrb[10].mxu0 %vm459_vm1, %v7336_v25 }
  0x36   : > { %6011 = vmatmul.mubr.msk.f32.gmra.mrb[10].mxu1 %vm459_vm1, %v7252_v11  ;;  %5975 = vmatprep.mubr.msk.f32.mxu0 %vm459_vm1, %v7341_v26 }
  0x37   : > { %6013 = vmatprep.mubr.msk.f32.mxu1 %vm459_vm1, %v7262_v13 }
  0x39   : > { %5976 = vmatmul.mubr.msk.f32.gmra.mrb[12].mxu0 %vm459_vm1, %v7354_v27 }
  0x3a   : > { %6014 = vmatmul.mubr.msk.f32.gmra.mrb[12].mxu1 %vm459_vm1, %v7280_v15  ;;  %5978 = vmatprep.mubr.msk.f32.mxu0 %vm459_vm1, %v7357_v28 }
  0x3b   : > { %6016 = vmatprep.mubr.msk.f32.mxu1 %vm459_vm1, %v7286_v17 }
  0x3d   : > { %5979 = vmatmul.mubr.msk.f32.gmra.mrb[14].mxu0 %vm459_vm1, %v7368_v29 }
  0x3e   : > { %6017 = vmatmul.mubr.msk.f32.gmra.mrb[14].mxu1 %vm459_vm1, %v7300_v19  ;;  %5981 = vmatprep.mubr.msk.f32.mxu0 %vm459_vm1, %v7371_v30 }
  0x3f   : > { %6019 = vmatprep.mubr.msk.f32.mxu1 %vm459_vm1, %v7306_v21 }
  0x41   : > { %5982 = vmatmul.mubr.msk.f32.gmra.mrb[16].mxu0 %vm459_vm1, %v7382_v31 }
  0x42   : > { %6020 = vmatmul.mubr.msk.f32.gmra.mrb[16].mxu1 %vm459_vm1, %v7317_v22  ;;  %5984 = vmatprep.mubr.msk.f32.mxu0 %vm459_vm1, %v7385_v32 }
  0x43   : > { %6022 = vmatprep.mubr.msk.f32.mxu1 %vm459_vm1, %v7320_v23 }
  0x45   : > { %5985 = vmatmul.mubr.msk.f32.gmra.mrb[18].mxu0 %vm459_vm1, %v7396_v33 }
  0x46   : > { %6023 = vmatmul.mubr.msk.f32.gmra.mrb[18].mxu1 %vm459_vm1, %v7336_v25  ;;  %5987 = vmatprep.mubr.msk.f32.mxu0 %vm459_vm1, %v7399_v34 }
  0x47   : > { %6025 = vmatprep.mubr.msk.f32.mxu1 %vm459_vm1, %v7341_v26 }
  0x49   : > { %5988 = vmatmul.mubr.msk.f32.gmra.mrb[20].mxu0 %vm459_vm1, %v7410_v35 }
  0x4a   : > { %6026 = vmatmul.mubr.msk.f32.gmra.mrb[20].mxu1 %vm459_vm1, %v7354_v27  ;;  %5990 = vmatprep.mubr.msk.f32.mxu0 %vm459_vm1, %v7413_v36 }
  0x4b   : > { %6028 = vmatprep.mubr.msk.f32.mxu1 %vm459_vm1, %v7357_v28 }
  0x4d   : > { %5991 = vmatmul.mubr.msk.f32.gmra.mrb[22].mxu0 %vm459_vm1, %v7424_v37 }
  0x4e   : > { %6029 = vmatmul.mubr.msk.f32.gmra.mrb[22].mxu1 %vm459_vm1, %v7368_v29  ;;  %6057 = vmatprep.mubr.msk.f32.mxu0 %vm459_vm1, %v7212_v3 }
  0x4f   : > { %6031 = vmatprep.mubr.msk.f32.mxu1 %vm459_vm1, %v7371_v30 }
  0x51   : > { %6058 = vmatmul.mubr.msk.f32.vlgmr.msra.gmra.mrb[24].mxu0 %vm459_vm1, %v7218_v5 }
  0x52   : > { %6032 = vmatmul.mubr.msk.f32.gmra.mrb[24].mxu1 %vm459_vm1, %v7382_v31  ;;  %6156 = vmatpush3.msk.msra.mxu0 %vm556_vm0, %v7245_v10 }
  0x53   : > { %6034 = vmatprep.mubr.msk.f32.mxu1 %vm459_vm1, %v7385_v32  ;;  %6060 = vmatprep.mubr.msk.f32.mxu0 %vm459_vm1, %v7228_v7 }
  0x54   : > { %6305 = vmatprep.subr.msk.mxu0 %vm556_vm0, %v7437_v38 }
  0x55   : > { %6061 = vmatmul.mubr.msk.f32.gmra.mrb[26].mxu0 %vm459_vm1, %v7252_v11 }
  0x56   : > { %6035 = vmatmul.mubr.msk.f32.gmra.mrb[26].mxu1 %vm459_vm1, %v7396_v33  ;;  %6063 = vmatprep.mubr.msk.f32.mxu0 %vm459_vm1, %v7262_v13 }
  0x57   : > { %6037 = vmatprep.mubr.msk.f32.mxu1 %vm459_vm1, %v7399_v34 }
  0x59   : > { %6064 = vmatmul.mubr.msk.f32.gmra.mrb[28].mxu0 %vm459_vm1, %v7280_v15 }
  0x5a   : > { %6038 = vmatmul.mubr.msk.f32.gmra.mrb[28].mxu1 %vm459_vm1, %v7410_v35  ;;  %6066 = vmatprep.mubr.msk.f32.mxu0 %vm459_vm1, %v7286_v17 }
  0x5b   : > { %6040 = vmatprep.mubr.msk.f32.mxu1 %vm459_vm1, %v7413_v36 }
  0x5d   : > { %6067 = vmatmul.mubr.msk.f32.gmra.mrb[30].mxu0 %vm459_vm1, %v7300_v19 }
  0x5e   : > { %6041 = vmatmul.mubr.msk.f32.gmra.mrb[30].mxu1 %vm459_vm1, %v7424_v37  ;;  %6069 = vmatprep.mubr.msk.f32.mxu0 %vm459_vm1, %v7306_v21 }
  0x5f   : > { %6043 = vmatprep.mubr.msk.f32.mxu1 %vm459_vm1, %v7215_v4 }
  0x61   : > { %6070 = vmatmul.mubr.msk.f32.gmra.mrb[32].mxu0 %vm459_vm1, %v7317_v22 }
  0x62   : > { %6044 = vmatmul.mubr.msk.f32.gmra.mrb[32].mxu1 %vm459_vm1, %v7225_v6  ;;  %6072 = vmatprep.mubr.msk.f32.mxu0 %vm459_vm1, %v7320_v23 }
  0x63   : > { %6046 = vmatprep.mubr.msk.f32.mxu1 %vm459_vm1, %v7231_v8 }
  0x65   : > { %6073 = vmatmul.mubr.msk.f32.gmra.mrb[34].mxu0 %vm459_vm1, %v7336_v25 }
  0x66   : > { %6047 = vmatmul.mubr.msk.f32.gmra.mrb[34].mxu1 %vm459_vm1, %v7255_v12  ;;  %6075 = vmatprep.mubr.msk.f32.mxu0 %vm459_vm1, %v7341_v26 }
  0x67   : > { %6049 = vmatprep.mubr.msk.f32.mxu1 %vm459_vm1, %v7265_v14 }
  0x69   : > { %6076 = vmatmul.mubr.msk.f32.gmra.mrb[36].mxu0 %vm459_vm1, %v7354_v27 }
  0x6a   : > { %6050 = vmatmul.mubr.msk.f32.gmra.mrb[36].mxu1 %vm459_vm1, %v7283_v16  ;;  %6078 = vmatprep.mubr.msk.f32.mxu0 %vm459_vm1, %v7357_v28 }
  0x6b   : > { %6052 = vmatprep.mubr.msk.f32.mxu1 %vm459_vm1, %v7289_v18 }
  0x6d   : > { %6079 = vmatmul.mubr.msk.f32.gmra.mrb[38].mxu0 %vm459_vm1, %v7368_v29 }
  0x6e   : > { %6053 = vmatmul.mubr.msk.f32.gmra.mrb[38].mxu1 %vm459_vm1, %v7303_v20  ;;  %6081 = vmatprep.mubr.msk.f32.mxu0 %vm459_vm1, %v7371_v30 }
  0x6f   : > { %6107 = vmatprep.mubr.msk.f32.mxu1 %vm459_vm1, %v7212_v3 }
  0x71   : > { %6082 = vmatmul.mubr.msk.f32.gmra.mrb[40].mxu0 %vm459_vm1, %v7382_v31 }
  0x72   : > { %6108 = vmatmul.mubr.msk.f32.vlgmr.msra.gmra.mrb[36].mxu1 %vm459_vm1, %v7218_v5  ;;  %6084 = vmatprep.mubr.msk.f32.mxu0 %vm459_vm1, %v7385_v32 }
  0x73   : > { %6206 = vmatpush3.msk.msra.mxu1 %vm556_vm0, %v7325_v24  ;;  %6110 = vmatprep.mubr.msk.f32.mxu1 %vm459_vm1, %v7228_v7 }
  0x74   : > { %6255 = vmatprep.subr.msk.mxu1 %vm556_vm0, %v7510_v39 }
  0x75   : > { %6085 = vmatmul.mubr.msk.f32.gmra.mrb[42].mxu0 %vm459_vm1, %v7396_v33 }
  0x76   : > { %6111 = vmatmul.mubr.msk.f32.gmra.mrb[38].mxu1 %vm459_vm1, %v7252_v11  ;;  %6087 = vmatprep.mubr.msk.f32.mxu0 %vm459_vm1, %v7399_v34 }
  0x77   : > { %6113 = vmatprep.mubr.msk.f32.mxu1 %vm459_vm1, %v7262_v13 }
  0x79   : > { %6088 = vmatmul.mubr.msk.f32.gmra.mrb[44].mxu0 %vm459_vm1, %v7410_v35 }
  0x7a   : > { %6114 = vmatmul.mubr.msk.f32.gmra.mrb[8].mxu1 %vm459_vm1, %v7280_v15  ;;  %6090 = vmatprep.mubr.msk.f32.mxu0 %vm459_vm1, %v7413_v36 }
  0x7b   : > { %6116 = vmatprep.mubr.msk.f32.mxu1 %vm459_vm1, %v7286_v17 }
  0x7d   : > { %6091 = vmatmul.mubr.msk.f32.gmra.mrb[46].mxu0 %vm459_vm1, %v7424_v37 }
  0x7e   : > { %6117 = vmatmul.mubr.msk.f32.gmra.mrb[10].mxu1 %vm459_vm1, %v7300_v19  ;;  %6093 = vmatprep.mubr.msk.f32.mxu0 %vm459_vm1, %v7215_v4 }
  0x7f   : > { %6119 = vmatprep.mubr.msk.f32.mxu1 %vm459_vm1, %v7306_v21 }
  0x81   : > { %6094 = vmatmul.mubr.msk.f32.gmra.mrb[48].mxu0 %vm459_vm1, %v7225_v6 }
  0x82   : > { %6120 = vmatmul.mubr.msk.f32.gmra.mrb[12].mxu1 %vm459_vm1, %v7317_v22  ;;  %6096 = vmatprep.mubr.msk.f32.mxu0 %vm459_vm1, %v7231_v8 }
  0x83   : > { %6122 = vmatprep.mubr.msk.f32.mxu1 %vm459_vm1, %v7320_v23 }
  0x85   : > { %6097 = vmatmul.mubr.msk.f32.gmra.mrb[50].mxu0 %vm459_vm1, %v7255_v12 }
  0x86   : > { %6123 = vmatmul.mubr.msk.f32.gmra.mrb[14].mxu1 %vm459_vm1, %v7336_v25  ;;  %6099 = vmatprep.mubr.msk.f32.mxu0 %vm459_vm1, %v7265_v14 }
  0x87   : > { %6125 = vmatprep.mubr.msk.f32.mxu1 %vm459_vm1, %v7341_v26 }
  0x89   : > { %6100 = vmatmul.mubr.msk.f32.gmra.mrb[52].mxu0 %vm459_vm1, %v7283_v16 }
  0x8a   : > { %6126 = vmatmul.mubr.msk.f32.gmra.mrb[16].mxu1 %vm459_vm1, %v7354_v27  ;;  %6102 = vmatprep.mubr.msk.f32.mxu0 %vm459_vm1, %v7289_v18 }
  0x8b   : > { %6128 = vmatprep.mubr.msk.f32.mxu1 %vm459_vm1, %v7357_v28 }
  0x8d   : > { %6103 = vmatmul.mubr.msk.f32.gmra.mrb[54].mxu0 %vm459_vm1, %v7303_v20 }
  0x8e   : > { %6129 = vmatmul.mubr.msk.f32.gmra.mrb[18].mxu1 %vm459_vm1, %v7368_v29  ;;  %6157 = vmatprep.mubr.msk.f32.mxu0 %vm459_vm1, %v7212_v3 }
  0x8f   : > { %6131 = vmatprep.mubr.msk.f32.mxu1 %vm459_vm1, %v7371_v30 }
  0x91   : > { %6158 = vmatmul.mubr.msk.f32.vlgmr.msra.gmra.mrb[56].mxu0 %vm459_vm1, %v7218_v5 }
  0x92   : > { %6132 = vmatmul.mubr.msk.f32.gmra.mrb[20].mxu1 %vm459_vm1, %v7382_v31  ;;  %6306 = vmatpush3.msk.msra.mxu0 %vm556_vm0, %v7437_v38 }
  0x93   : > { %6134 = vmatprep.mubr.msk.f32.mxu1 %vm459_vm1, %v7385_v32  ;;  %6160 = vmatprep.mubr.msk.f32.mxu0 %vm459_vm1, %v7228_v7 }
  0x94   : > { %6355 = vmatprep.subr.msk.mxu0 %vm556_vm0, %v7583_v40 }
  0x95   : > { %6161 = vmatmul.mubr.msk.f32.gmra.mrb[58].mxu0 %vm459_vm1, %v7252_v11 }
  0x96   : > { %6135 = vmatmul.mubr.msk.f32.gmra.mrb[22].mxu1 %vm459_vm1, %v7396_v33  ;;  %6163 = vmatprep.mubr.msk.f32.mxu0 %vm459_vm1, %v7262_v13 }
  0x97   : > { %6137 = vmatprep.mubr.msk.f32.mxu1 %vm459_vm1, %v7399_v34 }
  0x99   : > { %6164 = vmatmul.mubr.msk.f32.gmra.mrb[60].mxu0 %vm459_vm1, %v7280_v15 }
  0x9a   : > { %6138 = vmatmul.mubr.msk.f32.gmra.mrb[24].mxu1 %vm459_vm1, %v7410_v35  ;;  %6166 = vmatprep.mubr.msk.f32.mxu0 %vm459_vm1, %v7286_v17 }
  0x9b   : > { %6140 = vmatprep.mubr.msk.f32.mxu1 %vm459_vm1, %v7413_v36 }
  0x9d   : > { %6167 = vmatmul.mubr.msk.f32.gmra.mrb[62].mxu0 %vm459_vm1, %v7300_v19 }
  0x9e   : > { %6141 = vmatmul.mubr.msk.f32.gmra.mrb[26].mxu1 %vm459_vm1, %v7424_v37  ;;  %6169 = vmatprep.mubr.msk.f32.mxu0 %vm459_vm1, %v7306_v21 }
  0x9f   : > { %6143 = vmatprep.mubr.msk.f32.mxu1 %vm459_vm1, %v7215_v4 }
  0xa1   : > { %6170 = vmatmul.mubr.msk.f32.gmra.mrb[64].mxu0 %vm459_vm1, %v7317_v22 }
  0xa2   : > { %6144 = vmatmul.mubr.msk.f32.gmra.mrb[28].mxu1 %vm459_vm1, %v7225_v6  ;;  %6172 = vmatprep.mubr.msk.f32.mxu0 %vm459_vm1, %v7320_v23 }
  0xa3   : > { %6146 = vmatprep.mubr.msk.f32.mxu1 %vm459_vm1, %v7231_v8 }
  0xa5   : > { %6173 = vmatmul.mubr.msk.f32.gmra.mrb[66].mxu0 %vm459_vm1, %v7336_v25 }
  0xa6   : > { %6147 = vmatmul.mubr.msk.f32.gmra.mrb[30].mxu1 %vm459_vm1, %v7255_v12  ;;  %6175 = vmatprep.mubr.msk.f32.mxu0 %vm459_vm1, %v7341_v26 }
  0xa7   : > { %6149 = vmatprep.mubr.msk.f32.mxu1 %vm459_vm1, %v7265_v14 }
  0xa9   : > { %6176 = vmatmul.mubr.msk.f32.gmra.mrb[68].mxu0 %vm459_vm1, %v7354_v27 }
  0xaa   : > { %6150 = vmatmul.mubr.msk.f32.gmra.mrb[32].mxu1 %vm459_vm1, %v7283_v16  ;;  %6178 = vmatprep.mubr.msk.f32.mxu0 %vm459_vm1, %v7357_v28 }
  0xab   : > { %6152 = vmatprep.mubr.msk.f32.mxu1 %vm459_vm1, %v7289_v18 }
  0xad   : > { %6179 = vmatmul.mubr.msk.f32.gmra.mrb[70].mxu0 %vm459_vm1, %v7368_v29 }
  0xae   : > { %6153 = vmatmul.mubr.msk.f32.gmra.mrb[34].mxu1 %vm459_vm1, %v7303_v20  ;;  %6181 = vmatprep.mubr.msk.f32.mxu0 %vm459_vm1, %v7371_v30 }
  0xaf   : > { %6207 = vmatprep.mubr.msk.f32.mxu1 %vm459_vm1, %v7212_v3 }
  0xb1   : > { %6182 = vmatmul.mubr.msk.f32.gmra.mrb[72].mxu0 %vm459_vm1, %v7382_v31 }
  0xb2   : > { %6208 = vmatmul.mubr.msk.f32.vlgmr.msra.gmra.mrb[40].mxu1 %vm459_vm1, %v7218_v5  ;;  %6184 = vmatprep.mubr.msk.f32.mxu0 %vm459_vm1, %v7385_v32 }
  0xb3   : > { %6256 = vmatpush3.msk.msra.mxu1 %vm556_vm0, %v7510_v39  ;;  %6210 = vmatprep.mubr.msk.f32.mxu1 %vm459_vm1, %v7228_v7 }
  0xb4   : > { %6405 = vmatprep.subr.msk.mxu1 %vm556_vm0, %v7172_v0 }
  0xb5   : > { %6185 = vmatmul.mubr.msk.f32.gmra.mrb[74].mxu0 %vm459_vm1, %v7396_v33 }
  0xb6   : > { %6211 = vmatmul.mubr.msk.f32.gmra.mrb[42].mxu1 %vm459_vm1, %v7252_v11  ;;  %6187 = vmatprep.mubr.msk.f32.mxu0 %vm459_vm1, %v7399_v34 }
  0xb7   : > { %6213 = vmatprep.mubr.msk.f32.mxu1 %vm459_vm1, %v7262_v13 }
  0xb9   : > { %6188 = vmatmul.mubr.msk.f32.gmra.mrb[76].mxu0 %vm459_vm1, %v7410_v35 }
  0xba   : > { %6214 = vmatmul.mubr.msk.f32.gmra.mrb[44].mxu1 %vm459_vm1, %v7280_v15  ;;  %6190 = vmatprep.mubr.msk.f32.mxu0 %vm459_vm1, %v7413_v36 }
  0xbb   : > { %6216 = vmatprep.mubr.msk.f32.mxu1 %vm459_vm1, %v7286_v17 }
  0xbd   : > { %6191 = vmatmul.mubr.msk.f32.gmra.mrb[78].mxu0 %vm459_vm1, %v7424_v37 }
  0xbe   : > { %6217 = vmatmul.mubr.msk.f32.gmra.mrb[46].mxu1 %vm459_vm1, %v7300_v19  ;;  %6193 = vmatprep.mubr.msk.f32.mxu0 %vm459_vm1, %v7215_v4 }
  0xbf   : > { %6219 = vmatprep.mubr.msk.f32.mxu1 %vm459_vm1, %v7306_v21 }
  0xc1   : > { %6194 = vmatmul.mubr.msk.f32.gmra.mrb[80].mxu0 %vm459_vm1, %v7225_v6 }
  0xc2   : > { %6220 = vmatmul.mubr.msk.f32.gmra.mrb[48].mxu1 %vm459_vm1, %v7317_v22  ;;  %6196 = vmatprep.mubr.msk.f32.mxu0 %vm459_vm1, %v7231_v8 }
  0xc3   : > { %6222 = vmatprep.mubr.msk.f32.mxu1 %vm459_vm1, %v7320_v23 }
  0xc5   : > { %6197 = vmatmul.mubr.msk.f32.gmra.mrb[82].mxu0 %vm459_vm1, %v7255_v12 }
  0xc6   : > { %6223 = vmatmul.mubr.msk.f32.gmra.mrb[50].mxu1 %vm459_vm1, %v7336_v25  ;;  %6199 = vmatprep.mubr.msk.f32.mxu0 %vm459_vm1, %v7265_v14 }
  0xc7   : > { %6225 = vmatprep.mubr.msk.f32.mxu1 %vm459_vm1, %v7341_v26 }
  0xc9   : > { %6200 = vmatmul.mubr.msk.f32.gmra.mrb[84].mxu0 %vm459_vm1, %v7283_v16 }
  0xca   : > { %6226 = vmatmul.mubr.msk.f32.gmra.mrb[52].mxu1 %vm459_vm1, %v7354_v27  ;;  %6202 = vmatprep.mubr.msk.f32.mxu0 %vm459_vm1, %v7289_v18 }
  0xcb   : > { %6228 = vmatprep.mubr.msk.f32.mxu1 %vm459_vm1, %v7357_v28 }
  0xcd   : > { %6203 = vmatmul.mubr.msk.f32.gmra.mrb[86].mxu0 %vm459_vm1, %v7303_v20 }
  0xce   : > { %6229 = vmatmul.mubr.msk.f32.gmra.mrb[54].mxu1 %vm459_vm1, %v7368_v29  ;;  %6307 = vmatprep.mubr.msk.f32.mxu0 %vm459_vm1, %v7212_v3 }
  0xcf   : > { %6231 = vmatprep.mubr.msk.f32.mxu1 %vm459_vm1, %v7371_v30 }
  0xd1   : > { %6308 = vmatmul.mubr.msk.f32.vlgmr.msra.gmra.mrb[88].mxu0 %vm459_vm1, %v7218_v5 }
  0xd2   : > { %6232 = vmatmul.mubr.msk.f32.gmra.mrb[56].mxu1 %vm459_vm1, %v7382_v31  ;;  %6356 = vmatpush3.msk.msra.mxu0 %vm556_vm0, %v7583_v40 }
  0xd3   : > { %6234 = vmatprep.mubr.msk.f32.mxu1 %vm459_vm1, %v7385_v32  ;;  %6310 = vmatprep.mubr.msk.f32.mxu0 %vm459_vm1, %v7228_v7 }
  0xd4   : > { %6457 = vmatprep.subr.msk.mxu0 %vm556_vm0, %v7191_v2 }
  0xd5   : > { %6311 = vmatmul.mubr.msk.f32.gmra.mrb[90].mxu0 %vm459_vm1, %v7252_v11 }
  0xd6   : > { %6235 = vmatmul.mubr.msk.f32.gmra.mrb[58].mxu1 %vm459_vm1, %v7396_v33  ;;  %6313 = vmatprep.mubr.msk.f32.mxu0 %vm459_vm1, %v7262_v13 }
  0xd7   : > { %6237 = vmatprep.mubr.msk.f32.mxu1 %vm459_vm1, %v7399_v34 }
  0xd9   : > { %6314 = vmatmul.mubr.msk.f32.gmra.mrb[92].mxu0 %vm459_vm1, %v7280_v15 }
  0xda   : > { %6238 = vmatmul.mubr.msk.f32.gmra.mrb[60].mxu1 %vm459_vm1, %v7410_v35  ;;  %6316 = vmatprep.mubr.msk.f32.mxu0 %vm459_vm1, %v7286_v17 }
  0xdb   : > { %6240 = vmatprep.mubr.msk.f32.mxu1 %vm459_vm1, %v7413_v36 }
  0xdd   : > { %6317 = vmatmul.mubr.msk.f32.gmra.mrb[94].mxu0 %vm459_vm1, %v7300_v19 }
  0xde   : > { %6241 = vmatmul.mubr.msk.f32.gmra.mrb[62].mxu1 %vm459_vm1, %v7424_v37  ;;  %6319 = vmatprep.mubr.msk.f32.mxu0 %vm459_vm1, %v7306_v21 }
  0xdf   : > { %6243 = vmatprep.mubr.msk.f32.mxu1 %vm459_vm1, %v7215_v4 }
  0xe1   : > { %6320 = vmatmul.mubr.msk.f32.gmra.mrb[96].mxu0 %vm459_vm1, %v7317_v22 }
  0xe2   : > { %6244 = vmatmul.mubr.msk.f32.gmra.mrb[64].mxu1 %vm459_vm1, %v7225_v6  ;;  %6322 = vmatprep.mubr.msk.f32.mxu0 %vm459_vm1, %v7320_v23 }
  0xe3   : > { %6246 = vmatprep.mubr.msk.f32.mxu1 %vm459_vm1, %v7231_v8 }
  0xe5   : > { %6323 = vmatmul.mubr.msk.f32.gmra.mrb[98].mxu0 %vm459_vm1, %v7336_v25 }
  0xe6   : > { %6247 = vmatmul.mubr.msk.f32.gmra.mrb[66].mxu1 %vm459_vm1, %v7255_v12  ;;  %6325 = vmatprep.mubr.msk.f32.mxu0 %vm459_vm1, %v7341_v26 }
  0xe7   : > { %6249 = vmatprep.mubr.msk.f32.mxu1 %vm459_vm1, %v7265_v14 }
  0xe9   : > { %6326 = vmatmul.mubr.msk.f32.gmra.mrb[100].mxu0 %vm459_vm1, %v7354_v27 }
  0xea   : > { %6250 = vmatmul.mubr.msk.f32.gmra.mrb[68].mxu1 %vm459_vm1, %v7283_v16  ;;  %6328 = vmatprep.mubr.msk.f32.mxu0 %vm459_vm1, %v7357_v28 }
  0xeb   : > { %6252 = vmatprep.mubr.msk.f32.mxu1 %vm459_vm1, %v7289_v18 }
  0xed   : > { %6329 = vmatmul.mubr.msk.f32.gmra.mrb[102].mxu0 %vm459_vm1, %v7368_v29 }
  0xee   : > { %6253 = vmatmul.mubr.msk.f32.gmra.mrb[70].mxu1 %vm459_vm1, %v7303_v20  ;;  %6331 = vmatprep.mubr.msk.f32.mxu0 %vm459_vm1, %v7371_v30 }
  0xef   : > { %6257 = vmatprep.mubr.msk.f32.mxu1 %vm459_vm1, %v7212_v3 }
  0xf1   : > { %6332 = vmatmul.mubr.msk.f32.gmra.mrb[104].mxu0 %vm459_vm1, %v7382_v31 }
  0xf2   : > { %6258 = vmatmul.mubr.msk.f32.vlgmr.msra.gmra.mrb[32].mxu1 %vm459_vm1, %v7218_v5  ;;  %6334 = vmatprep.mubr.msk.f32.mxu0 %vm459_vm1, %v7385_v32 }
  0xf3   : > { %6406 = vmatpush3.msk.msra.mxu1 %vm556_vm0, %v7172_v0  ;;  %6260 = vmatprep.mubr.msk.f32.mxu1 %vm459_vm1, %v7228_v7 }
  0xf4   : > { %6431 = vmatprep.subr.msk.mxu1 %vm556_vm0, %v7186_v1  ;;  %v5959_v43 = vpop.f32.mrb[0].mxu0 }
  0xf5   : > { %v5995_v44 = vpop.f32.mrb[0].mxu1  ;;  %v786_v45 = vrot.slane %v5959_v43, 1  ;;  %v626_v46 = vpop.f32.mrb[1].mxu0  ;;  %6335 = vmatmul.mubr.msk.f32.gmra.mrb[106].mxu0 %vm459_vm1, %v7396_v33 }
  0xf6   : > { %v7804_v47 = vpop.f32.mrb[1].mxu1  ;;  %6261 = vmatmul.mubr.msk.f32.gmra.mrb[34].mxu1 %vm459_vm1, %v7252_v11  ;;  %v785_v48 = vrot.slane %v626_v46, 1  ;;  %6337 = vmatprep.mubr.msk.f32.mxu0 %vm459_vm1, %v7399_v34 }
  0xf7   : > { %6263 = vmatprep.mubr.msk.f32.mxu1 %vm459_vm1, %v7262_v13 }
  0xf8   : > { %v7816_v49 = vsel %vm819_vm2, %v785_v48, %v786_v45  ;;  %v5962_v50 = vpop.f32.mrb[2].mxu0 }
  0xf9   : > { %v5998_v51 = vpop.f32.mrb[2].mxu1  ;;  %v788_v52 = vrot.slane %v5962_v50, 1  ;;  %v636_v53 = vpop.f32.mrb[3].mxu0  ;;  %6338 = vmatmul.mubr.msk.f32.gmra.mrb[108].mxu0 %vm459_vm1, %v7410_v35 }
  0xfa   : > { %v756_v54 = vpop.f32.mrb[3].mxu1  ;;  %6264 = vmatmul.mubr.msk.f32.gmra.mrb[36].mxu1 %vm459_vm1, %v7280_v15  ;;  %v787_v55 = vrot.slane %v636_v53, 1  ;;  %6340 = vmatprep.mubr.msk.f32.mxu0 %vm459_vm1, %v7413_v36 }
  0xfb   : > { %6266 = vmatprep.mubr.msk.f32.mxu1 %vm459_vm1, %v7286_v17 }
  0xfc   : > { %v7828_v56 = vsel %vm819_vm2, %v787_v55, %v788_v52  ;;  %v7832_v57 = vsel %vm819_vm2, %v786_v45, %v787_v55  ;;  %v5965_v58 = vpop.f32.mrb[4].mxu0 }
  0xfd   : > { %v6001_v59 = vpop.f32.mrb[4].mxu1  ;;  %v790_v60 = vrot.slane %v5965_v58, 1  ;;  %v646_v61 = vpop.f32.mrb[5].mxu0  ;;  %6341 = vmatmul.mubr.msk.f32.gmra.mrb[110].mxu0 %vm459_vm1, %v7424_v37 }
  0xfe   : > { %v766_v62 = vpop.f32.mrb[5].mxu1  ;;  %6267 = vmatmul.mubr.msk.f32.gmra.mrb[38].mxu1 %vm459_vm1, %v7300_v19  ;;  %v789_v63 = vrot.slane %v646_v61, 1  ;;  %6343 = vmatprep.mubr.msk.f32.mxu0 %vm459_vm1, %v7215_v4 }
  0xff   : > { %6269 = vmatprep.mubr.msk.f32.mxu1 %vm459_vm1, %v7306_v21 }
 0x100   : > { %v7844_v0 = vsel %vm819_vm2, %v789_v63, %v790_v60  ;;  %v7848_v24 = vsel %vm819_vm2, %v788_v52, %v789_v63  ;;  %v5968_v41 = vpop.f32.mrb[6].mxu0 }
 0x101   : > { %v6004_v43 = vpop.f32.mrb[6].mxu1  ;;  %v792_v44 = vrot.slane %v5968_v41, 1  ;;  %v656_v45 = vpop.f32.mrb[7].mxu0  ;;  %6344 = vmatmul.mubr.msk.f32.gmra.mrb[112].mxu0 %vm459_vm1, %v7225_v6 }
 0x102   : > { %v776_v46 = vpop.f32.mrb[7].mxu1  ;;  %6270 = vmatmul.mubr.msk.f32.gmra.mrb[8].mxu1 %vm459_vm1, %v7317_v22  ;;  %v791_v48 = vrot.slane %v656_v45, 1  ;;  %6346 = vmatprep.mubr.msk.f32.mxu0 %vm459_vm1, %v7231_v8 }
 0x103   : > { %6272 = vmatprep.mubr.msk.f32.mxu1 %vm459_vm1, %v7320_v23 }
 0x104   : > { %v7860_v50 = vsel %vm819_vm2, %v791_v48, %v792_v44  ;;  %v7864_v51 = vsel %vm819_vm2, %v790_v60, %v791_v48  ;;  %v5971_v52 = vpop.f32.mrb[8].mxu0 }
 0x105   : > { %v794_v53 = vrot.slane %v5971_v52, 1  ;;  %v666_v54 = vpop.f32.mrb[9].mxu0  ;;  %6347 = vmatmul.mubr.msk.f32.gmra.mrb[114].mxu0 %vm459_vm1, %v7255_v12 }
 0x106   : > { %6273 = vmatmul.mubr.msk.f32.gmra.mrb[10].mxu1 %vm459_vm1, %v7336_v25  ;;  %v793_v55 = vrot.slane %v666_v54, 1  ;;  %6349 = vmatprep.mubr.msk.f32.mxu0 %vm459_vm1, %v7265_v14 }
 0x107   : > { %6275 = vmatprep.mubr.msk.f32.mxu1 %vm459_vm1, %v7341_v26 }
 0x108   : > { %v7876_v58 = vsel %vm819_vm2, %v793_v55, %v794_v53  ;;  %v7880_v59 = vsel %vm819_vm2, %v792_v44, %v793_v55  ;;  %v5974_v60 = vpop.f32.mrb[10].mxu0 }
 0x109   : > { %v796_v61 = vrot.slane %v5974_v60, 1  ;;  %v676_v62 = vpop.f32.mrb[11].mxu0  ;;  %6350 = vmatmul.mubr.msk.f32.gmra.mrb[116].mxu0 %vm459_vm1, %v7283_v16 }
 0x10a   : > { %6276 = vmatmul.mubr.msk.f32.gmra.mrb[12].mxu1 %vm459_vm1, %v7354_v27  ;;  %v795_v63 = vrot.slane %v676_v62, 1  ;;  %6352 = vmatprep.mubr.msk.f32.mxu0 %vm459_vm1, %v7289_v18 }
 0x10b   : > { %6278 = vmatprep.mubr.msk.f32.mxu1 %vm459_vm1, %v7357_v28 }
 0x10c   : > { %v7892_v41 = vsel %vm819_vm2, %v795_v63, %v796_v61  ;;  %v7896_v43 = vsel %vm819_vm2, %v794_v53, %v795_v63  ;;  %v5977_v44 = vpop.f32.mrb[12].mxu0 }
 0x10d   : > { %v798_v45 = vrot.slane %v5977_v44, 1  ;;  %v686_v46 = vpop.f32.mrb[13].mxu0  ;;  %6353 = vmatmul.mubr.msk.f32.gmra.mrb[118].mxu0 %vm459_vm1, %v7303_v20 }
 0x10e   : > { %6279 = vmatmul.mubr.msk.f32.gmra.mrb[14].mxu1 %vm459_vm1, %v7368_v29  ;;  %v797_v48 = vrot.slane %v686_v46, 1  ;;  %6357 = vmatprep.mubr.msk.f32.mxu0 %vm459_vm1, %v7212_v3 }
 0x10f   : > { %6281 = vmatprep.mubr.msk.f32.mxu1 %vm459_vm1, %v7371_v30 }
 0x110   : > { %v7908_v52 = vsel %vm819_vm2, %v797_v48, %v798_v45  ;;  %v7912_v53 = vsel %vm819_vm2, %v796_v61, %v797_v48  ;;  %v5980_v54 = vpop.f32.mrb[14].mxu0 }
 0x111   : > { %v800_v55 = vrot.slane %v5980_v54, 1  ;;  %v696_v60 = vpop.f32.mrb[15].mxu0  ;;  %6358 = vmatmul.mubr.msk.f32.vlgmr.msra.gmra.mrb[120].mxu0 %vm459_vm1, %v7218_v5 }
 0x112   : > { %6282 = vmatmul.mubr.msk.f32.gmra.mrb[16].mxu1 %vm459_vm1, %v7382_v31  ;;  %v799_v62 = vrot.slane %v696_v60, 1  ;;  %6458 = vmatpush3.msk.msra.mxu0 %vm556_vm0, %v7191_v2 }
 0x113   : > { %6284 = vmatprep.mubr.msk.f32.mxu1 %vm459_vm1, %v7385_v32  ;;  %6360 = vmatprep.mubr.msk.f32.mxu0 %vm459_vm1, %v7228_v7 }
 0x114   : > { %6509 = vmatprep.subr.msk.mxu0 %vm556_vm0, %v7245_v10  ;;  %v7928_v3 = vsel %vm819_vm2, %v799_v62, %v800_v55  ;;  %v7932_v5 = vsel %vm819_vm2, %v798_v45, %v799_v62  ;;  %v5983_v61 = vpop.f32.mrb[16].mxu0 }
 0x115   : > { %v802_v63 = vrot.slane %v5983_v61, 1  ;;  %v706_v2 = vpop.f32.mrb[17].mxu0  ;;  %6361 = vmatmul.mubr.msk.f32.gmra.mrb[122].mxu0 %vm459_vm1, %v7252_v11 }
 0x116   : > { %6285 = vmatmul.mubr.msk.f32.gmra.mrb[18].mxu1 %vm459_vm1, %v7396_v33  ;;  %v801_v7 = vrot.slane %v706_v2, 1  ;;  %6363 = vmatprep.mubr.msk.f32.mxu0 %vm459_vm1, %v7262_v13  ;;  %v809_v2 = vrot.slane %v7804_v47, 1 }
 0x117   : > { %6287 = vmatprep.mubr.msk.f32.mxu1 %vm459_vm1, %v7399_v34 }
 0x118   : > { %v7944_v10 = vsel %vm819_vm2, %v801_v7, %v802_v63  ;;  %v7948_v44 = vsel %vm819_vm2, %v800_v55, %v801_v7  ;;  %v5986_v45 = vpop.f32.mrb[18].mxu0 }
 0x119   : > { %v804_v46 = vrot.slane %v5986_v45, 1  ;;  %v716_v48 = vpop.f32.mrb[19].mxu0  ;;  %6364 = vmatmul.mubr.msk.f32.gmra.mrb[124].mxu0 %vm459_vm1, %v7280_v15 }
 0x11a   : > { %6288 = vmatmul.mubr.msk.f32.gmra.mrb[20].mxu1 %vm459_vm1, %v7410_v35  ;;  %v803_v11 = vrot.slane %v716_v48, 1  ;;  %6366 = vmatprep.mubr.msk.f32.mxu0 %vm459_vm1, %v7286_v17 }
 0x11b   : > { %6290 = vmatprep.mubr.msk.f32.mxu1 %vm459_vm1, %v7413_v36 }
 0x11c   : > { %v7960_v13 = vsel %vm819_vm2, %v803_v11, %v804_v46  ;;  %v7964_v54 = vsel %vm819_vm2, %v802_v63, %v803_v11  ;;  %v5989_v55 = vpop.f32.mrb[20].mxu0 }
 0x11d   : > { %v806_v60 = vrot.slane %v5989_v55, 1  ;;  %v726_v62 = vpop.f32.mrb[21].mxu0  ;;  %6367 = vmatmul.mubr.msk.f32.gmra.mrb[126].mxu0 %vm459_vm1, %v7300_v19 }
 0x11e   : > { %6291 = vmatmul.mubr.msk.f32.gmra.mrb[22].mxu1 %vm459_vm1, %v7424_v37  ;;  %v805_v15 = vrot.slane %v726_v62, 1  ;;  %6369 = vmatprep.mubr.msk.f32.mxu0 %vm459_vm1, %v7306_v21 }
 0x11f   : > { %6293 = vmatprep.mubr.msk.f32.mxu1 %vm459_vm1, %v7215_v4 }
 0x120   : > { %v7976_v17 = vsel %vm819_vm2, %v805_v15, %v806_v60  ;;  %v7980_v61 = vsel %vm819_vm2, %v804_v46, %v805_v15  ;;  %v5992_v63 = vpop.f32.mrb[22].mxu0 }
 0x121   : > { %v808_v19 = vrot.slane %v5992_v63, 1  ;;  %v736_v7 = vpop.f32.mrb[23].mxu0  ;;  %6370 = vmatmul.mubr.msk.f32.gmra.mrb[128].mxu0 %vm459_vm1, %v7317_v22 }
 0x122   : > { %6294 = vmatmul.mubr.msk.f32.gmra.mrb[24].mxu1 %vm459_vm1, %v7225_v6  ;;  %v807_v21 = vrot.slane %v736_v7, 1  ;;  %6372 = vmatprep.mubr.msk.f32.mxu0 %vm459_vm1, %v7320_v23 }
 0x123   : > { %6296 = vmatprep.mubr.msk.f32.mxu1 %vm459_vm1, %v7231_v8  ;;  %v7993_v45 = vsel %vm819_vm2, %v808_v19, %v809_v2 }
 0x124   : > { %v7997_v47 = vsel %vm819_vm2, %v807_v21, %v808_v19  ;;  %v8001_v46 = vsel %vm819_vm2, %v806_v60, %v807_v21  ;;  %v6059_v22 = vpop.f32.mrb[24].mxu0 }
 0x125   : > { %v1311_v48 = vrot.slane %v6059_v22, 2  ;;  %v1151_v11 = vpop.f32.mrb[25].mxu0  ;;  %6373 = vmatmul.mubr.msk.f32.gmra.mrb[130].mxu0 %vm459_vm1, %v7336_v25 }
 0x126   : > { %6297 = vmatmul.mubr.msk.f32.gmra.mrb[26].mxu1 %vm459_vm1, %v7255_v12  ;;  %v1310_v23 = vrot.slane %v1151_v11, 2  ;;  %6375 = vmatprep.mubr.msk.f32.mxu0 %vm459_vm1, %v7341_v26 }
 0x127   : > { %6299 = vmatprep.mubr.msk.f32.mxu1 %vm459_vm1, %v7265_v14 }
 0x128   : > { %v1373_v55 = vsel %vm1342_vm3, %v1310_v23, %v1311_v48  ;;  %v6062_v60 = vpop.f32.mrb[26].mxu0 }
 0x129   : > { %v8019_v62 = vadd.f32 %v1373_v55, %v7816_v49  ;;  %v1313_v15 = vrot.slane %v6062_v60, 2  ;;  %v1161_v63 = vpop.f32.mrb[27].mxu0  ;;  %6376 = vmatmul.mubr.msk.f32.gmra.mrb[132].mxu0 %vm459_vm1, %v7354_v27 }
 0x12a   : > { %6300 = vmatmul.mubr.msk.f32.gmra.mrb[28].mxu1 %vm459_vm1, %v7283_v16  ;;  %v1312_v25 = vrot.slane %v1161_v63, 2  ;;  %6378 = vmatprep.mubr.msk.f32.mxu0 %vm459_vm1, %v7357_v28 }
 0x12b   : > { %6302 = vmatprep.mubr.msk.f32.mxu1 %vm459_vm1, %v7289_v18 }
 0x12c   : > { %v1371_v26 = vsel %vm1342_vm3, %v1312_v25, %v1313_v15  ;;  %v1372_v49 = vsel %vm1342_vm3, %v1311_v48, %v1312_v25  ;;  %v6065_v2 = vpop.f32.mrb[28].mxu0 }
 0x12d   : > { %v8038_v27 = vadd.f32 %v1372_v49, %v7832_v57  ;;  %v8041_v19 = vadd.f32 %v1371_v26, %v7828_v56  ;;  %v1315_v7 = vrot.slane %v6065_v2, 2  ;;  %v1171_v21 = vpop.f32.mrb[29].mxu0  ;;  %6379 = vmatmul.mubr.msk.f32.gmra.mrb[134].mxu0 %vm459_vm1, %v7368_v29 }
 0x12e   : > { %6303 = vmatmul.mubr.msk.f32.gmra.mrb[30].mxu1 %vm459_vm1, %v7303_v20  ;;  %v1314_v28 = vrot.slane %v1171_v21, 2  ;;  %6381 = vmatprep.mubr.msk.f32.mxu0 %vm459_vm1, %v7371_v30 }
 0x12f   : > { %6407 = vmatprep.mubr.msk.f32.mxu1 %vm459_vm1, %v7215_v4 }
 0x130   : > { %v1369_v56 = vsel %vm1342_vm3, %v1314_v28, %v1315_v7  ;;  %v1370_v29 = vsel %vm1342_vm3, %v1313_v15, %v1314_v28  ;;  %v6068_v57 = vpop.f32.mrb[30].mxu0 }
 0x131   : > { %v8061_v22 = vadd.f32 %v1370_v29, %v7848_v24  ;;  %v8064_v30 = vadd.f32 %v1369_v56, %v7844_v0  ;;  %v1317_v48 = vrot.slane %v6068_v57, 2  ;;  %v1181_v11 = vpop.f32.mrb[31].mxu0  ;;  %6382 = vmatmul.mubr.msk.f32.gmra.mrb[136].mxu0 %vm459_vm1, %v7382_v31 }
 0x132   : > { %6408 = vmatmul.mubr.msk.f32.vlgmr.msra.gmra.mrb[72].mxu1 %vm459_vm1, %v7225_v6  ;;  %v1316_v23 = vrot.slane %v1181_v11, 2  ;;  %6384 = vmatprep.mubr.msk.f32.mxu0 %vm459_vm1, %v7385_v32 }
 0x133   : > { %6432 = vmatpush3.msk.msra.mxu1 %vm556_vm0, %v7186_v1  ;;  %6410 = vmatprep.mubr.msk.f32.mxu1 %vm459_vm1, %v7231_v8 }
 0x134   : > { %6483 = vmatprep.subr.msk.mxu1 %vm556_vm0, %v7240_v9  ;;  %v1367_v31 = vsel %vm1342_vm3, %v1316_v23, %v1317_v48  ;;  %v1368_v1 = vsel %vm1342_vm3, %v1315_v7, %v1316_v23  ;;  %v6071_v0 = vpop.f32.mrb[32].mxu0 }
 0x135   : > { %v8088_v32 = vadd.f32 %v1368_v1, %v7864_v51  ;;  %v8091_v24 = vadd.f32 %v1367_v31, %v7860_v50  ;;  %v1319_v55 = vrot.slane %v6071_v0, 2  ;;  %v1191_v60 = vpop.f32.mrb[33].mxu0  ;;  %6385 = vmatmul.mubr.msk.f32.gmra.mrb[138].mxu0 %vm459_vm1, %v7396_v33 }
 0x136   : > { %6411 = vmatmul.mubr.msk.f32.gmra.mrb[74].mxu1 %vm459_vm1, %v7255_v12  ;;  %v1318_v9 = vrot.slane %v1191_v60, 2  ;;  %6387 = vmatprep.mubr.msk.f32.mxu0 %vm459_vm1, %v7399_v34 }
 0x137   : > { %6413 = vmatprep.mubr.msk.f32.mxu1 %vm459_vm1, %v7265_v14 }
 0x138   : > { %v1365_v50 = vsel %vm1342_vm3, %v1318_v9, %v1319_v55  ;;  %v1366_v51 = vsel %vm1342_vm3, %v1317_v48, %v1318_v9  ;;  %v6074_v33 = vpop.f32.mrb[34].mxu0 }
 0x139   : > { %v8112_v34 = vadd.f32 %v1366_v51, %v7880_v59  ;;  %v8115_v15 = vadd.f32 %v1365_v50, %v7876_v58  ;;  %v1321_v63 = vrot.slane %v6074_v33, 2  ;;  %v1201_v25 = vpop.f32.mrb[35].mxu0  ;;  %6388 = vmatmul.mubr.msk.f32.gmra.mrb[140].mxu0 %vm459_vm1, %v7410_v35  ;;  %v8127_v58 = vld [vmem:[%s8109_s30] sm:$0xff] }
 0x13a   : > { %6414 = vmatmul.mubr.msk.f32.gmra.mrb[76].mxu1 %vm459_vm1, %v7283_v16  ;;  %v1320_v26 = vrot.slane %v1201_v25, 2  ;;  %6390 = vmatprep.mubr.msk.f32.mxu0 %vm459_vm1, %v7413_v36 }
 0x13b   : > { %6416 = vmatprep.mubr.msk.f32.mxu1 %vm459_vm1, %v7289_v18 }
 0x13c   : > { %v1363_v59 = vsel %vm1342_vm3, %v1320_v26, %v1321_v63  ;;  %v1364_v35 = vsel %vm1342_vm3, %v1319_v55, %v1320_v26  ;;  %v6077_v49 = vpop.f32.mrb[36].mxu0 }
 0x13d   : > { %v8134_v2 = vadd.f32 %v1364_v35, %v7896_v43  ;;  %v8137_v36 = vadd.f32 %v1363_v59, %v7892_v41  ;;  %v1323_v7 = vrot.slane %v6077_v49, 2  ;;  %v1211_v21 = vpop.f32.mrb[37].mxu0  ;;  %6391 = vmatmul.mubr.msk.f32.gmra.mrb[142].mxu0 %vm459_vm1, %v7424_v37  ;;  %v8148_v43 = vld [vmem:[%s8109_s30 + $0x8] sm:$0xff]  ;;  %v8151_v41 = vld [vmem:[%s8109_s30 + $0x10] sm:$0xff] }
 0x13e   : > { %6417 = vmatmul.mubr.msk.f32.gmra.mrb[78].mxu1 %vm459_vm1, %v7303_v20  ;;  %v1322_v28 = vrot.slane %v1211_v21, 2  ;;  %6393 = vmatprep.mubr.msk.f32.mxu0 %vm459_vm1, %v7215_v4 }
 0x13f   : > { %6419 = vmatprep.mubr.msk.f32.mxu1 %vm459_vm1, %v8127_v58 }
 0x140   : > { %v1361_v56 = vsel %vm1342_vm3, %v1322_v28, %v1323_v7  ;;  %v1362_v37 = vsel %vm1342_vm3, %v1321_v63, %v1322_v28  ;;  %v6080_v20 = vpop.f32.mrb[38].mxu0  ;;  %v8245_v28 = vld [vmem:[%s7209_s16 + $0xc0] sm:$0xff] }
 0x141   : > { %v8163_v4 = vadd.f32 %v1362_v37, %v7912_v53  ;;  %v8166_v29 = vadd.f32 %v1361_v56, %v7908_v52  ;;  %v1325_v57 = vrot.slane %v6080_v20, 2  ;;  %v1221_v48 = vpop.f32.mrb[39].mxu0  ;;  %6394 = vmatmul.mubr.msk.f32.gmra.mrb[144].mxu0 %vm459_vm1, %v7225_v6  ;;  %v8177_v53 = vld [vmem:[%s8109_s30 + $0x18] sm:$0xff]  ;;  %v8180_v52 = vld [vmem:[%s8160_s12] sm:$0xff]  ;;  %s5488_s30 = sshll.u32 %s7047_s21, 5 }
 0x142   : > { %6420 = vmatmul.mubr.msk.f32.gmra.mrb[80].mxu1 %vm459_vm1, %v8148_v43  ;;  %v1324_v11 = vrot.slane %v1221_v48, 2  ;;  %6396 = vmatprep.mubr.msk.f32.mxu0 %vm459_vm1, %v7231_v8 }
 0x143   : > { %6422 = vmatprep.mubr.msk.f32.mxu1 %vm459_vm1, %v8151_v41 }
 0x144   : > { %v1359_v23 = vsel %vm1342_vm3, %v1324_v11, %v1325_v57  ;;  %v1360_v6 = vsel %vm1342_vm3, %v1323_v7, %v1324_v11  ;;  %v6083_v31 = vpop.f32.mrb[40].mxu0  ;;  %v8238_v7 = vld [vmem:[%s7209_s16 + $0xf8] sm:$0xff]  ;;  %v8262_v11 = vld [vmem:[%s7209_s16 + $0xc8] sm:$0xff] }
 0x145   : > { %v8187_v1 = vadd.f32 %v1360_v6, %v7932_v5  ;;  %v8190_v8 = vadd.f32 %v1359_v23, %v7928_v3  ;;  %v1327_v0 = vrot.slane %v6083_v31, 2  ;;  %v1231_v55 = vpop.f32.mrb[41].mxu0  ;;  %6397 = vmatmul.mubr.msk.f32.gmra.mrb[146].mxu0 %vm459_vm1, %v7255_v12  ;;  %v8201_v5 = vld [vmem:[%s8160_s12 + $0x8] sm:$0xff]  ;;  %v8204_v3 = vld [vmem:[%s8160_s12 + $0x10] sm:$0xff] }
 0x146   : > { %6423 = vmatmul.mubr.msk.f32.gmra.mrb[82].mxu1 %vm459_vm1, %v8177_v53  ;;  %v1326_v60 = vrot.slane %v1231_v55, 2  ;;  %6399 = vmatprep.mubr.msk.f32.mxu0 %vm459_vm1, %v7265_v14  ;;  %v6958_v6 = vld [vmem:[%s9397_s3 + $0xc] sm:$0xf] }
 0x147   : > { %6425 = vmatprep.mubr.msk.f32.mxu1 %vm459_vm1, %v8180_v52 }
 0x148   : > { %v1357_v9 = vsel %vm1342_vm3, %v1326_v60, %v1327_v0  ;;  %v1358_v12 = vsel %vm1342_vm3, %v1325_v57, %v1326_v60  ;;  %v6086_v50 = vpop.f32.mrb[42].mxu0  ;;  %v8290_v60 = vld [vmem:[%s9397_s3 + $0x14] sm:$0xf] }
 0x149   : > { %v8211_v51 = vadd.f32 %v1358_v12, %v7948_v44  ;;  %v8214_v14 = vadd.f32 %v1357_v9, %v7944_v10  ;;  %v1329_v33 = vrot.slane %v6086_v50, 2  ;;  %v1241_v63 = vpop.f32.mrb[43].mxu0  ;;  %6400 = vmatmul.mubr.msk.f32.gmra.mrb[148].mxu0 %vm459_vm1, %v7283_v16  ;;  %v8225_v44 = vld [vmem:[%s8160_s12 + $0x18] sm:$0xff]  ;;  %s9342_s12 = scalar_lea.sflag [#allocation3], %s365_s13 }
 0x14a   : > { %6426 = vmatmul.mubr.msk.f32.gmra.mrb[84].mxu1 %vm459_vm1, %v8201_v5  ;;  %v1328_v25 = vrot.slane %v1241_v63, 2  ;;  %6402 = vmatprep.mubr.msk.f32.mxu0 %vm459_vm1, %v7289_v18 }
 0x14b   : > { %6428 = vmatprep.mubr.msk.f32.mxu1 %vm459_vm1, %v8204_v3 }
 0x14c   : > { %v1355_v10 = vsel %vm1342_vm3, %v1328_v25, %v1329_v33  ;;  %v1356_v26 = vsel %vm1342_vm3, %v1327_v0, %v1328_v25  ;;  %v6089_v16 = vpop.f32.mrb[44].mxu0  ;;  %v8310_v25 = vld [vmem:[%s7209_s16 + $0xe0] sm:$0xff] }
 0x14d   : > { %v8232_v59 = vadd.f32 %v1356_v26, %v7964_v54  ;;  %v8235_v35 = vadd.f32 %v1355_v10, %v7960_v13  ;;  %v1331_v49 = vrot.slane %v6089_v16, 2  ;;  %v1251_v18 = vpop.f32.mrb[45].mxu0  ;;  %6403 = vmatmul.mubr.msk.f32.gmra.mrb[150].mxu0 %vm459_vm1, %v8238_v7  ;;  %v8322_v26 = vld [vmem:[%s7209_s16 + $0xe8] sm:$0xff]  ;;  %v8329_v16 = vld [vmem:[%s7209_s16 + $0xf0] sm:$0xff] }
 0x14e   : > { %6429 = vmatmul.mubr.msk.f32.gmra.mrb[86].mxu1 %vm459_vm1, %v8225_v44  ;;  %v1330_v21 = vrot.slane %v1251_v18, 2  ;;  %6459 = vmatprep.mubr.msk.f32.mxu0 %vm459_vm1, %v8245_v28 }
 0x14f   : > { %6433 = vmatprep.mubr.msk.f32.mxu1 %vm459_vm1, %v8245_v28 }
 0x150   : > { %v1353_v13 = vsel %vm1342_vm3, %v1330_v21, %v1331_v49  ;;  %v1354_v54 = vsel %vm1342_vm3, %v1329_v33, %v1330_v21  ;;  %v6092_v56 = vpop.f32.mrb[46].mxu0  ;;  %v8303_v33 = vld [vmem:[%s7209_s16 + $0xd8] sm:$0xff] }
 0x151   : > { %v8256_v37 = vadd.f32 %v1354_v54, %v7980_v61  ;;  %v8259_v20 = vadd.f32 %v1353_v13, %v7976_v17  ;;  %v1333_v57 = vrot.slane %v6092_v56, 2  ;;  %v1261_v48 = vpop.f32.mrb[47].mxu0  ;;  %6460 = vmatmul.mubr.msk.f32.vlgmr.msra.gmra.mrb[152].mxu0 %vm459_vm1, %v8262_v11  ;;  %v6959_v17 = vld [vmem:[%s9397_s3 + $0x10] sm:$0xf] }
 0x152   : > { %6434 = vmatmul.mubr.msk.f32.vlgmr.msra.gmra.mrb[88].mxu1 %vm459_vm1, %v8262_v11  ;;  %v1332_v23 = vrot.slane %v1261_v48, 2  ;;  %6510 = vmatpush3.msk.msra.mxu0 %vm556_vm0, %v6959_v17  ;;  %v8277_v61 = vld [vmem:[%s7209_s16 + $0xd0] sm:$0xff]  ;;  %s5489_s16 = sshll.u32 %s7051_s22, 6 }
 0x153   : > { %6484 = vmatpush3.msk.msra.mxu1 %vm556_vm0, %v6958_v6  ;;  %6436 = vmatprep.mubr.msk.f32.mxu1 %vm459_vm1, %v8277_v61  ;;  %s4838_s21 = sadd.s32 %s5489_s16, %s5488_s30  ;;  %s6975_s30 = scalar_lea.vmem %s6974_s26, 8192 }
 0x154   : > { %6462 = vmatprep.mubr.msk.f32.mxu0 %vm459_vm1, %v8277_v61  ;;  %v1351_v31 = vsel %vm1342_vm3, %v1332_v23, %v1333_v57  ;;  %v1352_v0 = vsel %vm1342_vm3, %v1331_v49, %v1332_v23  ;;  %v6095_v55 = vpop.f32.mrb[48].mxu0  ;;  %6535 = vmatprep.subr.msk.mxu1 %vm556_vm0, %v8290_v60  ;;  %s5490_s22 = sshll.u32 %s4838_s21, 7  ;;  %p6977_p7 = scmp.lt.s32.totalorder %s6975_s30, %s6969_s15 }
 0x155   : > { %6587 = vmatprep.subr.msk.mxu0 %vm556_vm0, %v7437_v38  ;;  %v8297_v9 = vadd.f32 %v1352_v0, %v8001_v46  ;;  %v8300_v12 = vadd.f32 %v1351_v31, %v7997_v47  ;;  %v1271_v50 = vpop.f32.mrb[49].mxu0  ;;  %6463 = vmatmul.mubr.msk.f32.gmra.mrb[154].mxu0 %vm459_vm1, %v8303_v33  ;;  %s9333_s10 = scalar_lea.hbm %s9399_s5, %s5490_s22 }
 0x156   : > { %6437 = vmatmul.mubr.msk.f32.gmra.mrb[90].mxu1 %vm459_vm1, %v8303_v33  ;;  %v1334_v63 = vrot.slane %v1271_v50, 2  ;;  %6465 = vmatprep.mubr.msk.f32.mxu0 %vm459_vm1, %v8310_v25  ;;  %p6978_p9 = por %p6977_p7, %p6976_p6 }
 0x157   : > { %6439 = vmatprep.mubr.msk.f32.mxu1 %vm459_vm1, %v8310_v25 }
 0x158   : > { %v1350_v38 = vsel %vm1342_vm3, %v1333_v57, %v1334_v63  ;;  %v6098_v47 = vpop.f32.mrb[50].mxu0  ;;  %p6979_p10 = pnand %p6978_p9, %p6972_p5 }
 0x159   : > { %v8319_v46 = vadd.f32 %v1350_v38, %v7993_v45  ;;  %v1281_v10 = vpop.f32.mrb[51].mxu0  ;;  %6466 = vmatmul.mubr.msk.f32.gmra.mrb[156].mxu0 %vm459_vm1, %v8322_v26  ;;  %v6966_v47 = vld [vmem:[%s9397_s3 + $0x1c] sm:$0xf] }
 0x15a   : > { %6440 = vmatmul.mubr.msk.f32.gmra.mrb[92].mxu1 %vm459_vm1, %v8322_v26  ;;  %6468 = vmatprep.mubr.msk.f32.mxu0 %vm459_vm1, %v8329_v16 }
 0x15b   : > { %6442 = vmatprep.mubr.msk.f32.mxu1 %vm459_vm1, %v8329_v16 }
 0x15c   : > { %v6101_v49 = vpop.f32.mrb[52].mxu0 }
 0x15d   : > { %v1291_v45 = vpop.f32.mrb[53].mxu0  ;;  %6469 = vmatmul.mubr.msk.f32.gmra.mrb[158].mxu0 %vm459_vm1, %v8238_v7 }
 0x15e   : > { %6443 = vmatmul.mubr.msk.f32.gmra.mrb[94].mxu1 %vm459_vm1, %v8238_v7  ;;  %6471 = vmatprep.mubr.msk.f32.mxu0 %vm459_vm1, %v8127_v58 }
 0x15f   : > { %6445 = vmatprep.mubr.msk.f32.mxu1 %vm459_vm1, %v8127_v58 }
 0x160   : > { %v6104_v18 = vpop.f32.mrb[54].mxu0 }
 0x161   : > { %v1301_v21 = vpop.f32.mrb[55].mxu0  ;;  %6472 = vmatmul.mubr.msk.f32.gmra.mrb[160].mxu0 %vm459_vm1, %v8148_v43 }
 0x162   : > { %6446 = vmatmul.mubr.msk.f32.gmra.mrb[96].mxu1 %vm459_vm1, %v8148_v43  ;;  %6474 = vmatprep.mubr.msk.f32.mxu0 %vm459_vm1, %v8151_v41 }
 0x163   : > { %6448 = vmatprep.mubr.msk.f32.mxu1 %vm459_vm1, %v8151_v41 }
 0x164   : > { %v6159_v13 = vpop.f32.mrb[56].mxu0 }
 0x165   : > { %v1740_v54 = vpop.f32.mrb[57].mxu0  ;;  %6475 = vmatmul.mubr.msk.f32.gmra.mrb[162].mxu0 %vm459_vm1, %v8177_v53 }
 0x166   : > { %6449 = vmatmul.mubr.msk.f32.gmra.mrb[98].mxu1 %vm459_vm1, %v8177_v53  ;;  %6477 = vmatprep.mubr.msk.f32.mxu0 %vm459_vm1, %v8180_v52 }
 0x167   : > { %6451 = vmatprep.mubr.msk.f32.mxu1 %vm459_vm1, %v8180_v52 }
 0x168   : > { %v6162_v56 = vpop.f32.mrb[58].mxu0 }
 0x169   : > { %v1750_v57 = vpop.f32.mrb[59].mxu0  ;;  %6478 = vmatmul.mubr.msk.f32.gmra.mrb[164].mxu0 %vm459_vm1, %v8201_v5 }
 0x16a   : > { %6452 = vmatmul.mubr.msk.f32.gmra.mrb[100].mxu1 %vm459_vm1, %v8201_v5  ;;  %6480 = vmatprep.mubr.msk.f32.mxu0 %vm459_vm1, %v8204_v3 }
 0x16b   : > { %6454 = vmatprep.mubr.msk.f32.mxu1 %vm459_vm1, %v8204_v3 }
 0x16c   : > { %v6165_v48 = vpop.f32.mrb[60].mxu0 }
 0x16d   : > { %v1904_v23 = vrot.slane %v6165_v48, 1  ;;  %v1760_v6 = vpop.f32.mrb[61].mxu0  ;;  %6481 = vmatmul.mubr.msk.f32.gmra.mrb[166].mxu0 %vm459_vm1, %v8225_v44 }
 0x16e   : > { %6455 = vmatmul.mubr.msk.f32.gmra.mrb[102].mxu1 %vm459_vm1, %v8225_v44  ;;  %v1903_v17 = vrot.slane %v1760_v6, 1  ;;  %6511 = vmatprep.mubr.msk.f32.mxu0 %vm459_vm1, %v8245_v28 }
 0x16f   : > { %6485 = vmatprep.mubr.msk.f32.mxu1 %vm459_vm1, %v8245_v28 }
 0x170   : > { %v1957_v31 = vsel %vm819_vm2, %v1903_v17, %v1904_v23  ;;  %v6168_v0 = vpop.f32.mrb[62].mxu0 }
 0x171   : > { %v1906_v55 = vrot.slane %v6168_v0, 1  ;;  %v1770_v50 = vpop.f32.mrb[63].mxu0  ;;  %6512 = vmatmul.mubr.msk.f32.vlgmr.msra.gmra.mrb[168].mxu0 %vm459_vm1, %v8262_v11  ;;  %v8382_v63 = vadd.f32 %v8019_v62, %v1957_v31 }
 0x172   : > { %6486 = vmatmul.mubr.msk.f32.vlgmr.msra.gmra.mrb[104].mxu1 %vm459_vm1, %v8262_v11  ;;  %v1905_v38 = vrot.slane %v1770_v50, 1  ;;  %6588 = vmatpush3.msk.msra.mxu0 %vm556_vm0, %v6966_v47 }
 0x173   : > { %6536 = vmatpush3.msk.msra.mxu1 %vm556_vm0, %v8290_v60  ;;  %6488 = vmatprep.mubr.msk.f32.mxu1 %vm459_vm1, %v8277_v61 }
 0x174   : > { %6514 = vmatprep.mubr.msk.f32.mxu0 %vm459_vm1, %v8277_v61  ;;  %v1955_v62 = vsel %vm819_vm2, %v1905_v38, %v1906_v55  ;;  %v1956_v10 = vsel %vm819_vm2, %v1904_v23, %v1905_v38  ;;  %v6171_v49 = vpop.f32.mrb[64].mxu0  ;;  %6561 = vmatprep.subr.msk.mxu1 %vm556_vm0, %v7510_v39 }
 0x175   : > { %6613 = vmatprep.subr.msk.mxu0 %vm556_vm0, %v7583_v40  ;;  %v1908_v60 = vrot.slane %v6171_v49, 1  ;;  %v1780_v45 = vpop.f32.mrb[65].mxu0  ;;  %6515 = vmatmul.mubr.msk.f32.gmra.mrb[170].mxu0 %vm459_vm1, %v8303_v33  ;;  %v8407_v18 = vadd.f32 %v8038_v27, %v1956_v10  ;;  %v8410_v21 = vadd.f32 %v8041_v19, %v1955_v62 }
 0x176   : > { %6489 = vmatmul.mubr.msk.f32.gmra.mrb[106].mxu1 %vm459_vm1, %v8303_v33  ;;  %v1907_v13 = vrot.slane %v1780_v45, 1  ;;  %6517 = vmatprep.mubr.msk.f32.mxu0 %vm459_vm1, %v8310_v25 }
 0x177   : > { %6491 = vmatprep.mubr.msk.f32.mxu1 %vm459_vm1, %v8310_v25 }
 0x178   : > { %v1953_v39 = vsel %vm819_vm2, %v1907_v13, %v1908_v60  ;;  %v1954_v40 = vsel %vm819_vm2, %v1906_v55, %v1907_v13  ;;  %v6174_v54 = vpop.f32.mrb[66].mxu0 }
 0x179   : > { %v1910_v56 = vrot.slane %v6174_v54, 1  ;;  %v1790_v27 = vpop.f32.mrb[67].mxu0  ;;  %6518 = vmatmul.mubr.msk.f32.gmra.mrb[172].mxu0 %vm459_vm1, %v8322_v26  ;;  %v8425_v19 = vadd.f32 %v8061_v22, %v1954_v40  ;;  %v8428_v57 = vadd.f32 %v8064_v30, %v1953_v39 }
 0x17a   : > { %6492 = vmatmul.mubr.msk.f32.gmra.mrb[88].mxu1 %vm459_vm1, %v8322_v26  ;;  %v1909_v48 = vrot.slane %v1790_v27, 1  ;;  %6520 = vmatprep.mubr.msk.f32.mxu0 %vm459_vm1, %v8329_v16 }
 0x17b   : > { %6494 = vmatprep.mubr.msk.f32.mxu1 %vm459_vm1, %v8329_v16 }
 0x17c   : > { %v1951_v23 = vsel %vm819_vm2, %v1909_v48, %v1910_v56  ;;  %v1952_v6 = vsel %vm819_vm2, %v1908_v60, %v1909_v48  ;;  %v6177_v17 = vpop.f32.mrb[68].mxu0 }
 0x17d   : > { %v1912_v31 = vrot.slane %v6177_v17, 1  ;;  %v1800_v22 = vpop.f32.mrb[69].mxu0  ;;  %6521 = vmatmul.mubr.msk.f32.gmra.mrb[174].mxu0 %vm459_vm1, %v8238_v7  ;;  %v8443_v30 = vadd.f32 %v8088_v32, %v1952_v6  ;;  %v8446_v0 = vadd.f32 %v8091_v24, %v1951_v23 }
 0x17e   : > { %6495 = vmatmul.mubr.msk.f32.gmra.mrb[90].mxu1 %vm459_vm1, %v8238_v7  ;;  %v1911_v55 = vrot.slane %v1800_v22, 1  ;;  %6523 = vmatprep.mubr.msk.f32.mxu0 %vm459_vm1, %v8127_v58 }
 0x17f   : > { %6497 = vmatprep.mubr.msk.f32.mxu1 %vm459_vm1, %v8127_v58 }
 0x180   : > { %v1949_v50 = vsel %vm819_vm2, %v1911_v55, %v1912_v31  ;;  %v1950_v38 = vsel %vm819_vm2, %v1910_v56, %v1911_v55  ;;  %v6180_v47 = vpop.f32.mrb[70].mxu0 }
 0x181   : > { %v1914_v62 = vrot.slane %v6180_v47, 1  ;;  %v1810_v32 = vpop.f32.mrb[71].mxu0  ;;  %6524 = vmatmul.mubr.msk.f32.gmra.mrb[176].mxu0 %vm459_vm1, %v8148_v43  ;;  %v8461_v24 = vadd.f32 %v8112_v34, %v1950_v38  ;;  %v8464_v10 = vadd.f32 %v8115_v15, %v1949_v50 }
 0x182   : > { %6498 = vmatmul.mubr.msk.f32.gmra.mrb[92].mxu1 %vm459_vm1, %v8148_v43  ;;  %v1913_v49 = vrot.slane %v1810_v32, 1  ;;  %6526 = vmatprep.mubr.msk.f32.mxu0 %vm459_vm1, %v8151_v41 }
 0x183   : > { %6500 = vmatprep.mubr.msk.f32.mxu1 %vm459_vm1, %v8151_v41 }
 0x184   : > { %v1947_v60 = vsel %vm819_vm2, %v1913_v49, %v1914_v62  ;;  %v1948_v45 = vsel %vm819_vm2, %v1912_v31, %v1913_v49  ;;  %v6183_v13 = vpop.f32.mrb[72].mxu0 }
 0x185   : > { %v6209_v39 = vpop.f32.mrb[40].mxu1  ;;  %v1916_v34 = vrot.slane %v6183_v13, 1  ;;  %v1820_v40 = vpop.f32.mrb[73].mxu0  ;;  %6527 = vmatmul.mubr.msk.f32.gmra.mrb[178].mxu0 %vm459_vm1, %v8177_v53  ;;  %v8479_v15 = vadd.f32 %v8134_v2, %v1948_v45  ;;  %v8482_v56 = vadd.f32 %v8137_v36, %v1947_v60 }
 0x186   : > { %v2066_v54 = vpop.f32.mrb[41].mxu1  ;;  %6501 = vmatmul.mubr.msk.f32.gmra.mrb[94].mxu1 %vm459_vm1, %v8177_v53  ;;  %v1915_v27 = vrot.slane %v1820_v40, 1  ;;  %6529 = vmatprep.mubr.msk.f32.mxu0 %vm459_vm1, %v8180_v52 }
 0x187   : > { %6503 = vmatprep.mubr.msk.f32.mxu1 %vm459_vm1, %v8180_v52 }
 0x188   : > { %v1945_v48 = vsel %vm819_vm2, %v1915_v27, %v1916_v34  ;;  %v1946_v23 = vsel %vm819_vm2, %v1914_v62, %v1915_v27  ;;  %v6186_v6 = vpop.f32.mrb[74].mxu0 }
 0x189   : > { %v6212_v17 = vpop.f32.mrb[42].mxu1  ;;  %v1918_v2 = vrot.slane %v6186_v6, 1  ;;  %v1830_v31 = vpop.f32.mrb[75].mxu0  ;;  %6530 = vmatmul.mubr.msk.f32.gmra.mrb[180].mxu0 %vm459_vm1, %v8201_v5  ;;  %v8497_v36 = vadd.f32 %v8163_v4, %v1946_v23  ;;  %v8500_v55 = vadd.f32 %v8166_v29, %v1945_v48 }
 0x18a   : > { %v2076_v22 = vpop.f32.mrb[43].mxu1  ;;  %6504 = vmatmul.mubr.msk.f32.gmra.mrb[108].mxu1 %vm459_vm1, %v8201_v5  ;;  %v1917_v50 = vrot.slane %v1830_v31, 1  ;;  %6532 = vmatprep.mubr.msk.f32.mxu0 %vm459_vm1, %v8204_v3 }
 0x18b   : > { %6506 = vmatprep.mubr.msk.f32.mxu1 %vm459_vm1, %v8204_v3 }
 0x18c   : > { %v1943_v38 = vsel %vm819_vm2, %v1917_v50, %v1918_v2  ;;  %v1944_v47 = vsel %vm819_vm2, %v1916_v34, %v1917_v50  ;;  %v6189_v62 = vpop.f32.mrb[76].mxu0 }
 0x18d   : > { %v6215_v32 = vpop.f32.mrb[44].mxu1  ;;  %v1920_v4 = vrot.slane %v6189_v62, 1  ;;  %v1840_v60 = vpop.f32.mrb[77].mxu0  ;;  %6533 = vmatmul.mubr.msk.f32.gmra.mrb[182].mxu0 %vm459_vm1, %v8225_v44  ;;  %v8515_v45 = vadd.f32 %v8187_v1, %v1944_v47  ;;  %v8518_v13 = vadd.f32 %v8190_v8, %v1943_v38  ;;  %v6967_v38 = vld [vmem:[%s9397_s3 + $0x18] sm:$0xf] }
 0x18e   : > { %v2230_v49 = vrot.slane %v6215_v32, 2  ;;  %v2086_v29 = vpop.f32.mrb[45].mxu1  ;;  %6507 = vmatmul.mubr.msk.f32.gmra.mrb[110].mxu1 %vm459_vm1, %v8225_v44  ;;  %v1919_v39 = vrot.slane %v1840_v60, 1  ;;  %6589 = vmatprep.mubr.msk.f32.mxu0 %vm459_vm1, %v8245_v28  ;;  %v6968_v47 = vld [vmem:[%s9397_s3 + $0x20] sm:$0xf] }
 0x18f   : > { %v2229_v34 = vrot.slane %v2086_v29, 2  ;;  %6537 = vmatprep.mubr.msk.f32.mxu1 %vm459_vm1, %v8245_v28 }
 0x190   : > { %v1941_v40 = vsel %vm819_vm2, %v1919_v39, %v1920_v4  ;;  %v1942_v54 = vsel %vm819_vm2, %v1918_v2, %v1919_v39  ;;  %v6192_v27 = vpop.f32.mrb[78].mxu0 }
 0x191   : > { %v6218_v1 = vpop.f32.mrb[46].mxu1  ;;  %v2283_v8 = vsel %vm1342_vm3, %v2229_v34, %v2230_v49  ;;  %v1922_v48 = vrot.slane %v6192_v27, 1  ;;  %v1850_v6 = vpop.f32.mrb[79].mxu0  ;;  %6590 = vmatmul.mubr.msk.f32.vlgmr.msra.gmra.mrb[184].mxu0 %vm459_vm1, %v8262_v11  ;;  %v8538_v2 = vadd.f32 %v8211_v51, %v1942_v54 }
 0x192   : > { %v2232_v23 = vrot.slane %v6218_v1, 2  ;;  %v2096_v17 = vpop.f32.mrb[47].mxu1  ;;  %6538 = vmatmul.mubr.msk.f32.vlgmr.msra.gmra.mrb[112].mxu1 %vm459_vm1, %v8262_v11  ;;  %v8535_v31 = vadd.f32 %v8382_v63, %v2283_v8  ;;  %v1921_v22 = vrot.slane %v1850_v6, 1  ;;  %6614 = vmatpush3.msk.msra.mxu0 %vm556_vm0, %v6968_v47  ;;  %v8549_v63 = vadd.f32 %v8214_v14, %v1941_v40 }
 0x193   : > { %v2231_v50 = vrot.slane %v2096_v17, 2  ;;  %6562 = vmatpush3.msk.msra.mxu1 %vm556_vm0, %v6967_v38  ;;  %6540 = vmatprep.mubr.msk.f32.mxu1 %vm459_vm1, %v8277_v61 }
 0x194   : > { %6592 = vmatprep.mubr.msk.f32.mxu0 %vm459_vm1, %v8277_v61  ;;  %v1939_v51 = vsel %vm819_vm2, %v1921_v22, %v1922_v48  ;;  %v1940_v62 = vsel %vm819_vm2, %v1920_v4, %v1921_v22  ;;  %v6195_v32 = vpop.f32.mrb[80].mxu0 }
 0x195   : > { %v6221_v60 = vpop.f32.mrb[48].mxu1  ;;  %v2282_v29 = vsel %vm1342_vm3, %v2230_v49, %v2231_v50  ;;  %v2281_v14 = vsel %vm1342_vm3, %v2231_v50, %v2232_v23  ;;  %v1924_v39 = vrot.slane %v6195_v32, 1  ;;  %v1860_v40 = vpop.f32.mrb[81].mxu0  ;;  %6593 = vmatmul.mubr.msk.f32.gmra.mrb[186].mxu0 %vm459_vm1, %v8303_v33  ;;  %v8578_v8 = vadd.f32 %v8232_v59, %v1940_v62 }
 0x196   : > { %v2234_v34 = vrot.slane %v6221_v60, 2  ;;  %v2106_v54 = vpop.f32.mrb[49].mxu1  ;;  %6541 = vmatmul.mubr.msk.f32.gmra.mrb[114].mxu1 %vm459_vm1, %v8303_v33  ;;  %v8568_v4 = vadd.f32 %v8407_v18, %v2282_v29  ;;  %v8571_v27 = vadd.f32 %v8410_v21, %v2281_v14  ;;  %v1923_v49 = vrot.slane %v1860_v40, 1  ;;  %6595 = vmatprep.mubr.msk.f32.mxu0 %vm459_vm1, %v8310_v25 }
 0x197   : > { %v2233_v1 = vrot.slane %v2106_v54, 2  ;;  %6543 = vmatprep.mubr.msk.f32.mxu1 %vm459_vm1, %v8310_v25  ;;  %v8581_v6 = vadd.f32 %v8235_v35, %v1939_v51 }
 0x198   : > { %v1937_v18 = vsel %vm819_vm2, %v1923_v49, %v1924_v39  ;;  %v1938_v21 = vsel %vm819_vm2, %v1922_v48, %v1923_v49  ;;  %v6198_v17 = vpop.f32.mrb[82].mxu0 }
 0x199   : > { %v6224_v22 = vpop.f32.mrb[50].mxu1  ;;  %v2280_v50 = vsel %vm1342_vm3, %v2232_v23, %v2233_v1  ;;  %v2279_v38 = vsel %vm1342_vm3, %v2233_v1, %v2234_v34  ;;  %v1926_v47 = vrot.slane %v6198_v17, 1  ;;  %v1870_v62 = vpop.f32.mrb[83].mxu0  ;;  %6596 = vmatmul.mubr.msk.f32.gmra.mrb[188].mxu0 %vm459_vm1, %v8322_v26  ;;  %v8606_v60 = vadd.f32 %v8256_v37, %v1938_v21 }
 0x19a   : > { %v2236_v59 = vrot.slane %v6224_v22, 2  ;;  %v2116_v32 = vpop.f32.mrb[51].mxu1  ;;  %6544 = vmatmul.mubr.msk.f32.gmra.mrb[116].mxu1 %vm459_vm1, %v8322_v26  ;;  %v8596_v35 = vadd.f32 %v8425_v19, %v2280_v50  ;;  %v8599_v48 = vadd.f32 %v8428_v57, %v2279_v38  ;;  %v1925_v23 = vrot.slane %v1870_v62, 1  ;;  %6598 = vmatprep.mubr.msk.f32.mxu0 %vm459_vm1, %v8329_v16 }
 0x19b   : > { %v2235_v51 = vrot.slane %v2116_v32, 2  ;;  %6546 = vmatprep.mubr.msk.f32.mxu1 %vm459_vm1, %v8329_v16  ;;  %v8609_v29 = vadd.f32 %v8259_v20, %v1937_v18 }
 0x19c   : > { %v1935_v19 = vsel %vm819_vm2, %v1925_v23, %v1926_v47  ;;  %v1936_v57 = vsel %vm819_vm2, %v1924_v39, %v1925_v23  ;;  %v6201_v14 = vpop.f32.mrb[84].mxu0 }
 0x19d   : > { %v6227_v40 = vpop.f32.mrb[52].mxu1  ;;  %v2278_v54 = vsel %vm1342_vm3, %v2234_v34, %v2235_v51  ;;  %v2277_v49 = vsel %vm1342_vm3, %v2235_v51, %v2236_v59  ;;  %v1880_v37 = vpop.f32.mrb[85].mxu0  ;;  %6599 = vmatmul.mubr.msk.f32.gmra.mrb[190].mxu0 %vm459_vm1, %v8238_v7  ;;  %v8630_v34 = vadd.f32 %v8297_v9, %v1936_v57  ;;  %v8637_v22 = vadd.f32 %v8300_v12, %v1935_v19 }
 0x19e   : > { %v2238_v1 = vrot.slane %v6227_v40, 2  ;;  %v2126_v21 = vpop.f32.mrb[53].mxu1  ;;  %6547 = vmatmul.mubr.msk.f32.gmra.mrb[118].mxu1 %vm459_vm1, %v8238_v7  ;;  %v8624_v20 = vadd.f32 %v8443_v30, %v2278_v54  ;;  %v8627_v39 = vadd.f32 %v8446_v0, %v2277_v49  ;;  %v1927_v18 = vrot.slane %v1880_v37, 1  ;;  %6601 = vmatprep.mubr.msk.f32.mxu0 %vm459_vm1, %v8127_v58 }
 0x19f   : > { %v2237_v17 = vrot.slane %v2126_v21, 2  ;;  %6549 = vmatprep.mubr.msk.f32.mxu1 %vm459_vm1, %v8127_v58 }
 0x1a0   : > { %v1934_v30 = vsel %vm819_vm2, %v1926_v47, %v1927_v18  ;;  %v6204_v50 = vpop.f32.mrb[86].mxu0 }
 0x1a1   : > { %v6230_v0 = vpop.f32.mrb[54].mxu1  ;;  %v2276_v9 = vsel %vm1342_vm3, %v2236_v59, %v2237_v17  ;;  %v2275_v38 = vsel %vm1342_vm3, %v2237_v17, %v2238_v1  ;;  %v1890_v32 = vpop.f32.mrb[87].mxu0  ;;  %6602 = vmatmul.mubr.msk.f32.gmra.mrb[192].mxu0 %vm459_vm1, %v8148_v43  ;;  %v8656_v59 = vadd.f32 %v8319_v46, %v1934_v30 }
 0x1a2   : > { %v2240_v62 = vrot.slane %v6230_v0, 2  ;;  %v2136_v23 = vpop.f32.mrb[55].mxu1  ;;  %6550 = vmatmul.mubr.msk.f32.gmra.mrb[120].mxu1 %vm459_vm1, %v8148_v43  ;;  %v8650_v12 = vadd.f32 %v8461_v24, %v2276_v9  ;;  %v8653_v47 = vadd.f32 %v8464_v10, %v2275_v38  ;;  %6604 = vmatprep.mubr.msk.f32.mxu0 %vm459_vm1, %v8151_v41 }
 0x1a3   : > { %v2239_v51 = vrot.slane %v2136_v23, 2  ;;  %6552 = vmatprep.mubr.msk.f32.mxu1 %vm459_vm1, %v8151_v41 }
 0x1a4   : > { %v6309_v57 = vpop.f32.mrb[88].mxu0 }
 0x1a5   : > { %v6233_v19 = vpop.f32.mrb[56].mxu1  ;;  %v2274_v14 = vsel %vm1342_vm3, %v2238_v1, %v2239_v51  ;;  %v2273_v24 = vsel %vm1342_vm3, %v2239_v51, %v2240_v62  ;;  %v8666_v54 = vpop.f32.mrb[89].mxu0  ;;  %6605 = vmatmul.mubr.msk.f32.gmra.mrb[194].mxu0 %vm459_vm1, %v8177_v53 }
 0x1a6   : > { %v2242_v10 = vrot.slane %v6233_v19, 2  ;;  %v2146_v40 = vpop.f32.mrb[57].mxu1  ;;  %6553 = vmatmul.mubr.msk.f32.gmra.mrb[122].mxu1 %vm459_vm1, %v8177_v53  ;;  %v8673_v46 = vadd.f32 %v8479_v15, %v2274_v14  ;;  %v8676_v49 = vadd.f32 %v8482_v56, %v2273_v24  ;;  %6607 = vmatprep.mubr.msk.f32.mxu0 %vm459_vm1, %v8180_v52 }
 0x1a7   : > { %v2241_v1 = vrot.slane %v2146_v40, 2  ;;  %6555 = vmatprep.mubr.msk.f32.mxu1 %vm459_vm1, %v8180_v52 }
 0x1a8   : > { %v6312_v21 = vpop.f32.mrb[90].mxu0 }
 0x1a9   : > { %v6236_v37 = vpop.f32.mrb[58].mxu1  ;;  %v2272_v18 = vsel %vm1342_vm3, %v2240_v62, %v2241_v1  ;;  %v2271_v17 = vsel %vm1342_vm3, %v2241_v1, %v2242_v10  ;;  %v2664_v50 = vpop.f32.mrb[91].mxu0  ;;  %6608 = vmatmul.mubr.msk.f32.gmra.mrb[196].mxu0 %vm459_vm1, %v8201_v5 }
 0x1aa   : > { %v2244_v15 = vrot.slane %v6236_v37, 2  ;;  %v2156_v30 = vpop.f32.mrb[59].mxu1  ;;  %6556 = vmatmul.mubr.msk.f32.gmra.mrb[124].mxu1 %vm459_vm1, %v8201_v5  ;;  %v8691_v56 = vadd.f32 %v8497_v36, %v2272_v18  ;;  %v8694_v0 = vadd.f32 %v8500_v55, %v2271_v17  ;;  %6610 = vmatprep.mubr.msk.f32.mxu0 %vm459_vm1, %v8204_v3 }
 0x1ab   : > { %v2243_v9 = vrot.slane %v2156_v30, 2  ;;  %6558 = vmatprep.mubr.msk.f32.mxu1 %vm459_vm1, %v8204_v3 }
 0x1ac   : > { %v6315_v62 = vpop.f32.mrb[92].mxu0 }
 0x1ad   : > { %v6239_v38 = vpop.f32.mrb[60].mxu1  ;;  %v2270_v32 = vsel %vm1342_vm3, %v2242_v10, %v2243_v9  ;;  %v2269_v23 = vsel %vm1342_vm3, %v2243_v9, %v2244_v15  ;;  %v2674_v19 = vpop.f32.mrb[93].mxu0  ;;  %6611 = vmatmul.mubr.msk.f32.gmra.mrb[198].mxu0 %vm459_vm1, %v8225_v44 }
 0x1ae   : > { %v2246_v36 = vrot.slane %v6239_v38, 2  ;;  %v2166_v51 = vpop.f32.mrb[61].mxu1  ;;  %6559 = vmatmul.mubr.msk.f32.gmra.mrb[126].mxu1 %vm459_vm1, %v8225_v44  ;;  %v8709_v55 = vadd.f32 %v8515_v45, %v2270_v32  ;;  %v8712_v57 = vadd.f32 %v8518_v13, %v2269_v23  ;;  %6615 = vmatprep.mubr.msk.f32.mxu0 %vm459_vm1, %v8245_v28 }
 0x1af   : > { %v2245_v14 = vrot.slane %v2166_v51, 2  ;;  %6563 = vmatprep.mubr.msk.f32.mxu1 %vm459_vm1, %v8245_v28 }
 0x1b0   : > { %v6318_v10 = vpop.f32.mrb[94].mxu0 }
 0x1b1   : > { %v6242_v24 = vpop.f32.mrb[62].mxu1  ;;  %v2268_v40 = vsel %vm1342_vm3, %v2244_v15, %v2245_v14  ;;  %v2267_v1 = vsel %vm1342_vm3, %v2245_v14, %v2246_v36  ;;  %v2684_v21 = vpop.f32.mrb[95].mxu0  ;;  %6616 = vmatmul.mubr.msk.f32.vlgmr.msra.gmra.mrb[200].mxu0 %vm459_vm1, %v8262_v11 }
 0x1b2   : > { %v2248_v45 = vrot.slane %v6242_v24, 2  ;;  %v2176_v37 = vpop.f32.mrb[63].mxu1  ;;  %6564 = vmatmul.mubr.msk.f32.vlgmr.msra.gmra.mrb[128].mxu1 %vm459_vm1, %v8262_v11  ;;  %v8727_v13 = vadd.f32 %v8538_v2, %v2268_v40  ;;  %v8730_v28 = vadd.f32 %v8549_v63, %v2267_v1  ;;  %6618 = vmatprep.mubr.msk.f32.mxu0 %vm459_vm1, %v8277_v61 }
 0x1b3   : > { %v2247_v18 = vrot.slane %v2176_v37, 2  ;;  %6566 = vmatprep.mubr.msk.f32.mxu1 %vm459_vm1, %v8277_v61 }
 0x1b4   : > { %v6321_v15 = vpop.f32.mrb[96].mxu0 }
 0x1b5   : > { %v6245_v17 = vpop.f32.mrb[64].mxu1  ;;  %v2266_v30 = vsel %vm1342_vm3, %v2246_v36, %v2247_v18  ;;  %v2265_v11 = vsel %vm1342_vm3, %v2247_v18, %v2248_v45  ;;  %v2822_v50 = vrot.slane %v6321_v15, 1  ;;  %v2694_v63 = vpop.f32.mrb[97].mxu0  ;;  %6619 = vmatmul.mubr.msk.f32.gmra.mrb[202].mxu0 %vm459_vm1, %v8303_v33 }
 0x1b6   : > { %v2250_v2 = vrot.slane %v6245_v17, 2  ;;  %v2186_v9 = vpop.f32.mrb[65].mxu1  ;;  %6567 = vmatmul.mubr.msk.f32.gmra.mrb[130].mxu1 %vm459_vm1, %v8303_v33  ;;  %v8745_v61 = vadd.f32 %v8578_v8, %v2266_v30  ;;  %v8748_v38 = vadd.f32 %v8581_v6, %v2265_v11  ;;  %v2821_v32 = vrot.slane %v2694_v63, 1  ;;  %6621 = vmatprep.mubr.msk.f32.mxu0 %vm459_vm1, %v8310_v25 }
 0x1b7   : > { %v2249_v62 = vrot.slane %v2186_v9, 2  ;;  %6569 = vmatprep.mubr.msk.f32.mxu1 %vm459_vm1, %v8310_v25 }
 0x1b8   : > { %v6324_v36 = vpop.f32.mrb[98].mxu0  ;;  %v8756_v51 = vsel %vm819_vm2, %v2821_v32, %v2822_v50 }
 0x1b9   : > { %v6248_v23 = vpop.f32.mrb[66].mxu1  ;;  %v2264_v33 = vsel %vm1342_vm3, %v2248_v45, %v2249_v62  ;;  %v2263_v8 = vsel %vm1342_vm3, %v2249_v62, %v2250_v2  ;;  %v2824_v19 = vrot.slane %v6324_v36, 1  ;;  %v2704_v24 = vpop.f32.mrb[99].mxu0  ;;  %6622 = vmatmul.mubr.msk.f32.gmra.mrb[204].mxu0 %vm459_vm1, %v8322_v26 }
 0x1ba   : > { %v2252_v6 = vrot.slane %v6248_v23, 2  ;;  %v2196_v14 = vpop.f32.mrb[67].mxu1  ;;  %6570 = vmatmul.mubr.msk.f32.gmra.mrb[132].mxu1 %vm459_vm1, %v8322_v26  ;;  %v8767_v25 = vadd.f32 %v8606_v60, %v2264_v33  ;;  %v8770_v10 = vadd.f32 %v8609_v29, %v2263_v8  ;;  %v2823_v1 = vrot.slane %v2704_v24, 1  ;;  %6624 = vmatprep.mubr.msk.f32.mxu0 %vm459_vm1, %v8329_v16 }
 0x1bb   : > { %v2251_v40 = vrot.slane %v2196_v14, 2  ;;  %6572 = vmatprep.mubr.msk.f32.mxu1 %vm459_vm1, %v8329_v16 }
 0x1bc   : > { %v6327_v37 = vpop.f32.mrb[100].mxu0  ;;  %v8778_v21 = vsel %vm819_vm2, %v2822_v50, %v2823_v1  ;;  %v8782_v26 = vsel %vm819_vm2, %v2823_v1, %v2824_v19 }
 0x1bd   : > { %v6251_v45 = vpop.f32.mrb[68].mxu1  ;;  %v2262_v60 = vsel %vm1342_vm3, %v2250_v2, %v2251_v40  ;;  %v2261_v29 = vsel %vm1342_vm3, %v2251_v40, %v2252_v6  ;;  %v2826_v18 = vrot.slane %v6327_v37, 1  ;;  %v2714_v15 = vpop.f32.mrb[101].mxu0  ;;  %6625 = vmatmul.mubr.msk.f32.gmra.mrb[206].mxu0 %vm459_vm1, %v8238_v7 }
 0x1be   : > { %v2206_v17 = vpop.f32.mrb[69].mxu1  ;;  %6573 = vmatmul.mubr.msk.f32.gmra.mrb[134].mxu1 %vm459_vm1, %v8238_v7  ;;  %v8793_v16 = vadd.f32 %v8630_v34, %v2262_v60  ;;  %v8796_v30 = vadd.f32 %v8637_v22, %v2261_v29  ;;  %v2825_v2 = vrot.slane %v2714_v15, 1  ;;  %6627 = vmatprep.mubr.msk.f32.mxu0 %vm459_vm1, %v8127_v58 }
 0x1bf   : > { %v2253_v11 = vrot.slane %v2206_v17, 2  ;;  %6575 = vmatprep.mubr.msk.f32.mxu1 %vm459_vm1, %v8127_v58 }
 0x1c0   : > { %v6330_v9 = vpop.f32.mrb[102].mxu0  ;;  %v8804_v63 = vsel %vm819_vm2, %v2824_v19, %v2825_v2  ;;  %v8808_v7 = vsel %vm819_vm2, %v2825_v2, %v2826_v18 }
 0x1c1   : > { %v6254_v50 = vpop.f32.mrb[70].mxu1  ;;  %v2260_v34 = vsel %vm1342_vm3, %v2252_v6, %v2253_v11  ;;  %v2828_v22 = vrot.slane %v6330_v9, 1  ;;  %v2724_v32 = vpop.f32.mrb[103].mxu0  ;;  %6628 = vmatmul.mubr.msk.f32.gmra.mrb[208].mxu0 %vm459_vm1, %v8148_v43 }
 0x1c2   : > { %v2216_v62 = vpop.f32.mrb[71].mxu1  ;;  %6576 = vmatmul.mubr.msk.f32.gmra.mrb[88].mxu1 %vm459_vm1, %v8148_v43  ;;  %v8817_v58 = vadd.f32 %v8656_v59, %v2260_v34  ;;  %v2827_v23 = vrot.slane %v2724_v32, 1  ;;  %6630 = vmatprep.mubr.msk.f32.mxu0 %vm459_vm1, %v8151_v41 }
 0x1c3   : > { %6578 = vmatprep.mubr.msk.f32.mxu1 %vm459_vm1, %v8151_v41 }
 0x1c4   : > { %v6333_v33 = vpop.f32.mrb[104].mxu0  ;;  %v8825_v8 = vsel %vm819_vm2, %v2826_v18, %v2827_v23  ;;  %v8829_v6 = vsel %vm819_vm2, %v2827_v23, %v2828_v22 }
 0x1c5   : > { %v6259_v36 = vpop.f32.mrb[32].mxu1  ;;  %v2830_v43 = vrot.slane %v6333_v33, 1  ;;  %v2734_v19 = vpop.f32.mrb[105].mxu0  ;;  %6631 = vmatmul.mubr.msk.f32.gmra.mrb[210].mxu0 %vm459_vm1, %v8177_v53 }
 0x1c6   : > { %v2392_v59 = vpop.f32.mrb[33].mxu1  ;;  %6579 = vmatmul.mubr.msk.f32.gmra.mrb[90].mxu1 %vm459_vm1, %v8177_v53  ;;  %v2829_v41 = vrot.slane %v2734_v19, 1  ;;  %6633 = vmatprep.mubr.msk.f32.mxu0 %vm459_vm1, %v8180_v52 }
 0x1c7   : > { %6581 = vmatprep.mubr.msk.f32.mxu1 %vm459_vm1, %v8180_v52 }
 0x1c8   : > { %v6336_v24 = vpop.f32.mrb[106].mxu0  ;;  %v8841_v40 = vsel %vm819_vm2, %v2828_v22, %v2829_v41  ;;  %v8845_v1 = vsel %vm819_vm2, %v2829_v41, %v2830_v43 }
 0x1c9   : > { %v6262_v14 = vpop.f32.mrb[34].mxu1  ;;  %v2832_v45 = vrot.slane %v6336_v24, 1  ;;  %v2744_v53 = vpop.f32.mrb[107].mxu0  ;;  %6634 = vmatmul.mubr.msk.f32.gmra.mrb[212].mxu0 %vm459_vm1, %v8201_v5 }
 0x1ca   : > { %v2402_v37 = vpop.f32.mrb[35].mxu1  ;;  %6582 = vmatmul.mubr.msk.f32.gmra.mrb[92].mxu1 %vm459_vm1, %v8201_v5  ;;  %v2831_v52 = vrot.slane %v2744_v53, 1  ;;  %6636 = vmatprep.mubr.msk.f32.mxu0 %vm459_vm1, %v8204_v3 }
 0x1cb   : > { %6584 = vmatprep.mubr.msk.f32.mxu1 %vm459_vm1, %v8204_v3 }
 0x1cc   : > { %v6339_v29 = vpop.f32.mrb[108].mxu0  ;;  %v8857_v18 = vsel %vm819_vm2, %v2830_v43, %v2831_v52  ;;  %v8861_v17 = vsel %vm819_vm2, %v2831_v52, %v2832_v45 }
 0x1cd   : > { %v6265_v60 = vpop.f32.mrb[36].mxu1  ;;  %v2834_v15 = vrot.slane %v6339_v29, 1  ;;  %v2754_v5 = vpop.f32.mrb[109].mxu0  ;;  %6637 = vmatmul.mubr.msk.f32.gmra.mrb[214].mxu0 %vm459_vm1, %v8225_v44 }
 0x1ce   : > { %v2412_v11 = vpop.f32.mrb[37].mxu1  ;;  %6585 = vmatmul.mubr.msk.f32.gmra.mrb[94].mxu1 %vm459_vm1, %v8225_v44  ;;  %v2833_v3 = vrot.slane %v2754_v5, 1 }
 0x1d0   : > { %v6342_v50 = vpop.f32.mrb[110].mxu0  ;;  %v8869_v9 = vsel %vm819_vm2, %v2832_v45, %v2833_v3  ;;  %v8873_v34 = vsel %vm819_vm2, %v2833_v3, %v2834_v15 }
 0x1d1   : > { %v6268_v2 = vpop.f32.mrb[38].mxu1  ;;  %v2836_v22 = vrot.slane %v6342_v50, 1  ;;  %v2764_v32 = vpop.f32.mrb[111].mxu0 }
 0x1d2   : > { %v2422_v62 = vpop.f32.mrb[39].mxu1  ;;  %v2835_v23 = vrot.slane %v2764_v32, 1 }
 0x1d4   : > { %v6345_v33 = vpop.f32.mrb[112].mxu0  ;;  %v8877_v44 = vsel %vm819_vm2, %v2834_v15, %v2835_v23  ;;  %v8881_v43 = vsel %vm819_vm2, %v2835_v23, %v2836_v22 }
 0x1d5   : > { %v6271_v36 = vpop.f32.mrb[8].mxu1  ;;  %v2838_v19 = vrot.slane %v6345_v33, 1  ;;  %v2774_v14 = vpop.f32.mrb[113].mxu0 }
 0x1d6   : > { %v6644_v59 = vadd.f32 %v8568_v4, %v6271_v36  ;;  %v2432_v41 = vpop.f32.mrb[9].mxu1  ;;  %v2837_v45 = vrot.slane %v2774_v14, 1 }
 0x1d7   : > { %v6648_v24 = vadd.f32 %v8535_v31, %v2432_v41 }
 0x1d8   : > { %v8886_v37 = vadd.f32 %v6644_v59, %v8778_v21  ;;  %v6348_v60 = vpop.f32.mrb[114].mxu0  ;;  %v8893_v29 = vsel %vm819_vm2, %v2836_v22, %v2837_v45  ;;  %v8897_v4 = vsel %vm819_vm2, %v2837_v45, %v2838_v19 }
 0x1d9   : > { %v8889_v53 = vadd.f32 %v6648_v24, %v8756_v51  ;;  %v6274_v52 = vpop.f32.mrb[10].mxu1  ;;  %v2840_v31 = vrot.slane %v6348_v60, 1  ;;  %v2784_v5 = vpop.f32.mrb[115].mxu0  ;;  %v2813_v24 = vrot.slane %v8666_v54, 1 }
 0x1da   : > { %v6652_v15 = vadd.f32 %v8596_v35, %v6274_v52  ;;  %v2442_v11 = vpop.f32.mrb[11].mxu1  ;;  %v2839_v3 = vrot.slane %v2784_v5, 1 }
 0x1db   : > { %v6656_v21 = vadd.f32 %v8571_v27, %v2442_v11 }
 0x1dc   : > { %v8902_v51 = vadd.f32 %v6652_v15, %v8804_v63  ;;  %v6351_v22 = vpop.f32.mrb[116].mxu0  ;;  %v8909_v62 = vsel %vm819_vm2, %v2838_v19, %v2839_v3  ;;  %v8913_v35 = vsel %vm819_vm2, %v2839_v3, %v2840_v31 }
 0x1dd   : > { %v8905_v2 = vadd.f32 %v6656_v21, %v8782_v26  ;;  %v6277_v50 = vpop.f32.mrb[12].mxu1  ;;  %v2842_v27 = vrot.slane %v6351_v22, 1  ;;  %v2794_v36 = vpop.f32.mrb[117].mxu0 }
 0x1de   : > { %v6660_v32 = vadd.f32 %v8624_v20, %v6277_v50  ;;  %v2452_v23 = vpop.f32.mrb[13].mxu1  ;;  %v2841_v33 = vrot.slane %v2794_v36, 1 }
 0x1df   : > { %v6664_v63 = vadd.f32 %v8599_v48, %v2452_v23 }
 0x1e0   : > { %v8918_v26 = vadd.f32 %v6660_v32, %v8825_v8  ;;  %v6354_v41 = vpop.f32.mrb[118].mxu0  ;;  %v8925_v14 = vsel %vm819_vm2, %v2840_v31, %v2841_v33  ;;  %v8929_v20 = vsel %vm819_vm2, %v2841_v33, %v2842_v27 }
 0x1e1   : > { %v8921_v59 = vadd.f32 %v6664_v63, %v8808_v7  ;;  %v6280_v19 = vpop.f32.mrb[14].mxu1  ;;  %v2844_v45 = vrot.slane %v6354_v41, 1  ;;  %v2804_v52 = vpop.f32.mrb[119].mxu0 }
 0x1e2   : > { %v6668_v48 = vadd.f32 %v8650_v12, %v6280_v19  ;;  %v2462_v8 = vpop.f32.mrb[15].mxu1  ;;  %v2843_v60 = vrot.slane %v2804_v52, 1 }
 0x1e3   : > { %v6672_v7 = vadd.f32 %v8627_v39, %v2462_v8  ;;  %v8939_v31 = vsel %vm819_vm2, %v2844_v45, %v2813_v24 }
 0x1e4   : > { %v8935_v15 = vadd.f32 %v6668_v48, %v8841_v40  ;;  %v6359_v54 = vpop.f32.mrb[120].mxu0  ;;  %v8946_v12 = vsel %vm819_vm2, %v2842_v27, %v2843_v60  ;;  %v8950_v39 = vsel %vm819_vm2, %v2843_v60, %v2844_v45 }
 0x1e5   : > { %v8942_v11 = vadd.f32 %v6672_v7, %v8829_v6  ;;  %v6283_v5 = vpop.f32.mrb[16].mxu1  ;;  %v8953_v3 = vpop.f32.mrb[121].mxu0 }
 0x1e6   : > { %v6676_v40 = vadd.f32 %v8673_v46, %v6283_v5  ;;  %v2472_v21 = vpop.f32.mrb[17].mxu1 }
 0x1e7   : > { %v6680_v50 = vadd.f32 %v8653_v47, %v2472_v21 }
 0x1e8   : > { %v8957_v6 = vadd.f32 %v6676_v40, %v8857_v18  ;;  %v6362_v27 = vpop.f32.mrb[122].mxu0 }
 0x1e9   : > { %v8960_v22 = vadd.f32 %v6680_v50, %v8845_v1  ;;  %v6286_v32 = vpop.f32.mrb[18].mxu1  ;;  %v2990_v63 = vpop.f32.mrb[123].mxu0 }
 0x1ea   : > { %v6684_v23 = vadd.f32 %v8691_v56, %v6286_v32  ;;  %v2482_v36 = vpop.f32.mrb[19].mxu1 }
 0x1eb   : > { %v6688_v33 = vadd.f32 %v8676_v49, %v2482_v36 }
 0x1ec   : > { %v8965_v46 = vadd.f32 %v6684_v23, %v8869_v9  ;;  %v6365_v18 = vpop.f32.mrb[124].mxu0 }
 0x1ed   : > { %v8968_v19 = vadd.f32 %v6688_v33, %v8861_v17  ;;  %v6289_v47 = vpop.f32.mrb[20].mxu1  ;;  %v3000_v24 = vpop.f32.mrb[125].mxu0 }
 0x1ee   : > { %v6692_v41 = vadd.f32 %v8709_v55, %v6289_v47  ;;  %v2492_v1 = vpop.f32.mrb[21].mxu1 }
 0x1ef   : > { %v6696_v48 = vadd.f32 %v8694_v0, %v2492_v1 }
 0x1f0   : > { %v8973_v56 = vadd.f32 %v6692_v41, %v8877_v44  ;;  %v6368_v45 = vpop.f32.mrb[126].mxu0 }
 0x1f1   : > { %v8976_v49 = vadd.f32 %v6696_v48, %v8873_v34  ;;  %v6292_v9 = vpop.f32.mrb[22].mxu1  ;;  %v3010_v52 = vpop.f32.mrb[127].mxu0 }
 0x1f2   : > { %v6700_v17 = vadd.f32 %v8727_v13, %v6292_v9  ;;  %v2502_v8 = vpop.f32.mrb[23].mxu1 }
 0x1f3   : > { %v6704_v7 = vadd.f32 %v8712_v57, %v2502_v8 }
 0x1f4   : > { %v8981_v55 = vadd.f32 %v6700_v17, %v8893_v29  ;;  %v6371_v60 = vpop.f32.mrb[128].mxu0 }
 0x1f5   : > { %v8984_v0 = vadd.f32 %v6704_v7, %v8881_v43  ;;  %v6295_v44 = vpop.f32.mrb[24].mxu1  ;;  %v3148_v5 = vrot.slane %v6371_v60, 2  ;;  %v3020_v40 = vpop.f32.mrb[129].mxu0  ;;  %v8995_v43 = vld [vmem:[%s9398_s4] ss:$0 sm:$0xff] }
 0x1f6   : > { %v6708_v34 = vadd.f32 %v8745_v61, %v6295_v44  ;;  %v2512_v54 = vpop.f32.mrb[25].mxu1  ;;  %v3147_v21 = vrot.slane %v3020_v40, 2 }
 0x1f7   : > { %v6712_v13 = vadd.f32 %v8730_v28, %v2512_v54 }
 0x1f8   : > { %v8990_v57 = vadd.f32 %v6708_v34, %v8909_v62  ;;  %v3193_v61 = vsel %vm1342_vm3, %v3147_v21, %v3148_v5  ;;  %v6374_v32 = vpop.f32.mrb[130].mxu0 }
 0x1f9   : > { %v8998_v29 = vadd.f32 %v6712_v13, %v8897_v4  ;;  %v6298_v50 = vpop.f32.mrb[26].mxu1  ;;  %v3203_v28 = vadd.f32 %v3193_v61, %v8889_v53  ;;  %v3150_v27 = vrot.slane %v6374_v32, 2  ;;  %v3030_v36 = vpop.f32.mrb[131].mxu0 }
 0x1fa   : > { %v6716_v62 = vadd.f32 %v8767_v25, %v6298_v50  ;;  %v2522_v23 = vpop.f32.mrb[27].mxu1  ;;  %v3149_v33 = vrot.slane %v3030_v36, 2 }
 0x1fb   : > { %v6720_v63 = vadd.f32 %v8748_v38, %v2522_v23  ;;  %v4704_v4 = vadd.f32 %v8995_v43, %v3203_v28 }
 0x1fc   : > { %v9009_v47 = vadd.f32 %v6716_v62, %v8925_v14  ;;  %v3191_v41 = vsel %vm1342_vm3, %v3149_v33, %v3150_v27  ;;  %v3192_v25 = vsel %vm1342_vm3, %v3148_v5, %v3149_v33  ;;  %v6377_v1 = vpop.f32.mrb[132].mxu0 }
 0x1fd   : > { %v9012_v18 = vadd.f32 %v6720_v63, %v8913_v35  ;;  %v6301_v53 = vpop.f32.mrb[28].mxu1  ;;  %v4736_v24 = vmax.f32 %v4704_v4, 0.0  ;;  %v3204_v38 = vadd.f32 %v3192_v25, %v8886_v37  ;;  %v3205_v48 = vadd.f32 %v3191_v41, %v8905_v2  ;;  %v3040_v45 = vpop.f32.mrb[133].mxu0 }
 0x1fe   : > { %v6724_v9 = vadd.f32 %v8793_v16, %v6301_v53  ;;  %v2532_v14 = vpop.f32.mrb[29].mxu1  ;;  %v3152_v17 = vrot.slane %v6377_v1, 2  ;;  %v3151_v8 = vrot.slane %v3040_v45, 2 }
 0x1ff   : > { %v6728_v35 = vadd.f32 %v8770_v10, %v2532_v14  ;;  %4784 = vst [vmem:[%s9022_s27] sm:$0xff] %v4736_v24  ;;  %v4705_v52 = vadd.f32 %v8995_v43, %v3204_v38  ;;  %v4706_v7 = vadd.f32 %v8995_v43, %v3205_v48 }
 0x200   : > { %v9028_v37 = vadd.f32 %v6724_v9, %v8946_v12  ;;  %v3189_v10 = vsel %vm1342_vm3, %v3151_v8, %v3152_v17  ;;  %v3190_v2 = vsel %vm1342_vm3, %v3150_v27, %v3151_v8  ;;  %v6380_v60 = vpop.f32.mrb[134].mxu0 }
 0x201   : > { %v9031_v16 = vadd.f32 %v6728_v35, %v8929_v20  ;;  %v6304_v44 = vpop.f32.mrb[30].mxu1  ;;  %v4737_v34 = vmax.f32 %v4705_v52, 0.0  ;;  %v4738_v5 = vmax.f32 %v4706_v7, 0.0  ;;  %v3206_v54 = vadd.f32 %v3190_v2, %v8902_v51  ;;  %v3050_v13 = vpop.f32.mrb[135].mxu0 }
 0x202   : > { %v3207_v12 = vadd.f32 %v3189_v10, %v8921_v59  ;;  %v2542_v40 = vpop.f32.mrb[31].mxu1  ;;  %v6732_v20 = vadd.f32 %v8817_v58, %v6304_v44  ;;  %v3154_v21 = vrot.slane %v6380_v60, 2  ;;  %v3153_v50 = vrot.slane %v3050_v13, 2 }
 0x203   : > { %v6736_v61 = vadd.f32 %v8796_v30, %v2542_v40  ;;  %4785 = vst [vmem:[%s9022_s27 + $0x8] sm:$0xff] %v4737_v34  ;;  %4786 = vst [vmem:[%s9022_s27 + $0x10] sm:$0xff] %v4738_v5  ;;  %v4707_v32 = vadd.f32 %v8995_v43, %v3206_v54 }
 0x204   : > { %v4708_v28 = vadd.f32 %v8995_v43, %v3207_v12  ;;  %v9046_v62 = vadd.f32 %v6732_v20, %v8939_v31  ;;  %v3187_v58 = vsel %vm1342_vm3, %v3153_v50, %v3154_v21  ;;  %v3188_v30 = vsel %vm1342_vm3, %v3152_v17, %v3153_v50  ;;  %v6383_v59 = vpop.f32.mrb[136].mxu0 }
 0x205   : > { %v9049_v51 = vadd.f32 %v6736_v61, %v8950_v39  ;;  %v6409_v27 = vpop.f32.mrb[72].mxu1  ;;  %v4739_v23 = vmax.f32 %v4707_v32, 0.0  ;;  %v3208_v63 = vadd.f32 %v3188_v30, %v8918_v26  ;;  %v3209_v31 = vadd.f32 %v3187_v58, %v8942_v11  ;;  %v3060_v33 = vpop.f32.mrb[137].mxu0 }
 0x206   : > { %v4740_v36 = vmax.f32 %v4708_v28, 0.0  ;;  %v3366_v4 = vpop.f32.mrb[73].mxu1  ;;  %v3156_v41 = vrot.slane %v6383_v59, 2  ;;  %v3439_v39 = vrot.slane %v6409_v27, 1  ;;  %v3155_v25 = vrot.slane %v3060_v33, 2 }
 0x207   : > { %v3438_v53 = vrot.slane %v3366_v4, 1  ;;  %4787 = vst [vmem:[%s9022_s27 + $0x18] sm:$0xff] %v4739_v23  ;;  %v4709_v1 = vadd.f32 %v8995_v43, %v3208_v63  ;;  %v4710_v24 = vadd.f32 %v8995_v43, %v3209_v31 }
 0x208   : > { %4788 = vst [vmem:[%s9022_s27 + $0x20] sm:$0xff] %v4740_v36  ;;  %v3185_v38 = vsel %vm1342_vm3, %v3155_v25, %v3156_v41  ;;  %v3186_v26 = vsel %vm1342_vm3, %v3154_v21, %v3155_v25  ;;  %v6386_v48 = vpop.f32.mrb[138].mxu0 }
 0x209   : > { %v9067_v11 = vsel %vm819_vm2, %v3438_v53, %v3439_v39  ;;  %v6412_v9 = vpop.f32.mrb[74].mxu1  ;;  %v4741_v14 = vmax.f32 %v4709_v1, 0.0  ;;  %v4742_v45 = vmax.f32 %v4710_v24, 0.0  ;;  %v3210_v17 = vadd.f32 %v3186_v26, %v8935_v15  ;;  %v3070_v8 = vpop.f32.mrb[139].mxu0 }
 0x20a   : > { %v3211_v35 = vadd.f32 %v3185_v38, %v8960_v22  ;;  %v3376_v52 = vpop.f32.mrb[75].mxu1  ;;  %v3158_v7 = vrot.slane %v6386_v48, 2  ;;  %v3441_v10 = vrot.slane %v6412_v9, 1  ;;  %v3157_v2 = vrot.slane %v3070_v8, 2 }
 0x20b   : > { %v3440_v44 = vrot.slane %v3376_v52, 1  ;;  %4789 = vst [vmem:[%s9022_s27 + $0x28] sm:$0xff] %v4741_v14  ;;  %4790 = vst [vmem:[%s9022_s27 + $0x30] sm:$0xff] %v4742_v45  ;;  %v4711_v60 = vadd.f32 %v8995_v43, %v3210_v17 }
 0x20c   : > { %v4712_v34 = vadd.f32 %v8995_v43, %v3211_v35  ;;  %v3183_v5 = vsel %vm1342_vm3, %v3157_v2, %v3158_v7  ;;  %v3184_v15 = vsel %vm1342_vm3, %v3156_v41, %v3157_v2  ;;  %v6389_v12 = vpop.f32.mrb[140].mxu0 }
 0x20d   : > { %v9081_v22 = vsel %vm819_vm2, %v3440_v44, %v3441_v10  ;;  %v9085_v54 = vsel %vm819_vm2, %v3439_v39, %v3440_v44  ;;  %v6415_v40 = vpop.f32.mrb[76].mxu1  ;;  %v4743_v13 = vmax.f32 %v4711_v60, 0.0  ;;  %v3212_v21 = vadd.f32 %v3184_v15, %v8957_v6  ;;  %v3080_v50 = vpop.f32.mrb[141].mxu0 }
 0x20e   : > { %v4744_v20 = vmax.f32 %v4712_v34, 0.0  ;;  %v3213_v61 = vadd.f32 %v3183_v5, %v8968_v19  ;;  %v3386_v32 = vpop.f32.mrb[77].mxu1  ;;  %v3160_v28 = vrot.slane %v6389_v12, 2  ;;  %v3443_v58 = vrot.slane %v6415_v40, 1 }
 0x20f   : > { %v3159_v30 = vrot.slane %v3080_v50, 2  ;;  %v3442_v59 = vrot.slane %v3386_v32, 1  ;;  %4791 = vst [vmem:[%s9022_s27 + $0x38] sm:$0xff] %v4743_v13  ;;  %v4713_v27 = vadd.f32 %v8995_v43, %v3212_v21 }
 0x210   : > { %4792 = vst [vmem:[%s9022_s27 + $0x40] sm:$0xff] %v4744_v20  ;;  %v4714_v23 = vadd.f32 %v8995_v43, %v3213_v61  ;;  %v6392_v31 = vpop.f32.mrb[142].mxu0 }
 0x211   : > { %v3181_v36 = vsel %vm1342_vm3, %v3159_v30, %v3160_v28  ;;  %v3182_v6 = vsel %vm1342_vm3, %v3158_v7, %v3159_v30  ;;  %v9099_v19 = vsel %vm819_vm2, %v3442_v59, %v3443_v58  ;;  %v9103_v63 = vsel %vm819_vm2, %v3441_v10, %v3442_v59  ;;  %v6418_v33 = vpop.f32.mrb[78].mxu1  ;;  %v3090_v53 = vpop.f32.mrb[143].mxu0 }
 0x212   : > { %v4745_v4 = vmax.f32 %v4713_v27, 0.0  ;;  %v4746_v41 = vmax.f32 %v4714_v23, 0.0  ;;  %v3214_v39 = vadd.f32 %v3182_v6, %v8965_v46  ;;  %v3215_v25 = vadd.f32 %v3181_v36, %v8976_v49  ;;  %v3396_v1 = vpop.f32.mrb[79].mxu1 }
 0x213   : > { %v3162_v24 = vrot.slane %v6392_v31, 2  ;;  %v3445_v38 = vrot.slane %v6418_v33, 1  ;;  %v3161_v26 = vrot.slane %v3090_v53, 2  ;;  %v3444_v48 = vrot.slane %v3396_v1, 1 }
 0x214   : > { %4793 = vst [vmem:[%s9022_s27 + $0x48] sm:$0xff] %v4745_v4  ;;  %4794 = vst [vmem:[%s9022_s27 + $0x50] sm:$0xff] %v4746_v41  ;;  %v4715_v9 = vadd.f32 %v8995_v43, %v3214_v39  ;;  %v4716_v14 = vadd.f32 %v8995_v43, %v3215_v25  ;;  %v6395_v35 = vpop.f32.mrb[144].mxu0 }
 0x215   : > { %v3179_v45 = vsel %vm1342_vm3, %v3161_v26, %v3162_v24  ;;  %v3180_v46 = vsel %vm1342_vm3, %v3160_v28, %v3161_v26  ;;  %v9117_v49 = vsel %vm819_vm2, %v3444_v48, %v3445_v38  ;;  %v9121_v17 = vsel %vm819_vm2, %v3443_v58, %v3444_v48  ;;  %v6421_v8 = vpop.f32.mrb[80].mxu1  ;;  %v3100_v44 = vpop.f32.mrb[145].mxu0 }
 0x216   : > { %v4747_v52 = vmax.f32 %v4715_v9, 0.0  ;;  %v4748_v7 = vmax.f32 %v4716_v14, 0.0  ;;  %v3216_v10 = vadd.f32 %v3180_v46, %v8973_v56  ;;  %v3217_v2 = vadd.f32 %v3179_v45, %v8984_v0  ;;  %v3406_v60 = vpop.f32.mrb[81].mxu1 }
 0x217   : > { %v3164_v34 = vrot.slane %v6395_v35, 2  ;;  %v3163_v5 = vrot.slane %v3100_v44, 2  ;;  %v3446_v15 = vrot.slane %v3406_v60, 1 }
 0x218   : > { %4795 = vst [vmem:[%s9022_s27 + $0x58] sm:$0xff] %v4747_v52  ;;  %4796 = vst [vmem:[%s9022_s27 + $0x60] sm:$0xff] %v4748_v7  ;;  %v4717_v12 = vadd.f32 %v8995_v43, %v3216_v10  ;;  %v4718_v40 = vadd.f32 %v8995_v43, %v3217_v2  ;;  %v6398_v20 = vpop.f32.mrb[146].mxu0  ;;  %v3139_v7 = vrot.slane %v8953_v3, 2 }
 0x219   : > { %v3177_v13 = vsel %vm1342_vm3, %v3163_v5, %v3164_v34  ;;  %v3178_v56 = vsel %vm1342_vm3, %v3162_v24, %v3163_v5  ;;  %v9135_v0 = vsel %vm819_vm2, %v3445_v38, %v3446_v15  ;;  %v6424_v21 = vpop.f32.mrb[82].mxu1  ;;  %v3110_v58 = vpop.f32.mrb[147].mxu0  ;;  %v3166_v59 = vrot.slane %v6398_v20, 2 }
 0x21a   : > { %v4749_v61 = vmax.f32 %v4717_v12, 0.0  ;;  %v4750_v50 = vmax.f32 %v4718_v40, 0.0  ;;  %v3218_v32 = vadd.f32 %v3178_v56, %v8981_v55  ;;  %v3219_v28 = vadd.f32 %v3177_v13, %v8998_v29  ;;  %v3415_v30 = vpop.f32.mrb[83].mxu1 }
 0x21b   : > { %v3165_v27 = vrot.slane %v3110_v58, 2 }
 0x21c   : > { %4797 = vst [vmem:[%s9022_s27 + $0x68] sm:$0xff] %v4749_v61  ;;  %4798 = vst [vmem:[%s9022_s27 + $0x70] sm:$0xff] %v4750_v50  ;;  %v4719_v23 = vadd.f32 %v8995_v43, %v3218_v32  ;;  %v4720_v36 = vadd.f32 %v8995_v43, %v3219_v28  ;;  %v6401_v31 = vpop.f32.mrb[148].mxu0 }
 0x21d   : > { %v3175_v6 = vsel %vm1342_vm3, %v3165_v27, %v3166_v59  ;;  %v3176_v55 = vsel %vm1342_vm3, %v3164_v34, %v3165_v27  ;;  %v6427_v29 = vpop.f32.mrb[84].mxu1  ;;  %v3120_v25 = vpop.f32.mrb[149].mxu0  ;;  %v3168_v1 = vrot.slane %v6401_v31, 2 }
 0x21e   : > { %v4751_v33 = vmax.f32 %v4719_v23, 0.0  ;;  %v4752_v4 = vmax.f32 %v4720_v36, 0.0  ;;  %v3220_v41 = vadd.f32 %v3176_v55, %v8990_v57  ;;  %v3221_v39 = vadd.f32 %v3175_v6, %v9012_v18  ;;  %v3423_v53 = vpop.f32.mrb[85].mxu1 }
 0x21f   : > { %v3167_v24 = vrot.slane %v3120_v25, 2 }
 0x220   : > { %4799 = vst [vmem:[%s9022_s27 + $0x78] sm:$0xff] %v4751_v33  ;;  %4800 = vst [vmem:[%s9022_s27 + $0x80] sm:$0xff] %v4752_v4  ;;  %v4721_v38 = vadd.f32 %v8995_v43, %v3220_v41  ;;  %v4722_v26 = vadd.f32 %v8995_v43, %v3221_v39  ;;  %v6404_v9 = vpop.f32.mrb[150].mxu0 }
 0x221   : > { %v3173_v48 = vsel %vm1342_vm3, %v3167_v24, %v3168_v1  ;;  %v3174_v57 = vsel %vm1342_vm3, %v3166_v59, %v3167_v24  ;;  %v6430_v18 = vpop.f32.mrb[86].mxu1  ;;  %v3130_v8 = vpop.f32.mrb[151].mxu0  ;;  %v3170_v10 = vrot.slane %v6404_v9, 2 }
 0x222   : > { %v4753_v14 = vmax.f32 %v4721_v38, 0.0  ;;  %v4754_v45 = vmax.f32 %v4722_v26, 0.0  ;;  %v3222_v46 = vadd.f32 %v3174_v57, %v9009_v47  ;;  %v3223_v35 = vadd.f32 %v3173_v48, %v9031_v16  ;;  %v3431_v52 = vpop.f32.mrb[87].mxu1 }
 0x223   : > { %v3169_v2 = vrot.slane %v3130_v8, 2  ;;  %v3202_v34 = vsel %vm1342_vm3, %v3170_v10, %v3139_v7 }
 0x224   : > { %4801 = vst [vmem:[%s9022_s27 + $0x88] sm:$0xff] %v4753_v14  ;;  %4802 = vst [vmem:[%s9022_s27 + $0x90] sm:$0xff] %v4754_v45  ;;  %v4723_v44 = vadd.f32 %v8995_v43, %v3222_v46  ;;  %v4724_v60 = vadd.f32 %v8995_v43, %v3223_v35  ;;  %v6461_v3 = vpop.f32.mrb[152].mxu0  ;;  %v3226_v12 = vadd.f32 %v3202_v34, %v9046_v62 }
 0x225   : > { %v3171_v47 = vsel %vm1342_vm3, %v3169_v2, %v3170_v10  ;;  %v3172_v16 = vsel %vm1342_vm3, %v3168_v1, %v3169_v2  ;;  %v3658_v13 = vpop.f32.mrb[153].mxu0  ;;  %v3731_v20 = vrot.slane %v6461_v3, 2 }
 0x226   : > { %v4755_v5 = vmax.f32 %v4723_v44, 0.0  ;;  %v4756_v15 = vmax.f32 %v4724_v60, 0.0  ;;  %v3224_v40 = vadd.f32 %v3172_v16, %v9028_v37  ;;  %v3225_v56 = vadd.f32 %v3171_v47, %v9049_v51 }
 0x227   : > { %v3730_v21 = vrot.slane %v3658_v13, 2  ;;  %v4727_v61 = vadd.f32 %v8995_v43, %v3226_v12 }
 0x228   : > { %4803 = vst [vmem:[%s9022_s27 + $0x98] sm:$0xff] %v4755_v5  ;;  %4804 = vst [vmem:[%s9022_s27 + $0xa0] sm:$0xff] %v4756_v15  ;;  %v4725_v50 = vadd.f32 %v8995_v43, %v3224_v40  ;;  %v4726_v32 = vadd.f32 %v8995_v43, %v3225_v56  ;;  %v6464_v37 = vpop.f32.mrb[154].mxu0 }
 0x229   : > { %v3746_v62 = vsel %vm1342_vm3, %v3730_v21, %v3731_v20  ;;  %v4759_v28 = vmax.f32 %v4727_v61, 0.0  ;;  %v3733_v30 = vrot.slane %v6464_v37, 2  ;;  %v3668_v59 = vpop.f32.mrb[155].mxu0 }
 0x22a   : > { %v4757_v58 = vmax.f32 %v4725_v50, 0.0  ;;  %v9181_v51 = vadd.f32 %v3746_v62, %v9067_v11  ;;  %v4758_v27 = vmax.f32 %v4726_v32, 0.0  ;;  %v3732_v23 = vrot.slane %v3668_v59, 2 }
 0x22b   : > { %4807 = vst [vmem:[%s9022_s27 + $0xb8] sm:$0xff] %v4759_v28 }
 0x22c   : > { %4805 = vst [vmem:[%s9022_s27 + $0xa8] sm:$0xff] %v4757_v58  ;;  %4806 = vst [vmem:[%s9022_s27 + $0xb0] sm:$0xff] %v4758_v27  ;;  %v3744_v36 = vsel %vm1342_vm3, %v3732_v23, %v3733_v30  ;;  %v3745_v6 = vsel %vm1342_vm3, %v3731_v20, %v3732_v23  ;;  %v6467_v55 = vpop.f32.mrb[156].mxu0 }
 0x22d   : > { %v6769_v31 = vadd.f32 %v3745_v6, %v9085_v54  ;;  %v6781_v29 = vadd.f32 %v3744_v36, %v9081_v22  ;;  %v3735_v11 = vrot.slane %v6467_v55, 2  ;;  %v3678_v33 = vpop.f32.mrb[157].mxu0 }
 0x22e   : > { %v3734_v4 = vrot.slane %v3678_v33, 2 }
 0x230   : > { %v3742_v41 = vsel %vm1342_vm3, %v3734_v4, %v3735_v11  ;;  %v3743_v39 = vsel %vm1342_vm3, %v3733_v30, %v3734_v4  ;;  %v6470_v25 = vpop.f32.mrb[158].mxu0 }
 0x231   : > { %v6777_v53 = vadd.f32 %v3743_v39, %v9103_v63  ;;  %v6789_v1 = vadd.f32 %v3742_v41, %v9099_v19  ;;  %v3737_v24 = vrot.slane %v6470_v25, 2  ;;  %v3688_v38 = vpop.f32.mrb[159].mxu0 }
 0x232   : > { %v3736_v26 = vrot.slane %v3688_v38, 2 }
 0x234   : > { %v3740_v22 = vsel %vm1342_vm3, %v3736_v26, %v3737_v24  ;;  %v3741_v54 = vsel %vm1342_vm3, %v3735_v11, %v3736_v26  ;;  %v6473_v57 = vpop.f32.mrb[160].mxu0 }
 0x235   : > { %v6447_v48 = vpop.f32.mrb[96].mxu1  ;;  %v6785_v9 = vadd.f32 %v3741_v54, %v9121_v17  ;;  %v6797_v18 = vadd.f32 %v3740_v22, %v9117_v49  ;;  %v3698_v45 = vpop.f32.mrb[161].mxu0 }
 0x236   : > { %v3561_v14 = vpop.f32.mrb[97].mxu1  ;;  %v3738_v63 = vrot.slane %v3698_v45, 2 }
 0x238   : > { %v3739_v19 = vsel %vm1342_vm3, %v3737_v24, %v3738_v63  ;;  %v6476_v35 = vpop.f32.mrb[162].mxu0 }
 0x239   : > { %v6450_v46 = vpop.f32.mrb[98].mxu1  ;;  %v6793_v8 = vadd.f32 %v3739_v19, %v9135_v0  ;;  %v3707_v7 = vpop.f32.mrb[163].mxu0 }
 0x23a   : > { %v3569_v52 = vpop.f32.mrb[99].mxu1 }
 0x23c   : > { %v6479_v2 = vpop.f32.mrb[164].mxu0 }
 0x23d   : > { %v6453_v10 = vpop.f32.mrb[100].mxu1  ;;  %v3715_v60 = vpop.f32.mrb[165].mxu0 }
 0x23e   : > { %v3577_v44 = vpop.f32.mrb[101].mxu1 }
 0x240   : > { %v6482_v17 = vpop.f32.mrb[166].mxu0 }
 0x241   : > { %v6456_v34 = vpop.f32.mrb[102].mxu1  ;;  %v3723_v49 = vpop.f32.mrb[167].mxu0 }
 0x242   : > { %v3585_v47 = vpop.f32.mrb[103].mxu1 }
 0x244   : > { %v6513_v3 = vpop.f32.mrb[168].mxu0 }
 0x245   : > { %v6487_v16 = vpop.f32.mrb[104].mxu1  ;;  %v3966_v15 = vpop.f32.mrb[169].mxu0 }
 0x246   : > { %v3821_v5 = vpop.f32.mrb[105].mxu1 }
 0x248   : > { %v6516_v40 = vpop.f32.mrb[170].mxu0 }
 0x249   : > { %v6490_v12 = vpop.f32.mrb[106].mxu1  ;;  %v3974_v56 = vpop.f32.mrb[171].mxu0 }
 0x24a   : > { %v3829_v13 = vpop.f32.mrb[107].mxu1 }
 0x24c   : > { %v6519_v20 = vpop.f32.mrb[172].mxu0 }
 0x24d   : > { %v4039_v0 = vrot.slane %v6519_v20, 1  ;;  %v3982_v21 = vpop.f32.mrb[173].mxu0 }
 0x24e   : > { %v4038_v61 = vrot.slane %v3982_v21, 1 }
 0x250   : > { %v4054_v50 = vsel %vm819_vm2, %v4038_v61, %v4039_v0  ;;  %v6522_v32 = vpop.f32.mrb[174].mxu0 }
 0x251   : > { %v4041_v62 = vrot.slane %v6522_v32, 1  ;;  %v3992_v37 = vpop.f32.mrb[175].mxu0  ;;  %v6774_v28 = vadd.f32 %v9181_v51, %v4054_v50 }
 0x252   : > { %v4040_v58 = vrot.slane %v3992_v37, 1 }
 0x254   : > { %v4052_v30 = vsel %vm819_vm2, %v4040_v58, %v4041_v62  ;;  %v4053_v59 = vsel %vm819_vm2, %v4039_v0, %v4040_v58  ;;  %v6525_v27 = vpop.f32.mrb[176].mxu0 }
 0x255   : > { %v4043_v23 = vrot.slane %v6525_v27, 1  ;;  %v4002_v36 = vpop.f32.mrb[177].mxu0  ;;  %v6770_v6 = vadd.f32 %v6769_v31, %v4053_v59  ;;  %v6782_v55 = vadd.f32 %v6781_v29, %v4052_v30 }
 0x256   : > { %v4042_v11 = vrot.slane %v4002_v36, 1 }
 0x258   : > { %v4050_v33 = vsel %vm819_vm2, %v4042_v11, %v4043_v23  ;;  %v4051_v4 = vsel %vm819_vm2, %v4041_v62, %v4042_v11  ;;  %v6528_v51 = vpop.f32.mrb[178].mxu0 }
 0x259   : > { %v4045_v41 = vrot.slane %v6528_v51, 1  ;;  %v4012_v39 = vpop.f32.mrb[179].mxu0  ;;  %v6778_v25 = vadd.f32 %v6777_v53, %v4051_v4  ;;  %v6790_v24 = vadd.f32 %v6789_v1, %v4050_v33 }
 0x25a   : > { %v4044_v38 = vrot.slane %v4012_v39, 1 }
 0x25c   : > { %v4048_v26 = vsel %vm819_vm2, %v4044_v38, %v4045_v41  ;;  %v4049_v31 = vsel %vm819_vm2, %v4043_v23, %v4044_v38  ;;  %v6531_v22 = vpop.f32.mrb[180].mxu0 }
 0x25d   : > { %v6505_v29 = vpop.f32.mrb[108].mxu1  ;;  %v4022_v48 = vpop.f32.mrb[181].mxu0  ;;  %v9222_v57 = vadd.f32 %v6785_v9, %v4049_v31  ;;  %v9224_v14 = vadd.f32 %v6797_v18, %v4048_v26 }
 0x25e   : > { %v3877_v54 = vpop.f32.mrb[109].mxu1  ;;  %v4046_v45 = vrot.slane %v4022_v48, 1 }
 0x260   : > { %v4047_v53 = vsel %vm819_vm2, %v4045_v41, %v4046_v45  ;;  %v6534_v63 = vpop.f32.mrb[182].mxu0 }
 0x261   : > { %v6508_v1 = vpop.f32.mrb[110].mxu1  ;;  %v4031_v46 = vpop.f32.mrb[183].mxu0  ;;  %v9228_v35 = vadd.f32 %v6793_v8, %v4047_v53 }
 0x262   : > { %v3885_v19 = vpop.f32.mrb[111].mxu1 }
 0x264   : > { %v6591_v7 = vpop.f32.mrb[184].mxu0 }
 0x265   : > { %v6539_v52 = vpop.f32.mrb[112].mxu1  ;;  %v9230_v2 = vpop.f32.mrb[185].mxu0 }
 0x266   : > { %v4129_v10 = vpop.f32.mrb[113].mxu1 }
 0x268   : > { %v6594_v9 = vpop.f32.mrb[186].mxu0 }
 0x269   : > { %v6542_v44 = vpop.f32.mrb[114].mxu1  ;;  %v4446_v18 = vpop.f32.mrb[187].mxu0 }
 0x26a   : > { %v4137_v60 = vpop.f32.mrb[115].mxu1  ;;  %v4509_v18 = vrot.slane %v9230_v2, 1 }
 0x26c   : > { %v6597_v17 = vpop.f32.mrb[188].mxu0 }
 0x26d   : > { %v6545_v34 = vpop.f32.mrb[116].mxu1  ;;  %v4454_v16 = vpop.f32.mrb[189].mxu0 }
 0x26e   : > { %v4202_v47 = vrot.slane %v6545_v34, 2  ;;  %v4145_v49 = vpop.f32.mrb[117].mxu1 }
 0x26f   : > { %v4201_v3 = vrot.slane %v4145_v49, 2 }
 0x270   : > { %v6600_v15 = vpop.f32.mrb[190].mxu0 }
 0x271   : > { %v6548_v5 = vpop.f32.mrb[118].mxu1  ;;  %v4217_v8 = vsel %vm1342_vm3, %v4201_v3, %v4202_v47  ;;  %v4462_v13 = vpop.f32.mrb[191].mxu0 }
 0x272   : > { %v4204_v12 = vrot.slane %v6548_v5, 2  ;;  %v4155_v40 = vpop.f32.mrb[119].mxu1  ;;  %v9234_v56 = vadd.f32 %v6774_v28, %v4217_v8 }
 0x273   : > { %v4203_v20 = vrot.slane %v4155_v40, 2 }
 0x274   : > { %v6603_v21 = vpop.f32.mrb[192].mxu0 }
 0x275   : > { %v6551_v0 = vpop.f32.mrb[120].mxu1  ;;  %v4216_v61 = vsel %vm1342_vm3, %v4202_v47, %v4203_v20  ;;  %v4215_v50 = vsel %vm1342_vm3, %v4203_v20, %v4204_v12  ;;  %v4511_v62 = vrot.slane %v6603_v21, 1  ;;  %v4470_v58 = vpop.f32.mrb[193].mxu0 }
 0x276   : > { %v4206_v32 = vrot.slane %v6551_v0, 2  ;;  %v4165_v37 = vpop.f32.mrb[121].mxu1  ;;  %v6771_v30 = vadd.f32 %v6770_v6, %v4216_v61  ;;  %v9240_v59 = vadd.f32 %v6782_v55, %v4215_v50  ;;  %v4510_v23 = vrot.slane %v4470_v58, 1 }
 0x277   : > { %v4205_v27 = vrot.slane %v4165_v37, 2 }
 0x278   : > { %v6606_v36 = vpop.f32.mrb[194].mxu0  ;;  %v9244_v11 = vsel %vm819_vm2, %v4510_v23, %v4511_v62 }
 0x279   : > { %v6554_v28 = vpop.f32.mrb[122].mxu1  ;;  %v4214_v33 = vsel %vm1342_vm3, %v4204_v12, %v4205_v27  ;;  %v4213_v4 = vsel %vm1342_vm3, %v4205_v27, %v4206_v32  ;;  %v4513_v41 = vrot.slane %v6606_v36, 1  ;;  %v4480_v6 = vpop.f32.mrb[195].mxu0 }
 0x27a   : > { %v4208_v51 = vrot.slane %v6554_v28, 2  ;;  %v4175_v39 = vpop.f32.mrb[123].mxu1  ;;  %v6779_v55 = vadd.f32 %v6778_v25, %v4214_v33  ;;  %v9250_v38 = vadd.f32 %v6790_v24, %v4213_v4  ;;  %v4512_v31 = vrot.slane %v4480_v6, 1 }
 0x27b   : > { %v4207_v26 = vrot.slane %v4175_v39, 2 }
 0x27c   : > { %v6609_v22 = vpop.f32.mrb[196].mxu0  ;;  %v4523_v54 = vsel %vm819_vm2, %v4511_v62, %v4512_v31  ;;  %v4522_v48 = vsel %vm819_vm2, %v4512_v31, %v4513_v41 }
 0x27d   : > { %v6557_v29 = vpop.f32.mrb[124].mxu1  ;;  %v4212_v45 = vsel %vm1342_vm3, %v4206_v32, %v4207_v26  ;;  %v4211_v53 = vsel %vm1342_vm3, %v4207_v26, %v4208_v51  ;;  %v4515_v1 = vrot.slane %v6609_v22, 1  ;;  %v4490_v24 = vpop.f32.mrb[197].mxu0 }
 0x27e   : > { %v4185_v25 = vpop.f32.mrb[125].mxu1  ;;  %v6787_v63 = vadd.f32 %v9222_v57, %v4212_v45  ;;  %v9262_v19 = vadd.f32 %v9224_v14, %v4211_v53  ;;  %v4514_v52 = vrot.slane %v4490_v24, 1 }
 0x27f   : > { %v4209_v46 = vrot.slane %v4185_v25, 2 }
 0x280   : > { %v6612_v10 = vpop.f32.mrb[198].mxu0  ;;  %v4521_v44 = vsel %vm819_vm2, %v4513_v41, %v4514_v52  ;;  %v9268_v9 = vsel %vm819_vm2, %v4514_v52, %v4515_v1 }
 0x281   : > { %v6560_v7 = vpop.f32.mrb[126].mxu1  ;;  %v4210_v60 = vsel %vm1342_vm3, %v4208_v51, %v4209_v46  ;;  %v4517_v57 = vrot.slane %v6612_v10, 1  ;;  %v4500_v14 = vpop.f32.mrb[199].mxu0 }
 0x282   : > { %v4194_v34 = vpop.f32.mrb[127].mxu1  ;;  %v9274_v17 = vadd.f32 %v9228_v35, %v4210_v60  ;;  %v4516_v47 = vrot.slane %v4500_v14, 1 }
 0x283   : > { %v9278_v49 = vsel %vm819_vm2, %v4517_v57, %v4509_v18 }
 0x284   : > { %v6617_v3 = vpop.f32.mrb[200].mxu0  ;;  %v4519_v5 = vsel %vm819_vm2, %v4515_v1, %v4516_v47  ;;  %v9284_v15 = vsel %vm819_vm2, %v4516_v47, %v4517_v57 }
 0x285   : > { %v6565_v16 = vpop.f32.mrb[128].mxu1  ;;  %v9286_v8 = vpop.f32.mrb[201].mxu0 }
 0x286   : > { %v4292_v2 = vpop.f32.mrb[129].mxu1  ;;  %v4672_v14 = vrot.slane %v9286_v8, 2 }
 0x288   : > { %v6620_v35 = vpop.f32.mrb[202].mxu0 }
 0x289   : > { %v6568_v12 = vpop.f32.mrb[130].mxu1  ;;  %v4609_v13 = vpop.f32.mrb[203].mxu0 }
 0x28a   : > { %v4300_v40 = vpop.f32.mrb[131].mxu1 }
 0x28c   : > { %v6623_v0 = vpop.f32.mrb[204].mxu0 }
 0x28d   : > { %v6571_v20 = vpop.f32.mrb[132].mxu1  ;;  %v4617_v61 = vpop.f32.mrb[205].mxu0 }
 0x28e   : > { %v4308_v21 = vpop.f32.mrb[133].mxu1 }
 0x290   : > { %v6626_v32 = vpop.f32.mrb[206].mxu0 }
 0x291   : > { %v6574_v50 = vpop.f32.mrb[134].mxu1  ;;  %v4625_v37 = vpop.f32.mrb[207].mxu0 }
 0x292   : > { %v4316_v62 = vpop.f32.mrb[135].mxu1 }
 0x294   : > { %v6629_v27 = vpop.f32.mrb[208].mxu0 }
 0x295   : > { %v6577_v58 = vpop.f32.mrb[88].mxu1  ;;  %v4674_v28 = vrot.slane %v6629_v27, 2  ;;  %v4633_v33 = vpop.f32.mrb[209].mxu0 }
 0x296   : > { %v6772_v23 = vadd.f32 %v6771_v30, %v6577_v58  ;;  %v4324_v36 = vpop.f32.mrb[89].mxu1  ;;  %v4673_v51 = vrot.slane %v4633_v33, 2 }
 0x297   : > { %v6776_v4 = vadd.f32 %v9234_v56, %v4324_v36 }
 0x298   : > { %v4527_v41 = vadd.f32 %v6772_v23, %v4523_v54  ;;  %v4687_v6 = vsel %vm1342_vm3, %v4673_v51, %v4674_v28  ;;  %v6632_v31 = vpop.f32.mrb[210].mxu0 }
 0x299   : > { %v4526_v39 = vadd.f32 %v6776_v4, %v9244_v11  ;;  %v6580_v26 = vpop.f32.mrb[90].mxu1  ;;  %v4676_v22 = vrot.slane %v6632_v31, 2  ;;  %v4643_v53 = vpop.f32.mrb[211].mxu0 }
 0x29a   : > { %v6780_v29 = vadd.f32 %v6779_v55, %v6580_v26  ;;  %v4334_v45 = vpop.f32.mrb[91].mxu1  ;;  %v4675_v25 = vrot.slane %v4643_v53, 2 }
 0x29b   : > { %v4689_v1 = vadd.f32 %v4687_v6, %v4526_v39  ;;  %v6784_v30 = vadd.f32 %v9240_v59, %v4334_v45 }
 0x29c   : > { %v4529_v24 = vadd.f32 %v6780_v29, %v4521_v44  ;;  %v4685_v11 = vsel %vm1342_vm3, %v4675_v25, %v4676_v22  ;;  %v4686_v54 = vsel %vm1342_vm3, %v4674_v28, %v4675_v25  ;;  %v6635_v55 = vpop.f32.mrb[212].mxu0 }
 0x29d   : > { %v4768_v56 = vadd.f32 %v8995_v43, %v4689_v1  ;;  %v4528_v46 = vadd.f32 %v6784_v30, %v4522_v48  ;;  %v6583_v52 = vpop.f32.mrb[92].mxu1  ;;  %v4690_v7 = vadd.f32 %v4686_v54, %v4527_v41  ;;  %v4678_v60 = vrot.slane %v6635_v55, 2  ;;  %v4653_v59 = vpop.f32.mrb[213].mxu0 }
 0x29e   : > { %v6788_v10 = vadd.f32 %v6787_v63, %v6583_v52  ;;  %v4344_v18 = vpop.f32.mrb[93].mxu1  ;;  %v4677_v34 = vrot.slane %v4653_v59, 2 }
 0x29f   : > { %v4776_v44 = vmax.f32 %v4768_v56, 0.0  ;;  %v4691_v57 = vadd.f32 %v4685_v11, %v4528_v46  ;;  %v6792_v48 = vadd.f32 %v9250_v38, %v4344_v18  ;;  %v4769_v47 = vadd.f32 %v8995_v43, %v4690_v7 }
 0x2a0   : > { %v4531_v16 = vadd.f32 %v6788_v10, %v4519_v5  ;;  %v4683_v2 = vsel %vm1342_vm3, %v4677_v34, %v4678_v60  ;;  %v4684_v12 = vsel %vm1342_vm3, %v4676_v22, %v4677_v34  ;;  %v6638_v38 = vpop.f32.mrb[214].mxu0 }
 0x2a1   : > { %4816 = vst [vmem:[%s9022_s27 + $0xc0] sm:$0xff] %v4776_v44  ;;  %v4770_v3 = vadd.f32 %v8995_v43, %v4691_v57  ;;  %v4530_v63 = vadd.f32 %v6792_v48, %v9268_v9  ;;  %v6586_v35 = vpop.f32.mrb[94].mxu1  ;;  %v4777_v8 = vmax.f32 %v4769_v47, 0.0  ;;  %v4692_v40 = vadd.f32 %v4684_v12, %v4529_v24  ;;  %v4663_v0 = vpop.f32.mrb[215].mxu0 }
 0x2a2   : > { %v6796_v5 = vadd.f32 %v9274_v17, %v6586_v35  ;;  %v4680_v13 = vrot.slane %v6638_v38, 2  ;;  %v4354_v20 = vpop.f32.mrb[95].mxu1  ;;  %v4679_v50 = vrot.slane %v4663_v0, 2 }
 0x2a3   : > { %v4778_v9 = vmax.f32 %v4770_v3, 0.0  ;;  %v4693_v21 = vadd.f32 %v4683_v2, %v4530_v63  ;;  %v6800_v61 = vadd.f32 %v9262_v19, %v4354_v20  ;;  %4817 = vst [vmem:[%s9022_s27 + $0xc8] sm:$0xff] %v4777_v8  ;;  %v4771_v32 = vadd.f32 %v8995_v43, %v4692_v40 }
 0x2a4   : > { %v4533_v62 = vadd.f32 %v6796_v5, %v9278_v49  ;;  %v4688_v37 = vsel %vm1342_vm3, %v4680_v13, %v4672_v14  ;;  %v4681_v19 = vsel %vm1342_vm3, %v4679_v50, %v4680_v13  ;;  %v4682_v27 = vsel %vm1342_vm3, %v4678_v60, %v4679_v50 }
 0x2a5   : > { %4818 = vst [vmem:[%s9022_s27 + $0xd0] sm:$0xff] %v4778_v9  ;;  %v4772_v17 = vadd.f32 %v8995_v43, %v4693_v21  ;;  %v4532_v58 = vadd.f32 %v6800_v61, %v9284_v15  ;;  %v4779_v23 = vmax.f32 %v4771_v32, 0.0  ;;  %v4694_v49 = vadd.f32 %v4682_v27, %v4531_v16 }
 0x2a6   : > { %v4696_v28 = vadd.f32 %v4688_v37, %v4533_v62 }
 0x2a7   : > { %v4780_v36 = vmax.f32 %v4772_v17, 0.0  ;;  %v4695_v33 = vadd.f32 %v4681_v19, %v4532_v58  ;;  %4819 = vst [vmem:[%s9022_s27 + $0xd8] sm:$0xff] %v4779_v23  ;;  %v4773_v4 = vadd.f32 %v8995_v43, %v4694_v49 }
 0x2a8   : > { %v4775_v15 = vadd.f32 %v8995_v43, %v4696_v28 }
 0x2a9   : > { %4820 = vst [vmem:[%s9022_s27 + $0xe0] sm:$0xff] %v4780_v36  ;;  %v4774_v42 = vadd.f32 %v8995_v43, %v4695_v33  ;;  %v4781_v41 = vmax.f32 %v4773_v4, 0.0 }
 0x2aa   : > { %v4783_v51 = vmax.f32 %v4775_v15, 0.0 }
 0x2ab   : > { %v4782_v39 = vmax.f32 %v4774_v42, 0.0  ;;  %4821 = vst [vmem:[%s9022_s27 + $0xe8] sm:$0xff] %v4781_v41 }
 0x2ac   : > { %4823 = vst [vmem:[%s9022_s27 + $0xf8] sm:$0xff] %v4783_v51 }
 0x2ad   : > { %4822 = vst [vmem:[%s9022_s27 + $0xf0] sm:$0xff] %v4782_v39 }
 0x2ae   : > { %6982 = shalt.err (!%p6979_p10)
}
 0x2af   : > { %s6983_s13 = scalar_lea.hbm %s9333_s10, 4096  ;;  %s6987_s21 = scalar_lea.hbm %s9399_s5, 16384 }
 0x2b0   : > { %p6984_p11 = scmp.ne.s32.totalorder %s9333_s10, %s6983_s13  ;;  %p6988_p0 = scmp.lt.u32.totalorder %s9333_s10, %s9399_s5 }
 0x2b1   : > { %p6989_p1 = scmp.lt.u32.totalorder %s6987_s21, %s6983_s13  ;;  %p6991_p4 = scmp.lt.u32.totalorder %s6983_s13, %s9333_s10 }
 0x2b2   : > { %p6985_p12 = pnand %p6984_p11, %p7149_p3 }
 0x2b3   : > { %p6990_p2 = por %p6989_p1, %p6988_p0 }
 0x2b4   : > { %p6986_p13 = pneg %p6985_p12 }
 0x2b5   : > { %p6992_p5 = por %p6991_p4, %p6990_p2 }
 0x2b7   : > { %p6993_p6 = pnand %p6992_p5, %p6986_p13 }
 0x2b9   : > { %6996 = shalt.err (!%p6993_p6)
}
 0x2ba   : > { %s7066_s9 = smov 128   ;;  %s7067_s15 = smov 8  }
 0x2bb   : > { %6882 = dma.vmem_to_hbm [thread:$0]  (%p7149_p3), %s9335_s14, 4096, %s9333_s10, %s9342_s12, %s7066_s9, %s7066_s9, %s7067_s15  }
 0x2bc PF: > { %p6888_p7 = scmp.ge.s32.totalorder %s7063_s25, 2  ;;  %s4856_s17 = sand.u32 1, %s7035_s18  }
 0x2bd   : > { %s4857_s26 = scalar_lea.sflag [#allocation3], %s4856_s17 }
 0x2be   : > { %p6885_p9 = pnand %p6888_p7, %p7158_p8 }
 0x2c0   : > { %7030 = dma.done.wait (!%p6885_p9), %s4857_s26, 4096  }
 0x2c1   : > { %7032 = vsyncadd (!%p6885_p9), %s4857_s26, 4294963200  ;;  %s18_s25 = sadd.s32 1, %s7063_s25   ;;  %s9403_s18 = smov %s7039_s19 }
 0x2c2   : > { %p15_p10 = scmp.ge.s32.totalorder %s18_s25, 6   ;;  %s9404_s19 = smov %s7043_s20 }
 0x2c3   : > { %s9405_s20 = smov %s7167_s11  ;;  %s9406_s21 = smov %s7055_s23 }
 0x2c4   : > { %s9407_s22 = smov %s7059_s24  ;;  %s9408_s23 = smov %s9411_s28 }
 0x2c5   : > { %s9409_s24 = smov %s9415_s29  ;;  %17 = sbr.rel (!%p15_p10) target bundleno = 5 (0x5), region = 96 }
 0x2cc   :  { %4862 = vsyncpa [#allocation3], 1 }
 0x2cd   :  { %4864 = vsyncpa [#allocation3 + $0x1], 1 }

</bundles_post_ra>
